<compile_context>
chip_gen: v6e
topology: v6e:2x2x1
jax: 0.10.0
libtpu: 0.0.40
codegen_flags: <defaults>
</compile_context>

<pallas_src>
import functools
import math

import jax
import jax.numpy as jnp
from jax.experimental import pallas as pl
from jax.experimental.pallas import tpu as pltpu

LANE = 128     # lane width: E/R/H padded to multiples of this
SUBLANE = 8    # batch tiles are multiples of 8 sublanes


# ----------------------------------------------------------------------------
# Small helpers (padding, VMEM budgeting, single-buffered resident blocks).
# ----------------------------------------------------------------------------
def _round_up(x, m):
    return (x + m - 1) // m * m


def _pad_axis(x, axis, new_size):
    pad = new_size - x.shape[axis]
    if pad <= 0:
        return x
    widths = [(0, 0)] * x.ndim
    widths[axis] = (0, pad)
    return jnp.pad(x, widths)


def _nbytes(shape, dtype):
    return math.prod(shape) * jnp.dtype(dtype).itemsize


def _vmem_limit_bytes(entries):
    """entries: iterable of (bytes_per_buffer, num_buffers)."""
    est = sum(int(nb) * int(cnt) for nb, cnt in entries)
    est = int(est * 1.5) + (4 << 20)          # headroom for compiler temps
    # Cap below v7x's 64 MiB physical VMEM (raise toward ~100 MiB on v5e/v6e
    # if larger tiles are wanted).
    return int(min(max(est, 32 << 20), 56 << 20))


_RESIDENT_OK = True   # flips to False if this jax build rejects Buffered(1)


def _resident_spec(block_shape, index_map, resident):
    """BlockSpec for a block whose index never changes (weights / biases).

    Requests a single VMEM buffer (no double-buffering) so large resident
    weights don't pay 2x VMEM; falls back to a plain spec on jax versions
    without BlockSpec.pipeline_mode / pl.Buffered.
    """
    if resident and _RESIDENT_OK:
        try:
            return pl.BlockSpec(block_shape, index_map,
                                pipeline_mode=pl.Buffered(buffer_count=1))
        except Exception:  # older jax: kwarg/class missing
            pass
    return pl.BlockSpec(block_shape, index_map)


def _try_resident_then_fallback(make_call):
    """Run make_call(resident=True); if the installed Mosaic rejects
    single-buffered resident blocks, fall back to default double-buffering."""
    global _RESIDENT_OK
    if _RESIDENT_OK:
        try:
            return make_call(True)
        except Exception:
            _RESIDENT_OK = False
    return make_call(False)


# ----------------------------------------------------------------------------
# Parameter fusion + lane padding (precompute once per model in production).
# ----------------------------------------------------------------------------
def _pad_gate_cols(w, R, Rp):
    """(K, 5*R) -> (K, 5*Rp): pad each of the 5 gate column groups to Rp lanes
    so the in/forget/out/transform slices land on 128-lane boundaries."""
    K = w.shape[0]
    return _pad_axis(w.reshape(K, 5, R), 2, Rp).reshape(K, 5 * Rp)


def _prepare_params(params, E, R, H, mxu_dtype):
    """Fuse i2h/h2h/a2h into one (Ep+2Rp, 5Rp) matrix + pre-summed bias, drop
    alpha_net's bias (per-row constant, cancels in softmax), and zero-pad all
    contraction/output dims to 128-lane multiples (exact no-ops)."""
    f32 = jnp.float32
    Ep, Rp, Hp = (_round_up(d, LANE) for d in (E, R, H))

    w_h2att = _pad_axis(_pad_axis(params["w_h2att"].astype(f32), 0, Rp), 1, Hp)
    b_h2att = _pad_axis(params["b_h2att"].reshape(1, -1).astype(f32), 1, Hp)
    w_alpha = _pad_axis(params["w_alpha"].reshape(1, 1, -1).astype(f32), 2, Hp)

    def fuse(w, rows_p):
        return _pad_axis(_pad_gate_cols(w.astype(f32), R, Rp), 0, rows_p)

    w_gates = jnp.concatenate([fuse(params["w_i2h"], Ep),
                               fuse(params["w_h2h"], Rp),
                               fuse(params["w_a2h"], Rp)], axis=0)
    b_gates = _pad_gate_cols(
        (params["b_i2h"] + params["b_h2h"] + params["b_a2h"])
        .reshape(1, -1).astype(f32), R, Rp)

    return dict(w_h2att=w_h2att.astype(mxu_dtype), b_h2att=b_h2att,
                w_alpha=w_alpha, w_gates=w_gates.astype(mxu_dtype),
                b_gates=b_gates, Ep=Ep, Rp=Rp, Hp=Hp)


# ----------------------------------------------------------------------------
# Shared per-step math (everything stays in VMEM / vregs).
# ----------------------------------------------------------------------------
def _attention_and_cell(xt, h, c, att_ref, p_att_ref, mask,
                        w_h2att, b_h2att, w_alpha, w_gates, b_gates,
                        *, l_chunk=128):
    f32 = jnp.float32

    # ---------------- Attention ----------------
    att_h = jnp.dot(h.astype(w_h2att.dtype), w_h2att,
                    preferred_element_type=f32) + b_h2att          # (Bt, Hp)

    p_att = p_att_ref[...]                                         # (Bt, L, Hp)
    feat_dtype = p_att.dtype
    # tanh + alpha reduction run in the feature dtype (bf16 on v6e/v7x doubles
    # EUP/VPU throughput and halves the temp); reduce accumulates in f32.
    dot = jnp.tanh(p_att + att_h.astype(feat_dtype)[:, None, :])   # (Bt, L, Hp)
    logits = jnp.sum((dot * w_alpha.astype(feat_dtype)).astype(f32),
                     axis=-1)                                      # (Bt, L)

    # Softmax + optional mask re-normalization collapsed into ONE normalization:
    #   w_i = e_i * m_i / sum_j(e_j * m_j)
    m = jnp.max(logits, axis=-1, keepdims=True)
    e = jnp.exp(logits - m)
    if mask is not None:
        e = e * mask
    denom = jnp.maximum(jnp.sum(e, axis=-1, keepdims=True), 1e-9)  # masked rows
    weight = e * pl.reciprocal(denom, approx=True)                 # (Bt, L)

    # att_res = bmm(weight, att_feats): L-chunked VPU reduction (MXU stays free,
    # no full (Bt, L, Rp) broadcast temp is materialized).
    Bt, L, Rp = att_ref.shape
    w_f = weight.astype(feat_dtype)
    att_res = jnp.zeros((Bt, Rp), f32)
    step = min(l_chunk, L)
    for l0 in range(0, L, step):
        lc = min(step, L - l0)
        blk = att_ref[:, pl.ds(l0, lc), :]
        att_res = att_res + jnp.sum(
            (w_f[:, l0:l0 + lc, None] * blk).astype(f32), axis=1)

    # ---------------- Fused LSTM-style gates ----------------
    # One MXU matmul over [xt | h | att_res]; concat boundaries are 128-aligned.
    xha = jnp.concatenate([xt.astype(w_gates.dtype), h.astype(w_gates.dtype),
                           att_res.astype(w_gates.dtype)], axis=-1)
    all_sums = jnp.dot(xha, w_gates, preferred_element_type=f32) + b_gates

    sig = jax.nn.sigmoid(all_sums[:, :3 * Rp])
    in_gate = sig[:, :Rp]
    forget_gate = sig[:, Rp:2 * Rp]
    out_gate = sig[:, 2 * Rp:]
    in_transform = jnp.maximum(all_sums[:, 3 * Rp:4 * Rp], all_sums[:, 4 * Rp:])

    next_c = forget_gate * c + in_gate * in_transform
    next_h = out_gate * jnp.tanh(next_c)
    return next_h, next_c


# ----------------------------------------------------------------------------
# Single decode step (module-parity forward).
# ----------------------------------------------------------------------------
def _att2all2_step_kernel(*refs, has_mask, rp):
    if has_mask:
        (xt_ref, h_ref, c_ref, att_ref, p_att_ref, mask_ref,
         w_h2att_ref, b_h2att_ref, w_alpha_ref, w_gates_ref, b_gates_ref,
         hc_ref) = refs
        mask = mask_ref[...]
    else:
        (xt_ref, h_ref, c_ref, att_ref, p_att_ref,
         w_h2att_ref, b_h2att_ref, w_alpha_ref, w_gates_ref, b_gates_ref,
         hc_ref) = refs
        mask = None

    next_h, next_c = _attention_and_cell(
        xt_ref[...], h_ref[...], c_ref[...], att_ref, p_att_ref, mask,
        w_h2att_ref[...], b_h2att_ref[...], w_alpha_ref[...],
        w_gates_ref[...], b_gates_ref[...])

    # Two lane-aligned sub-slice stores (no concat/relayout).  Eval-mode
    # dropout on `output` is the identity, so next_h is stored only once.
    hc_ref[:, :rp] = next_h
    hc_ref[:, rp:] = next_c
    # TODO(synk): training-mode dropout (drop_prob_lm) would need in-kernel
    #             PRNG (pltpu.prng_*); eval-mode dropout is the identity.


def att2all2_core(xt, fc_feats, att_feats, p_att_feats, state, params,
                  att_masks=None, *, mxu_dtype=jnp.float32,
                  feat_dtype=jnp.float32, block_b=8):
    """Pallas implementation of Att2all2Core.forward (one decode step).

    xt (B,E), att_feats (B,L,R), p_att_feats (B,L,H), state ((1,B,R),(1,B,R)).
    Returns (output, (next_h[None], next_c[None])); output == next_h because
    eval-mode dropout is the identity.

    mxu_dtype=bf16 is safe on v5e/v6e/v7x (MXU consumes bf16, f32 accumulate);
    feat_dtype=bf16 halves att/p_att HBM traffic + VMEM and runs the large
    tanh on the bf16 EUP path (v6e/v7x).  Softmax / cell math stays f32.
    """
    del fc_feats                                    # unused by the forward pass
    h = state[0][-1]
    c = state[1][-1]
    B, L, R = att_feats.shape
    E = xt.shape[-1]
    H = p_att_feats.shape[-1]
    f32 = jnp.float32

    prep = _prepare_params(params, E, R, H, mxu_dtype)
    Ep, Rp, Hp = prep["Ep"], prep["Rp"], prep["Hp"]

    block_b = min(_round_up(max(block_b, SUBLANE), SUBLANE),
                  _round_up(B, SUBLANE))
    Bp = _round_up(B, block_b)
    nb = Bp // block_b

    xt_p = _pad_axis(_pad_axis(xt.astype(f32), 1, Ep), 0, Bp)
    h_p = _pad_axis(_pad_axis(h.astype(f32), 1, Rp), 0, Bp)
    c_p = _pad_axis(_pad_axis(c.astype(f32), 1, Rp), 0, Bp)
    att_p = _pad_axis(_pad_axis(att_feats, 2, Rp), 0, Bp).astype(feat_dtype)
    patt_p = _pad_axis(_pad_axis(p_att_feats, 2, Hp), 0, Bp).astype(feat_dtype)

    has_mask = att_masks is not None
    weights = (prep["w_h2att"], prep["b_h2att"], prep["w_alpha"],
               prep["w_gates"], prep["b_gates"])

    inputs = [xt_p, h_p, c_p, att_p, patt_p]
    if has_mask:
        inputs.append(_pad_axis(att_masks.reshape(B, L).astype(f32), 0, Bp))
    inputs.extend(weights)

    bmap2 = lambda b: (b, 0)
    bmap3 = lambda b: (b, 0, 0)
    wmap2 = lambda b: (0, 0)
    wmap3 = lambda b: (0, 0, 0)

    vmem_limit = _vmem_limit_bytes([
        (_nbytes((block_b, Ep), f32), 2),
        (_nbytes((block_b, Rp), f32), 4),                      # h, c blocks
        (_nbytes((block_b, L, Rp), feat_dtype), 2),
        (_nbytes((block_b, L, Hp), feat_dtype), 2),
        (_nbytes((block_b, L), f32), 2 if has_mask else 0),
        (sum(int(w.size) * w.dtype.itemsize for w in weights), 1),
        (_nbytes((block_b, 2 * Rp), f32), 2),                  # output
        (_nbytes((block_b, L, Hp), f32), 3),                   # elementwise temps
    ])

    def make_call(resident):
        in_specs = [
            pl.BlockSpec((block_b, Ep), bmap2),
            pl.BlockSpec((block_b, Rp), bmap2),
            pl.BlockSpec((block_b, Rp), bmap2),
            pl.BlockSpec((block_b, L, Rp), bmap3),
            pl.BlockSpec((block_b, L, Hp), bmap3),
        ]
        if has_mask:
            in_specs.append(pl.BlockSpec((block_b, L), bmap2))
        in_specs += [
            _resident_spec(weights[0].shape, wmap2, resident),
            _resident_spec(weights[1].shape, wmap2, resident),
            _resident_spec(weights[2].shape, wmap3, resident),
            _resident_spec(weights[3].shape, wmap2, resident),
            _resident_spec(weights[4].shape, wmap2, resident),
        ]
        return pl.pallas_call(
            functools.partial(_att2all2_step_kernel, has_mask=has_mask, rp=Rp),
            out_shape=jax.ShapeDtypeStruct((Bp, 2 * Rp), f32),
            grid=(nb,),
            in_specs=in_specs,
            out_specs=pl.BlockSpec((block_b, 2 * Rp), bmap2),
            compiler_params=pltpu.CompilerParams(
                dimension_semantics=("parallel",),   # batch tiles -> 2 TCs (v7x)
                vmem_limit_bytes=vmem_limit),
        )(*inputs)

    hc = _try_resident_then_fallback(make_call)
    next_h = hc[:B, :R]
    next_c = hc[:B, Rp:Rp + R]
    return next_h, (next_h[None], next_c[None])


# ----------------------------------------------------------------------------
# Time-fused rollout: T decode steps in one pallas_call, grid=(B_tiles, T).
# Weights / att features stay resident in VMEM; h/c carried in VMEM scratch.
# ----------------------------------------------------------------------------
def _att2all2_rollout_kernel(*refs, has_mask):
    if has_mask:
        (xt_ref, h0_ref, c0_ref, att_ref, p_att_ref, mask_ref,
         w_h2att_ref, b_h2att_ref, w_alpha_ref, w_gates_ref, b_gates_ref,
         h_seq_ref, c_out_ref, h_scr, c_scr) = refs
        mask = mask_ref[...]
    else:
        (xt_ref, h0_ref, c0_ref, att_ref, p_att_ref,
         w_h2att_ref, b_h2att_ref, w_alpha_ref, w_gates_ref, b_gates_ref,
         h_seq_ref, c_out_ref, h_scr, c_scr) = refs
        mask = None

    t = pl.program_id(1)

    @pl.when(t == 0)
    def _():
        h_scr[...] = h0_ref[...]
        c_scr[...] = c0_ref[...]

    next_h, next_c = _attention_and_cell(
        xt_ref[0], h_scr[...], c_scr[...], att_ref, p_att_ref, mask,
        w_h2att_ref[...], b_h2att_ref[...], w_alpha_ref[...],
        w_gates_ref[...], b_gates_ref[...])

    h_scr[...] = next_h
    c_scr[...] = next_c
    h_seq_ref[0] = next_h      # per-step output: h only (c_seq is never used)
    c_out_ref[...] = next_c    # revisited block: HBM writeback only after t==T-1


def att2all2_core_rollout(xt_seq, att_feats, p_att_feats, state, params,
                          att_masks=None, *, mxu_dtype=jnp.float32,
                          feat_dtype=jnp.float32, block_b=8):
    """Run T Att2all2Core steps inside one kernel (amortizes launch/weight DMA).

    xt_seq: (T, B, E) teacher-forced inputs.  Returns (h_seq (T,B,R),
    (h_T[None], c_T[None])).  Batch axis is tiled & "parallel"; time axis is
    "arbitrary" with h/c carried in VMEM scratch.
    """
    T, B, E = xt_seq.shape
    _, L, R = att_feats.shape
    H = p_att_feats.shape[-1]
    f32 = jnp.float32
    h0 = state[0][-1]
    c0 = state[1][-1]

    prep = _prepare_params(params, E, R, H, mxu_dtype)
    Ep, Rp, Hp = prep["Ep"], prep["Rp"], prep["Hp"]

    block_b = min(_round_up(max(block_b, SUBLANE), SUBLANE),
                  _round_up(B, SUBLANE))
    Bp = _round_up(B, block_b)
    nb = Bp // block_b

    xt_p = _pad_axis(_pad_axis(xt_seq.astype(f32), 2, Ep), 1, Bp)
    h0_p = _pad_axis(_pad_axis(h0.astype(f32), 1, Rp), 0, Bp)
    c0_p = _pad_axis(_pad_axis(c0.astype(f32), 1, Rp), 0, Bp)
    att_p = _pad_axis(_pad_axis(att_feats, 2, Rp), 0, Bp).astype(feat_dtype)
    patt_p = _pad_axis(_pad_axis(p_att_feats, 2, Hp), 0, Bp).astype(feat_dtype)

    has_mask = att_masks is not None
    weights = (prep["w_h2att"], prep["b_h2att"], prep["w_alpha"],
               prep["w_gates"], prep["b_gates"])

    inputs = [xt_p, h0_p, c0_p, att_p, patt_p]
    if has_mask:
        inputs.append(_pad_axis(att_masks.reshape(B, L).astype(f32), 0, Bp))
    inputs.extend(weights)

    bmap2 = lambda b, t: (b, 0)
    bmap3 = lambda b, t: (b, 0, 0)
    wmap2 = lambda b, t: (0, 0)
    wmap3 = lambda b, t: (0, 0, 0)

    vmem_limit = _vmem_limit_bytes([
        (_nbytes((1, block_b, Ep), f32), 2),
        (_nbytes((block_b, Rp), f32), 4),                      # h0, c0 blocks
        (_nbytes((block_b, L, Rp), feat_dtype), 2),
        (_nbytes((block_b, L, Hp), feat_dtype), 2),
        (_nbytes((block_b, L), f32), 2 if has_mask else 0),
        (sum(int(w.size) * w.dtype.itemsize for w in weights), 1),
        (_nbytes((1, block_b, Rp), f32), 2),                   # h_seq block
        (_nbytes((block_b, Rp), f32), 2),                      # c_T block
        (_nbytes((block_b, Rp), f32), 2),                      # h/c scratch
        (_nbytes((block_b, L, Hp), f32), 3),                   # elementwise temps
    ])

    out_shape = (jax.ShapeDtypeStruct((T, Bp, Rp), f32),
                 jax.ShapeDtypeStruct((Bp, Rp), f32))

    def make_call(resident):
        in_specs = [
            pl.BlockSpec((1, block_b, Ep), lambda b, t: (t, b, 0)),
            pl.BlockSpec((block_b, Rp), bmap2),
            pl.BlockSpec((block_b, Rp), bmap2),
            pl.BlockSpec((block_b, L, Rp), bmap3),
            pl.BlockSpec((block_b, L, Hp), bmap3),
        ]
        if has_mask:
            in_specs.append(pl.BlockSpec((block_b, L), bmap2))
        in_specs += [
            _resident_spec(weights[0].shape, wmap2, resident),
            _resident_spec(weights[1].shape, wmap2, resident),
            _resident_spec(weights[2].shape, wmap3, resident),
            _resident_spec(weights[3].shape, wmap2, resident),
            _resident_spec(weights[4].shape, wmap2, resident),
        ]
        out_specs = [
            pl.BlockSpec((1, block_b, Rp), lambda b, t: (t, b, 0)),
            pl.BlockSpec((block_b, Rp), bmap2),
        ]
        return pl.pallas_call(
            functools.partial(_att2all2_rollout_kernel, has_mask=has_mask),
            out_shape=out_shape,
            grid_spec=pltpu.PrefetchScalarGridSpec(
                num_scalar_prefetch=0,
                grid=(nb, T),
                in_specs=in_specs,
                out_specs=out_specs,
                scratch_shapes=[pltpu.VMEM((block_b, Rp), f32),
                                pltpu.VMEM((block_b, Rp), f32)]),
            compiler_params=pltpu.CompilerParams(
                dimension_semantics=("parallel", "arbitrary"),
                vmem_limit_bytes=vmem_limit),
        )(*inputs)

    h_seq_p, c_last_p = _try_resident_then_fallback(make_call)
    h_seq = h_seq_p[:, :B, :R]
    c_T = c_last_p[:B, :R]
    return h_seq, (h_seq[-1][None], c_T[None])


# ----------------------------------------------------------------------------
# Pure-JAX reference mirroring the PyTorch module (un-fused params).
# ----------------------------------------------------------------------------
def _reference(xt, att_feats, p_att_feats, h, c, params, att_masks=None):
    att_h = h @ params["w_h2att"] + params["b_h2att"]
    dot = jnp.tanh(p_att_feats + att_h[:, None, :])
    logits = jnp.einsum("blh,h->bl", dot, params["w_alpha"]) + params["b_alpha"]
    weight = jax.nn.softmax(logits, axis=1)
    if att_masks is not None:
        weight = weight * att_masks
        weight = weight / jnp.sum(weight, axis=1, keepdims=True)
    att_res = jnp.einsum("bl,blr->br", weight, att_feats)
    all_sums = (xt @ params["w_i2h"] + params["b_i2h"]
                + h @ params["w_h2h"] + params["b_h2h"]
                + att_res @ params["w_a2h"] + params["b_a2h"])
    R = h.shape[-1]
    sig = jax.nn.sigmoid(all_sums[:, : 3 * R])
    in_gate, forget_gate, out_gate = sig[:, :R], sig[:, R:2*R], sig[:, 2*R:3*R]
    in_transform = jnp.maximum(all_sums[:, 3*R:4*R], all_sums[:, 4*R:5*R])
    next_c = forget_gate * c + in_gate * in_transform
    next_h = out_gate * jnp.tanh(next_c)
    return next_h, next_c


if __name__ == "__main__":
    # Small config (opt.rnn_size = opt.input_encoding_size = opt.att_hid_size = 32).
    B, E, R, H, L, FC, T = 2, 32, 32, 32, 16, 64, 4

    key = jax.random.PRNGKey(0)
    ks = jax.random.split(key, 24)

    def rnd(k, shape, scale=0.1):
        return (scale * jax.random.normal(k, shape)).astype(jnp.float32)

    params = {
        # Attention
        "w_h2att": rnd(ks[0], (R, H)),
        "b_h2att": rnd(ks[1], (H,)),
        "w_alpha": rnd(ks[2], (H,)),
        "b_alpha": rnd(ks[3], ()),          # cancels in softmax; kernel drops it
        # Gate projections (stored as (in, out))
        "w_i2h": rnd(ks[4], (E, 5 * R)),
        "b_i2h": rnd(ks[5], (5 * R,)),
        "w_h2h": rnd(ks[6], (R, 5 * R)),
        "b_h2h": rnd(ks[7], (5 * R,)),
        "w_a2h": rnd(ks[8], (R, 5 * R)),
        "b_a2h": rnd(ks[9], (5 * R,)),
    }

    xt = rnd(ks[10], (B, E), 1.0)
    fc_feats = rnd(ks[11], (B, FC), 1.0)      # unused in forward
    att_feats = rnd(ks[12], (B, L, R), 1.0)
    p_att_feats = rnd(ks[13], (B, L, H), 1.0)
    h0 = rnd(ks[14], (B, R), 1.0)
    c0 = rnd(ks[15], (B, R), 1.0)
    state = (h0[None], c0[None])

    # 1) single step, att_masks=None, f32 everywhere
    out, (nh, nc) = att2all2_core(xt, fc_feats, att_feats, p_att_feats, state, params)
    jax.block_until_ready((out, nh, nc))
    ref_h, ref_c = _reference(xt, att_feats, p_att_feats, h0, c0, params)
    assert out.shape == (B, R) and nh.shape == (1, B, R) and nc.shape == (1, B, R)
    assert jnp.allclose(out, ref_h, atol=5e-3, rtol=5e-3)        # approx recip
    assert jnp.allclose(nc[0], ref_c, atol=5e-3, rtol=5e-3)

    # 2) single step with an attention mask
    mask = (jax.random.uniform(ks[16], (B, L)) > 0.3).astype(jnp.float32)
    mask = mask.at[:, 0].set(1.0)   # avoid fully-masked rows (same as PyTorch)
    out_m, (nh_m, nc_m) = att2all2_core(
        xt, fc_feats, att_feats, p_att_feats, state, params, att_masks=mask)
    ref_hm, ref_cm = _reference(xt, att_feats, p_att_feats, h0, c0, params,
                                att_masks=mask)
    assert jnp.allclose(out_m, ref_hm, atol=5e-3, rtol=5e-3)
    assert jnp.allclose(nc_m[0], ref_cm, atol=5e-3, rtol=5e-3)

    # 3) bf16 MXU operands + bf16 attention-feature storage (v6e/v7x fast path;
    #    bf16 MXU is also the recommended setting on v5e)
    out_bf, (nh_bf, nc_bf) = att2all2_core(
        xt, fc_feats, att_feats, p_att_feats, state, params,
        mxu_dtype=jnp.bfloat16, feat_dtype=jnp.bfloat16)
    assert jnp.allclose(out_bf, ref_h, atol=5e-2, rtol=5e-2)
    assert jnp.allclose(nc_bf[0], ref_c, atol=5e-2, rtol=5e-2)

    # 4) time-fused rollout over T steps (weights resident, h/c in VMEM scratch)
    xt_seq = rnd(ks[17], (T, B, E), 1.0)
    h_seq, (hT, cT) = att2all2_core_rollout(
        xt_seq, att_feats, p_att_feats, state, params)
    jax.block_until_ready((h_seq, hT, cT))
    hh, cc = h0, c0
    for t in range(T):
        hh, cc = _reference(xt_seq[t], att_feats, p_att_feats, hh, cc, params)
        assert jnp.allclose(h_seq[t], hh, atol=1e-2, rtol=1e-2)
    assert jnp.allclose(hT[0], hh, atol=1e-2, rtol=1e-2)
    assert jnp.allclose(cT[0], cc, atol=1e-2, rtol=1e-2)

    # 5) masked rollout (mask DMA'd once, resident across all T steps)
    h_seq_m, (hT_m, cT_m) = att2all2_core_rollout(
        xt_seq, att_feats, p_att_feats, state, params, att_masks=mask)
    hh, cc = h0, c0
    for t in range(T):
        hh, cc = _reference(xt_seq[t], att_feats, p_att_feats, hh, cc, params,
                            att_masks=mask)
        assert jnp.allclose(h_seq_m[t], hh, atol=1e-2, rtol=1e-2)
    assert jnp.allclose(hT_m[0], hh, atol=1e-2, rtol=1e-2)
    assert jnp.allclose(cT_m[0], cc, atol=1e-2, rtol=1e-2)

    print("KERNEL_OK")
</pallas_src>

<mosaic_0001>
module attributes {stable_mosaic.version = 11 : i64} {
  func.func @_att2all2_step_kernel(%arg0: i32, %arg1: memref<8x128xf32, #tpu.memory_space<vmem>>, %arg2: memref<8x128xf32, #tpu.memory_space<vmem>>, %arg3: memref<8x128xf32, #tpu.memory_space<vmem>>, %arg4: memref<8x16x128xf32, #tpu.memory_space<vmem>>, %arg5: memref<8x16x128xf32, #tpu.memory_space<vmem>>, %arg6: memref<128x128xf32, #tpu.memory_space<vmem>>, %arg7: memref<1x128xf32, #tpu.memory_space<vmem>>, %arg8: memref<1x1x128xf32, #tpu.memory_space<vmem>>, %arg9: memref<384x640xf32, #tpu.memory_space<vmem>>, %arg10: memref<1x640xf32, #tpu.memory_space<vmem>>, %arg11: memref<8x256xf32, #tpu.memory_space<vmem>>) attributes {dimension_semantics = [#tpu.dimension_semantics<parallel>], iteration_bounds = array<i64: 1>, scalar_prefetch = 0 : i64, scratch_operands = 0 : i64, tpu.core_type = #tpu.core_type<tc>, window_params = [{transform_indices = @transform_0, window_bounds = array<i64: 8, 128>}, {transform_indices = @transform_1, window_bounds = array<i64: 8, 128>}, {transform_indices = @transform_2, window_bounds = array<i64: 8, 128>}, {transform_indices = @transform_3, window_bounds = array<i64: 8, 16, 128>}, {transform_indices = @transform_4, window_bounds = array<i64: 8, 16, 128>}, {pipeline_mode = #tpu.pipeline_mode<synchronous>, transform_indices = @transform_5, window_bounds = array<i64: 128, 128>}, {pipeline_mode = #tpu.pipeline_mode<synchronous>, transform_indices = @transform_6, window_bounds = array<i64: 1, 128>}, {pipeline_mode = #tpu.pipeline_mode<synchronous>, transform_indices = @transform_7, window_bounds = array<i64: 1, 1, 128>}, {pipeline_mode = #tpu.pipeline_mode<synchronous>, transform_indices = @transform_8, window_bounds = array<i64: 384, 640>}, {pipeline_mode = #tpu.pipeline_mode<synchronous>, transform_indices = @transform_9, window_bounds = array<i64: 1, 640>}, {transform_indices = @transform_10, window_bounds = array<i64: 8, 256>}]} {
    %c0 = arith.constant 0 : index
    %c0_0 = arith.constant 0 : index
    %0 = vector.load %arg1[%c0, %c0_0] : memref<8x128xf32, #tpu.memory_space<vmem>>, vector<8x128xf32>
    %c0_1 = arith.constant 0 : index
    %c0_2 = arith.constant 0 : index
    %1 = vector.load %arg2[%c0_1, %c0_2] : memref<8x128xf32, #tpu.memory_space<vmem>>, vector<8x128xf32>
    %c0_3 = arith.constant 0 : index
    %c0_4 = arith.constant 0 : index
    %2 = vector.load %arg3[%c0_3, %c0_4] : memref<8x128xf32, #tpu.memory_space<vmem>>, vector<8x128xf32>
    %c0_5 = arith.constant 0 : index
    %c0_6 = arith.constant 0 : index
    %3 = vector.load %arg6[%c0_5, %c0_6] : memref<128x128xf32, #tpu.memory_space<vmem>>, vector<128x128xf32>
    %c0_7 = arith.constant 0 : index
    %c0_8 = arith.constant 0 : index
    %4 = vector.load %arg7[%c0_7, %c0_8] : memref<1x128xf32, #tpu.memory_space<vmem>>, vector<1x128xf32>
    %c0_9 = arith.constant 0 : index
    %c0_10 = arith.constant 0 : index
    %c0_11 = arith.constant 0 : index
    %5 = vector.load %arg8[%c0_9, %c0_10, %c0_11] : memref<1x1x128xf32, #tpu.memory_space<vmem>>, vector<1x1x128xf32>
    %c0_12 = arith.constant 0 : index
    %c0_13 = arith.constant 0 : index
    %6 = vector.load %arg9[%c0_12, %c0_13] : memref<384x640xf32, #tpu.memory_space<vmem>>, vector<384x640xf32>
    %c0_14 = arith.constant 0 : index
    %c0_15 = arith.constant 0 : index
    %7 = vector.load %arg10[%c0_14, %c0_15] : memref<1x640xf32, #tpu.memory_space<vmem>>, vector<1x640xf32>
    %cst = arith.constant dense<0.000000e+00> : vector<8x128xf32>
    %8 = tpu.matmul %1, %3, %cst {dimension_numbers = #tpu.dot_dimension_numbers<[1], [0], [0], [1], [0, 0, 1, 1], [], []>} : vector<8x128xf32>, vector<128x128xf32>, vector<8x128xf32> -> vector<8x128xf32>
    %9 = vector.broadcast %4 : vector<1x128xf32> to vector<8x128xf32>
    %10 = arith.addf %8, %9 : vector<8x128xf32>
    %c0_16 = arith.constant 0 : index
    %c0_17 = arith.constant 0 : index
    %c0_18 = arith.constant 0 : index
    %11 = vector.load %arg5[%c0_16, %c0_17, %c0_18] : memref<8x16x128xf32, #tpu.memory_space<vmem>>, vector<8x16x128xf32>
    %12 = vector.shape_cast %10 : vector<8x128xf32> to vector<8x1x128xf32>
    %13 = vector.broadcast %12 : vector<8x1x128xf32> to vector<8x16x128xf32>
    %14 = arith.addf %11, %13 : vector<8x16x128xf32>
    %15 = math.tanh %14 : vector<8x16x128xf32>
    %16 = vector.broadcast %5 : vector<1x1x128xf32> to vector<8x16x128xf32>
    %17 = arith.mulf %15, %16 : vector<8x16x128xf32>
    %cst_19 = arith.constant dense<0.000000e+00> : vector<8x16xf32>
    %18 = vector.multi_reduction <add>, %17, %cst_19 [2] : vector<8x16x128xf32> to vector<8x16xf32>
    %cst_20 = arith.constant dense<0xFF800000> : vector<8xf32>
    %19 = vector.multi_reduction <maximumf>, %18, %cst_20 [1] : vector<8x16xf32> to vector<8xf32>
    %20 = vector.shape_cast %19 : vector<8xf32> to vector<8x1xf32>
    %21 = vector.broadcast %20 : vector<8x1xf32> to vector<8x16xf32>
    %22 = arith.subf %18, %21 : vector<8x16xf32>
    %23 = math.exp %22 : vector<8x16xf32>
    %cst_21 = arith.constant dense<0.000000e+00> : vector<8xf32>
    %24 = vector.multi_reduction <add>, %23, %cst_21 [1] : vector<8x16xf32> to vector<8xf32>
    %25 = vector.shape_cast %24 : vector<8xf32> to vector<8x1xf32>
    %cst_22 = arith.constant 9.99999971E-10 : f32
    %26 = vector.broadcast %cst_22 : f32 to vector<8x1xf32>
    %27 = arith.maximumf %25, %26 : vector<8x1xf32>
    %28 = tpu.reciprocal %27 {approx = true} : vector<8x1xf32> -> vector<8x1xf32>
    %29 = vector.broadcast %28 : vector<8x1xf32> to vector<8x16xf32>
    %30 = arith.mulf %23, %29 : vector<8x16xf32>
    %cst_23 = arith.constant 0.000000e+00 : f32
    %31 = vector.broadcast %cst_23 : f32 to vector<8x128xf32>
    %c0_24 = arith.constant 0 : index
    %c0_25 = arith.constant 0 : index
    %c0_26 = arith.constant 0 : index
    %32 = vector.load %arg4[%c0_24, %c0_25, %c0_26] : memref<8x16x128xf32, #tpu.memory_space<vmem>>, vector<8x16x128xf32>
    %33 = vector.shape_cast %30 : vector<8x16xf32> to vector<8x16x1xf32>
    %34 = vector.broadcast %33 : vector<8x16x1xf32> to vector<8x16x128xf32>
    %35 = arith.mulf %34, %32 : vector<8x16x128xf32>
    %cst_27 = arith.constant dense<0.000000e+00> : vector<8x128xf32>
    %36 = vector.multi_reduction <add>, %35, %cst_27 [1] : vector<8x16x128xf32> to vector<8x128xf32>
    %37 = arith.addf %31, %36 : vector<8x128xf32>
    %38 = tpu.concatenate %0, %1, %37 in 1 : vector<8x128xf32>, vector<8x128xf32>, vector<8x128xf32> -> vector<8x384xf32>
    %cst_28 = arith.constant dense<0.000000e+00> : vector<8x640xf32>
    %39 = tpu.matmul %38, %6, %cst_28 {dimension_numbers = #tpu.dot_dimension_numbers<[1], [0], [0], [1], [0, 0, 1, 1], [], []>} : vector<8x384xf32>, vector<384x640xf32>, vector<8x640xf32> -> vector<8x640xf32>
    %40 = vector.broadcast %7 : vector<1x640xf32> to vector<8x640xf32>
    %41 = arith.addf %39, %40 : vector<8x640xf32>
    %42 = vector.extract_strided_slice %41 {offsets = [0, 0], sizes = [8, 384], strides = [1, 1]} : vector<8x640xf32> to vector<8x384xf32>
    %43 = arith.negf %42 : vector<8x384xf32>
    %44 = math.exp %43 : vector<8x384xf32>
    %cst_29 = arith.constant 1.000000e+00 : f32
    %45 = vector.broadcast %cst_29 : f32 to vector<8x384xf32>
    %46 = arith.addf %45, %44 : vector<8x384xf32>
    %47 = arith.divf %45, %46 : vector<8x384xf32>
    %48 = vector.extract_strided_slice %47 {offsets = [0, 0], sizes = [8, 128], strides = [1, 1]} : vector<8x384xf32> to vector<8x128xf32>
    %49 = vector.extract_strided_slice %47 {offsets = [0, 128], sizes = [8, 128], strides = [1, 1]} : vector<8x384xf32> to vector<8x128xf32>
    %50 = vector.extract_strided_slice %47 {offsets = [0, 256], sizes = [8, 128], strides = [1, 1]} : vector<8x384xf32> to vector<8x128xf32>
    %51 = vector.extract_strided_slice %41 {offsets = [0, 384], sizes = [8, 128], strides = [1, 1]} : vector<8x640xf32> to vector<8x128xf32>
    %52 = vector.extract_strided_slice %41 {offsets = [0, 512], sizes = [8, 128], strides = [1, 1]} : vector<8x640xf32> to vector<8x128xf32>
    %53 = arith.maximumf %51, %52 : vector<8x128xf32>
    %54 = arith.mulf %49, %2 : vector<8x128xf32>
    %55 = arith.mulf %48, %53 : vector<8x128xf32>
    %56 = arith.addf %54, %55 : vector<8x128xf32>
    %57 = math.tanh %56 : vector<8x128xf32>
    %58 = arith.mulf %50, %57 : vector<8x128xf32>
    %c0_30 = arith.constant 0 : index
    %c0_31 = arith.constant 0 : index
    %59 = vector.load %arg11[%c0_30, %c0_31] : memref<8x256xf32, #tpu.memory_space<vmem>>, vector<8x128xf32>
    tpu.vector_store %arg11[%c0_30, %c0_31], %58 {strides = array<i32>} : memref<8x256xf32, #tpu.memory_space<vmem>>, vector<8x128xf32>,
    %c0_32 = arith.constant 0 : index
    %c128 = arith.constant 128 : index
    %60 = vector.load %arg11[%c0_32, %c128] : memref<8x256xf32, #tpu.memory_space<vmem>>, vector<8x128xf32>
    tpu.vector_store %arg11[%c0_32, %c128], %56 {strides = array<i32>} : memref<8x256xf32, #tpu.memory_space<vmem>>, vector<8x128xf32>,
    return
  }
  func.func @transform_0(%arg0: i32) -> (i32, i32) {
    %c0_i32 = arith.constant 0 : i32
    %c0_i32_0 = arith.constant 0 : i32
    return %arg0, %c0_i32 : i32, i32
  }
  func.func @transform_1(%arg0: i32) -> (i32, i32) {
    %c0_i32 = arith.constant 0 : i32
    %c0_i32_0 = arith.constant 0 : i32
    return %arg0, %c0_i32 : i32, i32
  }
  func.func @transform_2(%arg0: i32) -> (i32, i32) {
    %c0_i32 = arith.constant 0 : i32
    %c0_i32_0 = arith.constant 0 : i32
    return %arg0, %c0_i32 : i32, i32
  }
  func.func @transform_3(%arg0: i32) -> (i32, i32, i32) {
    %c0_i32 = arith.constant 0 : i32
    %c0_i32_0 = arith.constant 0 : i32
    %c0_i32_1 = arith.constant 0 : i32
    return %arg0, %c0_i32, %c0_i32_0 : i32, i32, i32
  }
  func.func @transform_4(%arg0: i32) -> (i32, i32, i32) {
    %c0_i32 = arith.constant 0 : i32
    %c0_i32_0 = arith.constant 0 : i32
    %c0_i32_1 = arith.constant 0 : i32
    return %arg0, %c0_i32, %c0_i32_0 : i32, i32, i32
  }
  func.func @transform_5(%arg0: i32) -> (i32, i32) {
    %c0_i32 = arith.constant 0 : i32
    %c0_i32_0 = arith.constant 0 : i32
    %c0_i32_1 = arith.constant 0 : i32
    return %c0_i32, %c0_i32_0 : i32, i32
  }
  func.func @transform_6(%arg0: i32) -> (i32, i32) {
    %c0_i32 = arith.constant 0 : i32
    %c0_i32_0 = arith.constant 0 : i32
    %c0_i32_1 = arith.constant 0 : i32
    return %c0_i32, %c0_i32_0 : i32, i32
  }
  func.func @transform_7(%arg0: i32) -> (i32, i32, i32) {
    %c0_i32 = arith.constant 0 : i32
    %c0_i32_0 = arith.constant 0 : i32
    %c0_i32_1 = arith.constant 0 : i32
    %c0_i32_2 = arith.constant 0 : i32
    return %c0_i32, %c0_i32_0, %c0_i32_1 : i32, i32, i32
  }
  func.func @transform_8(%arg0: i32) -> (i32, i32) {
    %c0_i32 = arith.constant 0 : i32
    %c0_i32_0 = arith.constant 0 : i32
    %c0_i32_1 = arith.constant 0 : i32
    return %c0_i32, %c0_i32_0 : i32, i32
  }
  func.func @transform_9(%arg0: i32) -> (i32, i32) {
    %c0_i32 = arith.constant 0 : i32
    %c0_i32_0 = arith.constant 0 : i32
    %c0_i32_1 = arith.constant 0 : i32
    return %c0_i32, %c0_i32_0 : i32, i32
  }
  func.func @transform_10(%arg0: i32) -> (i32, i32) {
    %c0_i32 = arith.constant 0 : i32
    %c0_i32_0 = arith.constant 0 : i32
    return %arg0, %c0_i32 : i32, i32
  }
}

module attributes {stable_mosaic.version = 11 : i64} {
  func.func @_att2all2_step_kernel(%arg0: i32, %arg1: memref<8x128xf32, #tpu.memory_space<vmem>>, %arg2: memref<8x128xf32, #tpu.memory_space<vmem>>, %arg3: memref<8x128xf32, #tpu.memory_space<vmem>>, %arg4: memref<8x16x128xf32, #tpu.memory_space<vmem>>, %arg5: memref<8x16x128xf32, #tpu.memory_space<vmem>>, %arg6: memref<128x128xf32, #tpu.memory_space<vmem>>, %arg7: memref<1x128xf32, #tpu.memory_space<vmem>>, %arg8: memref<1x1x128xf32, #tpu.memory_space<vmem>>, %arg9: memref<384x640xf32, #tpu.memory_space<vmem>>, %arg10: memref<1x640xf32, #tpu.memory_space<vmem>>, %arg11: memref<8x256xf32, #tpu.memory_space<vmem>>) attributes {dimension_semantics = [#tpu.dimension_semantics<parallel>], iteration_bounds = array<i64: 1>, scalar_prefetch = 0 : i64, scratch_operands = 0 : i64, tpu.core_type = #tpu.core_type<tc>, window_params = [{transform_indices = @transform_0, window_bounds = array<i64: 8, 128>}, {transform_indices = @transform_1, window_bounds = array<i64: 8, 128>}, {transform_indices = @transform_2, window_bounds = array<i64: 8, 128>}, {transform_indices = @transform_3, window_bounds = array<i64: 8, 16, 128>}, {transform_indices = @transform_4, window_bounds = array<i64: 8, 16, 128>}, {pipeline_mode = #tpu.pipeline_mode<synchronous>, transform_indices = @transform_5, window_bounds = array<i64: 128, 128>}, {pipeline_mode = #tpu.pipeline_mode<synchronous>, transform_indices = @transform_6, window_bounds = array<i64: 1, 128>}, {pipeline_mode = #tpu.pipeline_mode<synchronous>, transform_indices = @transform_7, window_bounds = array<i64: 1, 1, 128>}, {pipeline_mode = #tpu.pipeline_mode<synchronous>, transform_indices = @transform_8, window_bounds = array<i64: 384, 640>}, {pipeline_mode = #tpu.pipeline_mode<synchronous>, transform_indices = @transform_9, window_bounds = array<i64: 1, 640>}, {transform_indices = @transform_10, window_bounds = array<i64: 8, 256>}]} {
    %c0 = arith.constant 0 : index
    %c0_0 = arith.constant 0 : index
    %0 = vector.load %arg1[%c0, %c0_0] : memref<8x128xf32, #tpu.memory_space<vmem>>, vector<8x128xf32>
    %c0_1 = arith.constant 0 : index
    %c0_2 = arith.constant 0 : index
    %1 = vector.load %arg2[%c0_1, %c0_2] : memref<8x128xf32, #tpu.memory_space<vmem>>, vector<8x128xf32>
    %c0_3 = arith.constant 0 : index
    %c0_4 = arith.constant 0 : index
    %2 = vector.load %arg3[%c0_3, %c0_4] : memref<8x128xf32, #tpu.memory_space<vmem>>, vector<8x128xf32>
    %c0_5 = arith.constant 0 : index
    %c0_6 = arith.constant 0 : index
    %3 = vector.load %arg6[%c0_5, %c0_6] : memref<128x128xf32, #tpu.memory_space<vmem>>, vector<128x128xf32>
    %c0_7 = arith.constant 0 : index
    %c0_8 = arith.constant 0 : index
    %4 = vector.load %arg7[%c0_7, %c0_8] : memref<1x128xf32, #tpu.memory_space<vmem>>, vector<1x128xf32>
    %c0_9 = arith.constant 0 : index
    %c0_10 = arith.constant 0 : index
    %c0_11 = arith.constant 0 : index
    %5 = vector.load %arg8[%c0_9, %c0_10, %c0_11] : memref<1x1x128xf32, #tpu.memory_space<vmem>>, vector<1x1x128xf32>
    %c0_12 = arith.constant 0 : index
    %c0_13 = arith.constant 0 : index
    %6 = vector.load %arg9[%c0_12, %c0_13] : memref<384x640xf32, #tpu.memory_space<vmem>>, vector<384x640xf32>
    %c0_14 = arith.constant 0 : index
    %c0_15 = arith.constant 0 : index
    %7 = vector.load %arg10[%c0_14, %c0_15] : memref<1x640xf32, #tpu.memory_space<vmem>>, vector<1x640xf32>
    %cst = arith.constant dense<0.000000e+00> : vector<8x128xf32>
    %8 = tpu.matmul %1, %3, %cst {dimension_numbers = #tpu.dot_dimension_numbers<[1], [0], [0], [1], [0, 0, 1, 1], [], []>} : vector<8x128xf32>, vector<128x128xf32>, vector<8x128xf32> -> vector<8x128xf32>
    %9 = vector.broadcast %4 : vector<1x128xf32> to vector<8x128xf32>
    %10 = arith.addf %8, %9 : vector<8x128xf32>
    %c0_16 = arith.constant 0 : index
    %c0_17 = arith.constant 0 : index
    %c0_18 = arith.constant 0 : index
    %11 = vector.load %arg5[%c0_16, %c0_17, %c0_18] : memref<8x16x128xf32, #tpu.memory_space<vmem>>, vector<8x16x128xf32>
    %12 = vector.shape_cast %10 : vector<8x128xf32> to vector<8x1x128xf32>
    %13 = vector.broadcast %12 : vector<8x1x128xf32> to vector<8x16x128xf32>
    %14 = arith.addf %11, %13 : vector<8x16x128xf32>
    %15 = math.tanh %14 : vector<8x16x128xf32>
    %16 = vector.broadcast %5 : vector<1x1x128xf32> to vector<8x16x128xf32>
    %17 = arith.mulf %15, %16 : vector<8x16x128xf32>
    %cst_19 = arith.constant dense<0.000000e+00> : vector<8x16xf32>
    %18 = vector.multi_reduction <add>, %17, %cst_19 [2] : vector<8x16x128xf32> to vector<8x16xf32>
    %cst_20 = arith.constant dense<0xFF800000> : vector<8xf32>
    %19 = vector.multi_reduction <maximumf>, %18, %cst_20 [1] : vector<8x16xf32> to vector<8xf32>
    %20 = vector.shape_cast %19 : vector<8xf32> to vector<8x1xf32>
    %21 = vector.broadcast %20 : vector<8x1xf32> to vector<8x16xf32>
    %22 = arith.subf %18, %21 : vector<8x16xf32>
    %23 = math.exp %22 : vector<8x16xf32>
    %cst_21 = arith.constant dense<0.000000e+00> : vector<8xf32>
    %24 = vector.multi_reduction <add>, %23, %cst_21 [1] : vector<8x16xf32> to vector<8xf32>
    %25 = vector.shape_cast %24 : vector<8xf32> to vector<8x1xf32>
    %cst_22 = arith.constant 9.99999971E-10 : f32
    %26 = vector.broadcast %cst_22 : f32 to vector<8x1xf32>
    %27 = arith.maximumf %25, %26 : vector<8x1xf32>
    %28 = tpu.reciprocal %27 {approx = true} : vector<8x1xf32> -> vector<8x1xf32>
    %29 = vector.broadcast %28 : vector<8x1xf32> to vector<8x16xf32>
    %30 = arith.mulf %23, %29 : vector<8x16xf32>
    %cst_23 = arith.constant 0.000000e+00 : f32
    %31 = vector.broadcast %cst_23 : f32 to vector<8x128xf32>
    %c0_24 = arith.constant 0 : index
    %c0_25 = arith.constant 0 : index
    %c0_26 = arith.constant 0 : index
    %32 = vector.load %arg4[%c0_24, %c0_25, %c0_26] : memref<8x16x128xf32, #tpu.memory_space<vmem>>, vector<8x16x128xf32>
    %33 = vector.shape_cast %30 : vector<8x16xf32> to vector<8x16x1xf32>
    %34 = vector.broadcast %33 : vector<8x16x1xf32> to vector<8x16x128xf32>
    %35 = arith.mulf %34, %32 : vector<8x16x128xf32>
    %cst_27 = arith.constant dense<0.000000e+00> : vector<8x128xf32>
    %36 = vector.multi_reduction <add>, %35, %cst_27 [1] : vector<8x16x128xf32> to vector<8x128xf32>
    %37 = arith.addf %31, %36 : vector<8x128xf32>
    %38 = tpu.concatenate %0, %1, %37 in 1 : vector<8x128xf32>, vector<8x128xf32>, vector<8x128xf32> -> vector<8x384xf32>
    %cst_28 = arith.constant dense<0.000000e+00> : vector<8x640xf32>
    %39 = tpu.matmul %38, %6, %cst_28 {dimension_numbers = #tpu.dot_dimension_numbers<[1], [0], [0], [1], [0, 0, 1, 1], [], []>} : vector<8x384xf32>, vector<384x640xf32>, vector<8x640xf32> -> vector<8x640xf32>
    %40 = vector.broadcast %7 : vector<1x640xf32> to vector<8x640xf32>
    %41 = arith.addf %39, %40 : vector<8x640xf32>
    %42 = vector.extract_strided_slice %41 {offsets = [0, 0], sizes = [8, 384], strides = [1, 1]} : vector<8x640xf32> to vector<8x384xf32>
    %43 = arith.negf %42 : vector<8x384xf32>
    %44 = math.exp %43 : vector<8x384xf32>
    %cst_29 = arith.constant 1.000000e+00 : f32
    %45 = vector.broadcast %cst_29 : f32 to vector<8x384xf32>
    %46 = arith.addf %45, %44 : vector<8x384xf32>
    %47 = arith.divf %45, %46 : vector<8x384xf32>
    %48 = vector.extract_strided_slice %47 {offsets = [0, 0], sizes = [8, 128], strides = [1, 1]} : vector<8x384xf32> to vector<8x128xf32>
    %49 = vector.extract_strided_slice %47 {offsets = [0, 128], sizes = [8, 128], strides = [1, 1]} : vector<8x384xf32> to vector<8x128xf32>
    %50 = vector.extract_strided_slice %47 {offsets = [0, 256], sizes = [8, 128], strides = [1, 1]} : vector<8x384xf32> to vector<8x128xf32>
    %51 = vector.extract_strided_slice %41 {offsets = [0, 384], sizes = [8, 128], strides = [1, 1]} : vector<8x640xf32> to vector<8x128xf32>
    %52 = vector.extract_strided_slice %41 {offsets = [0, 512], sizes = [8, 128], strides = [1, 1]} : vector<8x640xf32> to vector<8x128xf32>
    %53 = arith.maximumf %51, %52 : vector<8x128xf32>
    %54 = arith.mulf %49, %2 : vector<8x128xf32>
    %55 = arith.mulf %48, %53 : vector<8x128xf32>
    %56 = arith.addf %54, %55 : vector<8x128xf32>
    %57 = math.tanh %56 : vector<8x128xf32>
    %58 = arith.mulf %50, %57 : vector<8x128xf32>
    %c0_30 = arith.constant 0 : index
    %c0_31 = arith.constant 0 : index
    %59 = vector.load %arg11[%c0_30, %c0_31] : memref<8x256xf32, #tpu.memory_space<vmem>>, vector<8x128xf32>
    tpu.vector_store %arg11[%c0_30, %c0_31], %58 {strides = array<i32>} : memref<8x256xf32, #tpu.memory_space<vmem>>, vector<8x128xf32>,
    %c0_32 = arith.constant 0 : index
    %c128 = arith.constant 128 : index
    %60 = vector.load %arg11[%c0_32, %c128] : memref<8x256xf32, #tpu.memory_space<vmem>>, vector<8x128xf32>
    tpu.vector_store %arg11[%c0_32, %c128], %56 {strides = array<i32>} : memref<8x256xf32, #tpu.memory_space<vmem>>, vector<8x128xf32>,
    return
  }
  func.func @transform_0(%arg0: i32) -> (i32, i32) {
    %c0_i32 = arith.constant 0 : i32
    %c0_i32_0 = arith.constant 0 : i32
    return %arg0, %c0_i32 : i32, i32
  }
  func.func @transform_1(%arg0: i32) -> (i32, i32) {
    %c0_i32 = arith.constant 0 : i32
    %c0_i32_0 = arith.constant 0 : i32
    return %arg0, %c0_i32 : i32, i32
  }
  func.func @transform_2(%arg0: i32) -> (i32, i32) {
    %c0_i32 = arith.constant 0 : i32
    %c0_i32_0 = arith.constant 0 : i32
    return %arg0, %c0_i32 : i32, i32
  }
  func.func @transform_3(%arg0: i32) -> (i32, i32, i32) {
    %c0_i32 = arith.constant 0 : i32
    %c0_i32_0 = arith.constant 0 : i32
    %c0_i32_1 = arith.constant 0 : i32
    return %arg0, %c0_i32, %c0_i32_0 : i32, i32, i32
  }
  func.func @transform_4(%arg0: i32) -> (i32, i32, i32) {
    %c0_i32 = arith.constant 0 : i32
    %c0_i32_0 = arith.constant 0 : i32
    %c0_i32_1 = arith.constant 0 : i32
    return %arg0, %c0_i32, %c0_i32_0 : i32, i32, i32
  }
  func.func @transform_5(%arg0: i32) -> (i32, i32) {
    %c0_i32 = arith.constant 0 : i32
    %c0_i32_0 = arith.constant 0 : i32
    %c0_i32_1 = arith.constant 0 : i32
    return %c0_i32, %c0_i32_0 : i32, i32
  }
  func.func @transform_6(%arg0: i32) -> (i32, i32) {
    %c0_i32 = arith.constant 0 : i32
    %c0_i32_0 = arith.constant 0 : i32
    %c0_i32_1 = arith.constant 0 : i32
    return %c0_i32, %c0_i32_0 : i32, i32
  }
  func.func @transform_7(%arg0: i32) -> (i32, i32, i32) {
    %c0_i32 = arith.constant 0 : i32
    %c0_i32_0 = arith.constant 0 : i32
    %c0_i32_1 = arith.constant 0 : i32
    %c0_i32_2 = arith.constant 0 : i32
    return %c0_i32, %c0_i32_0, %c0_i32_1 : i32, i32, i32
  }
  func.func @transform_8(%arg0: i32) -> (i32, i32) {
    %c0_i32 = arith.constant 0 : i32
    %c0_i32_0 = arith.constant 0 : i32
    %c0_i32_1 = arith.constant 0 : i32
    return %c0_i32, %c0_i32_0 : i32, i32
  }
  func.func @transform_9(%arg0: i32) -> (i32, i32) {
    %c0_i32 = arith.constant 0 : i32
    %c0_i32_0 = arith.constant 0 : i32
    %c0_i32_1 = arith.constant 0 : i32
    return %c0_i32, %c0_i32_0 : i32, i32
  }
  func.func @transform_10(%arg0: i32) -> (i32, i32) {
    %c0_i32 = arith.constant 0 : i32
    %c0_i32_0 = arith.constant 0 : i32
    return %arg0, %c0_i32 : i32, i32
  }
}

</mosaic_0001>

<bundles_post_ra>
// kernel: tpu_custom_call.1
= control target key start
LH: loop header
LB: loop body
LE: loop exit
PB: predicated region body
PF: predicated region fallthrough
CT: control target
= control target key end

     0   :  { %15 = vsyncpa [#allocation3], 0  ;;  %s2628_s0 = inlined_call_operand.hbm [shape: f32[8,128], index: 0, kind: input, shape index: {}]   ;;  %s2629_s1 = inlined_call_operand.hbm [shape: f32[8,128], index: 1, kind: input, shape index: {}]   ;;  %s2630_s2 = inlined_call_operand.hbm [shape: f32[8,128], index: 2, kind: input, shape index: {}]   ;;  %s2631_s3 = inlined_call_operand.hbm [shape: f32[8,16,128], index: 3, kind: input, shape index: {}]   ;;  %s2632_s4 = inlined_call_operand.hbm [shape: f32[8,16,128], index: 4, kind: input, shape index: {}]   ;;  %s2633_s5 = inlined_call_operand.hbm [shape: f32[128,128], index: 5, kind: input, shape index: {}]   ;;  %s2634_s6 = inlined_call_operand.vmem [shape: f32[1,128], index: 6, kind: input, shape index: {}]   ;;  %s2635_s7 = inlined_call_operand.vmem [shape: f32[1,1,128], index: 7, kind: input, shape index: {}]   ;;  %s2636_s8 = inlined_call_operand.hbm [shape: f32[384,640], index: 8, kind: input, shape index: {}]   ;;  %s2637_s9 = inlined_call_operand.vmem [shape: f32[1,640], index: 9, kind: input, shape index: {}]   ;;  %s2638_s10 = inlined_call_operand.hbm [shape: f32[8,256], index: 10, kind: output, shape index: {}]  }
   0x1   :  { %16 = vsyncpa [#allocation6], 0 }
   0x2   :  { %17 = vsyncpa [#allocation9], 0 }
   0x3   :  { %18 = vsyncpa [#allocation12], 0 }
   0x4   :  { %19 = vsyncpa [#allocation4], 0  ;;  %s2160_s13 = smov [#allocation5]   ;;  %s2161_s15 = smov [#allocation8]  }
   0x5   :  { %s36_s14 = sshll.u32 %s2160_s13, 4  ;;  %s55_s16 = sshll.u32 %s2161_s15, 4  ;;  %s37_s14 = int_to_ptr.vmem [resolvable:$true] %s36_s14  ;;  %s56_s16 = int_to_ptr.vmem [resolvable:$true] %s55_s16 }
   0x6   :  { %s1998_s17 = scalar_lea.vmem %s37_s14, 128  ;;  %p2003_p1 = scmp.lt.s32.totalorder %s37_s14, %s37_s14 }
   0x7   :  { %p1999_p0 = scmp.ne.s32.totalorder %s37_s14, %s1998_s17  ;;  %p2004_p2 = scmp.lt.s32.totalorder %s1998_s17, %s1998_s17 }
   0x9   :  { %p2005_p3 = por %p2004_p2, %p2003_p1 }
   0xb   :  { %p2006_p4 = pnand %p2005_p3, %p1999_p0 }
   0xd   :  { %2009 = shalt.err (!%p2006_p4)
}
   0xe   :  { %39 = dma.hbm_to_vmem [thread:$0]  %s2629_s1, 128, %s37_s14, [#allocation6]  }
   0xf   :  { %s2018_s20 = scalar_lea.vmem %s56_s16, 2048  ;;  %p2023_p6 = scmp.lt.s32.totalorder %s56_s16, %s56_s16 }
  0x10   :  { %p2019_p5 = scmp.ne.s32.totalorder %s56_s16, %s2018_s20  ;;  %p2024_p7 = scmp.lt.s32.totalorder %s2018_s20, %s2018_s20 }
  0x12   :  { %p2025_p8 = por %p2024_p7, %p2023_p6 }
  0x14   :  { %p2026_p9 = pnand %p2025_p8, %p2019_p5 }
  0x16   :  { %2029 = shalt.err (!%p2026_p9)
}
  0x17   :  { %s2162_s21 = smov 128   ;;  %s2163_s22 = smov 8  }
  0x18   :  { %61 = dma.hbm_to_vmem [thread:$0]  %s2631_s3, 2048, %s56_s16, [#allocation9], %s2162_s21, %s2162_s21, %s2163_s22  }
  0x19   :  { %s2164_s25 = smov [#allocation11]   ;;  %s2165_s27 = smov [#allocation2]  }
  0x1a   :  { %s79_s26 = sshll.u32 %s2164_s25, 4  ;;  %s26_s1 = sshll.u32 %s2165_s27, 4  ;;  %s80_s26 = int_to_ptr.vmem [resolvable:$true] %s79_s26  ;;  %s27_s1 = int_to_ptr.vmem [resolvable:$true] %s26_s1 }
  0x1b   :  { %s2038_s28 = scalar_lea.vmem %s80_s26, 2048  ;;  %p2043_p11 = scmp.lt.s32.totalorder %s80_s26, %s80_s26 }
  0x1c   :  { %p2039_p10 = scmp.ne.s32.totalorder %s80_s26, %s2038_s28  ;;  %p2044_p12 = scmp.lt.s32.totalorder %s2038_s28, %s2038_s28 }
  0x1e   :  { %p2045_p13 = por %p2044_p12, %p2043_p11 }
  0x20   :  { %p2046_p0 = pnand %p2045_p13, %p2039_p10 }
  0x22   :  { %2049 = shalt.err (!%p2046_p0)
}
  0x23   :  { %85 = dma.hbm_to_vmem [thread:$0]  %s2633_s5, 2048, %s80_s26, [#allocation12], %s2162_s21, %s2162_s21, %s2163_s22  }
  0x24   :  { %s2058_s3 = scalar_lea.vmem %s27_s1, 128  ;;  %p2063_p2 = scmp.lt.s32.totalorder %s27_s1, %s27_s1 }
  0x25   :  { %p2059_p1 = scmp.ne.s32.totalorder %s27_s1, %s2058_s3  ;;  %p2064_p3 = scmp.lt.s32.totalorder %s2058_s3, %s2058_s3 }
  0x27   :  { %p2065_p4 = por %p2064_p3, %p2063_p2 }
  0x29   :  { %p2066_p5 = pnand %p2065_p4, %p2059_p1 }
  0x2b   :  { %2069 = shalt.err (!%p2066_p5)
}
  0x2c   :  { %29 = dma.hbm_to_vmem [thread:$0]  %s2628_s0, 128, %s27_s1, [#allocation3]  }
  0x2d   :  { %s2166_s13 = smov [#allocation7]   ;;  %s2167_s15 = smov [#allocation10]  }
  0x2e   :  { %s46_s14 = sshll.u32 %s2166_s13, 4  ;;  %s67_s16 = sshll.u32 %s2167_s15, 4  ;;  %s47_s14 = int_to_ptr.vmem [resolvable:$true] %s46_s14  ;;  %s68_s16 = int_to_ptr.vmem [resolvable:$true] %s67_s16 }
  0x2f   :  { %s2078_s17 = scalar_lea.vmem %s47_s14, 128  ;;  %p2083_p7 = scmp.lt.s32.totalorder %s47_s14, %s47_s14 }
  0x30   :  { %p2079_p6 = scmp.ne.s32.totalorder %s47_s14, %s2078_s17  ;;  %p2084_p8 = scmp.lt.s32.totalorder %s2078_s17, %s2078_s17 }
  0x32   :  { %p2085_p9 = por %p2084_p8, %p2083_p7 }
  0x34   :  { %p2086_p10 = pnand %p2085_p9, %p2079_p6 }
  0x36   :  { %2089 = shalt.err (!%p2086_p10)
}
  0x37   :  { %49 = dma.hbm_to_vmem [thread:$0]  %s2630_s2, 128, %s47_s14, [#allocation6]  }
  0x38   :  { %s2098_s19 = scalar_lea.vmem %s68_s16, 2048  ;;  %p2103_p12 = scmp.lt.s32.totalorder %s68_s16, %s68_s16 }
  0x39   :  { %p2099_p11 = scmp.ne.s32.totalorder %s68_s16, %s2098_s19  ;;  %p2104_p13 = scmp.lt.s32.totalorder %s2098_s19, %s2098_s19 }
  0x3b   :  { %p2105_p0 = por %p2104_p13, %p2103_p12 }
  0x3d   :  { %p2106_p1 = pnand %p2105_p0, %p2099_p11 }
  0x3f   :  { %2109 = shalt.err (!%p2106_p1)
}
  0x40   :  { %73 = dma.hbm_to_vmem [thread:$0]  %s2632_s4, 2048, %s68_s16, [#allocation9], %s2162_s21, %s2162_s21, %s2163_s22  }
  0x41   :  { %s2168_s23 = smov [#allocation13]  }
  0x42   :  { %s95_s24 = sshll.u32 %s2168_s23, 4  ;;  %s96_s24 = int_to_ptr.vmem [resolvable:$true] %s95_s24 }
  0x43   :  { %s2118_s25 = scalar_lea.vmem %s96_s24, 30720  ;;  %p2123_p3 = scmp.lt.s32.totalorder %s96_s24, %s96_s24 }
  0x44   :  { %p2119_p2 = scmp.ne.s32.totalorder %s96_s24, %s2118_s25  ;;  %p2124_p4 = scmp.lt.s32.totalorder %s2118_s25, %s2118_s25 }
  0x46   :  { %p2125_p5 = por %p2124_p4, %p2123_p3 }
  0x48   :  { %p2126_p6 = pnand %p2125_p5, %p2119_p2 }
  0x4a   :  { %2129 = shalt.err (!%p2126_p6)
}
  0x4b   :  { %s2169_s2 = smov 640   ;;  %s2170_s26 = smov 40  }
  0x4c   :  { %101 = dma.hbm_to_vmem [thread:$0]  %s2636_s8, 30720, %s96_s24, [#allocation12], %s2169_s2, %s2169_s2, %s2170_s26  }
  0x4d   :  { %2150 = dma.done.wait [#allocation3], 128  }
  0x4e   :  { %2151 = vsyncadd [#allocation3], 4294967168 }
  0x4f   :  { %2152 = dma.done.wait [#allocation6], 256  }
  0x50   :  { %2153 = vsyncadd [#allocation6], 4294967040 }
  0x51   :  { %2154 = dma.done.wait [#allocation9], 4096  }
  0x52   :  { %2155 = vsyncadd [#allocation9], 4294963200 }
  0x53   :  { %2156 = dma.done.wait [#allocation12], 32768  }
  0x54   :  { %2157 = vsyncadd [#allocation12], 4294934528  ;;  %v2171_v0 = vmov 0.0   ;;  %vm2172_vm0 = vmmov 0   ;;  %v143_v1 = vld [vmem:[#allocation11 + $0x78] sm:$0xff]  ;;  %v142_v2 = vld [vmem:[#allocation11 + $0x70] sm:$0xff]  ;;  %v484_v20 = vlaneseq }
  0x55   :  { %1821 = vmatprep.subr.mxu0 %v2171_v0  ;;  %1853 = vmatprep.mubr.msk.f32.mxu0 %vm2172_vm0, %v2171_v0  ;;  %v141_v3 = vld [vmem:[#allocation11 + $0x68] sm:$0xff]  ;;  %v140_v4 = vld [vmem:[#allocation11 + $0x60] sm:$0xff]  ;;  %v126_v5 = vld [vmem:[#allocation5] sm:$0xff]  ;;  %v2173_v18 = vmov 1966171168   ;;  %vm682_vm1 = vcmask 130112  }
  0x56   :  { %1822 = vmatpush3.msra.mxu0 %v143_v1  ;;  %v139_v6 = vld [vmem:[#allocation11 + $0x58] sm:$0xff]  ;;  %1343 = vmatprep.mubr.f32.mxu1 %v126_v5  ;;  %v138_v7 = vld [vmem:[#allocation11 + $0x50] sm:$0xff]  ;;  %v137_v8 = vld [vmem:[#allocation11 + $0x48] sm:$0xff]  ;;  %v482_v19 = vunpack.c.l.s4 %v2173_v18  ;;  %v2281_v22 = vshrl.u32 %v484_v20, 7  ;;  %vm747_vm2 = vcmask 1041409   ;;  %vm749_vm3 = vcmask 1042434  }
  0x57   :  { %1823 = vmatprep.subr.mxu0 %v2171_v0  ;;  %v136_v9 = vld [vmem:[#allocation11 + $0x40] sm:$0xff]  ;;  %v135_v10 = vld [vmem:[#allocation11 + $0x38] sm:$0xff]  ;;  %v134_v11 = vld [vmem:[#allocation11 + $0x30] sm:$0xff]  ;;  %vm751_vm4 = vcmask 1043459   ;;  %vm753_vm5 = vcmask 1044484   ;;  %vm755_vm6 = vcmask 1045509  }
  0x58   :  { %1824 = vmatpush3.msra.mxu0 %v142_v2  ;;  %v133_v12 = vld [vmem:[#allocation11 + $0x28] sm:$0xff]  ;;  %v132_v13 = vld [vmem:[#allocation11 + $0x20] sm:$0xff]  ;;  %v131_v14 = vld [vmem:[#allocation11 + $0x18] sm:$0xff]  ;;  %v483_v21 = vunpack.c.0.s8 %v482_v19  ;;  %v2288_v29 = vsub.s32 0, %v2281_v22  ;;  %vm757_vm7 = vcmask 1046534   ;;  %vm759_vm8 = vcmask 1047559  }
  0x59   :  { %1825 = vmatprep.subr.mxu0 %v2171_v0  ;;  %v130_v15 = vld [vmem:[#allocation11 + $0x10] sm:$0xff]  ;;  %v129_v16 = vld [vmem:[#allocation11 + $0x8] sm:$0xff]  ;;  %v128_v17 = vld [vmem:[#allocation11] sm:$0xff]  ;;  %vm762_vm9 = vcmask 130048  }
  0x5a   :  { %1826 = vmatpush3.msra.mxu0 %v141_v3  ;;  %v1747_v23 = vld [vmem:[%s2634_s6] ss:$0 sm:$0xff]  ;;  %v486_v24 = vsub.s32 %v483_v21, %v2281_v22  ;;  %v463_v34 = vld [vmem:[#allocation10] sm:$0xff]  ;;  %v465_v40 = vld [vmem:[#allocation10 + $0x10] sm:$0xff] }
  0x5b   :  { %1827 = vmatprep.subr.mxu0 %v2171_v0  ;;  %v464_v36 = vld [vmem:[#allocation10 + $0x8] sm:$0xff]  ;;  %v466_v42 = vld [vmem:[#allocation10 + $0x18] sm:$0xff]  ;;  %v467_v47 = vld [vmem:[#allocation10 + $0x20] sm:$0xff] }
  0x5c   :  { %1828 = vmatpush3.msra.mxu0 %v140_v4  ;;  %v468_v49 = vld [vmem:[#allocation10 + $0x28] sm:$0xff]  ;;  %v471_v54 = vld [vmem:[#allocation10 + $0x40] sm:$0xff]  ;;  %v469_v60 = vld [vmem:[#allocation10 + $0x30] sm:$0xff] }
  0x5d   :  { %1829 = vmatprep.subr.mxu0 %v2171_v0  ;;  %v472_v56 = vld [vmem:[#allocation10 + $0x48] sm:$0xff]  ;;  %v470_v62 = vld [vmem:[#allocation10 + $0x38] sm:$0xff]  ;;  %v473_v3 = vld [vmem:[#allocation10 + $0x50] sm:$0xff] }
  0x5e   :  { %1830 = vmatpush3.msra.mxu0 %v139_v6  ;;  %v2299_v4 = vld [vmem:[%s2635_s7] ss:$0 sm:$0xff] }
  0x5f   :  { %1831 = vmatprep.subr.mxu0 %v2171_v0  ;;  %v476_v18 = vld [vmem:[#allocation10 + $0x68] sm:$0xff] }
  0x60   :  { %1832 = vmatpush3.msra.mxu0 %v138_v7  ;;  %v474_v7 = vld [vmem:[#allocation10 + $0x58] sm:$0xff] }
  0x61   :  { %1833 = vmatprep.subr.mxu0 %v2171_v0 }
  0x62   :  { %1834 = vmatpush3.msra.mxu0 %v137_v8 }
  0x63   :  { %1835 = vmatprep.subr.mxu0 %v2171_v0 }
  0x64   :  { %1836 = vmatpush3.msra.mxu0 %v136_v9 }
  0x65   :  { %1837 = vmatprep.subr.mxu0 %v2171_v0 }
  0x66   :  { %1838 = vmatpush3.msra.mxu0 %v135_v10 }
  0x67   :  { %1839 = vmatprep.subr.mxu0 %v2171_v0 }
  0x68   :  { %1840 = vmatpush3.msra.mxu0 %v134_v11 }
  0x69   :  { %1841 = vmatprep.subr.mxu0 %v2171_v0 }
  0x6a   :  { %1842 = vmatpush3.msra.mxu0 %v133_v12 }
  0x6b   :  { %1843 = vmatprep.subr.mxu0 %v2171_v0 }
  0x6c   :  { %1844 = vmatpush3.msra.mxu0 %v132_v13 }
  0x6d   :  { %1845 = vmatprep.subr.mxu0 %v2171_v0 }
  0x6e   :  { %1846 = vmatpush3.msra.mxu0 %v131_v14  ;;  %v475_v14 = vld [vmem:[#allocation10 + $0x60] sm:$0xff] }
  0x6f   :  { %1847 = vmatprep.subr.mxu0 %v2171_v0 }
  0x70   :  { %1848 = vmatpush3.msra.mxu0 %v130_v15 }
  0x71   :  { %1849 = vmatprep.subr.mxu0 %v2171_v0 }
  0x72   :  { %1850 = vmatpush3.msra.mxu0 %v129_v16 }
  0x73   :  { %1851 = vmatprep.subr.mxu0 %v2171_v0 }
  0x74   :  { %1852 = vmatpush3.msra.mxu0 %v128_v17 }
  0x75   :  { %1854 = vmatmul.mubr.f32.vlgmr.msra.gmra.mxu0 %v126_v5 }
  0x76   :  { %1414 = vmatprep.mubr.f32.mxu0 %v2171_v0 }
 0x135   :  { %v459_v25 = vpop.f32.mrf.mxu0 }
 0x136   :  { %v460_v26 = vadd.f32 %v1747_v23, %v459_v25  ;;  %v477_v25 = vld [vmem:[#allocation10 + $0x70] sm:$0xff] }
 0x137   :  { %v1855_v27 = vpop.f32.mrf.mxu0 }
 0x138   :  { %v487_v28 = vrot.slane %v460_v26, %v486_v24  ;;  %v480_v30 = vcombine.high %v460_v26, %v460_v26 }
 0x13a   :  { %v495_v31 = vcombine.high %v487_v28, %v487_v28  ;;  %v503_v32 = vrot.slane %v487_v28, %v486_v24  ;;  %v494_v37 = vrot.slane %v480_v30, %v486_v24  ;;  %v478_v30 = vld [vmem:[#allocation10 + $0x78] sm:$0xff] }
 0x13c   :  { %v517_v33 = vrot.slane %v495_v31, %v486_v24  ;;  %v532_v35 = vrot.slane %v503_v32, %v2288_v29  ;;  %v525_v38 = vcombine.high %v503_v32, %v503_v32  ;;  %v510_v44 = vrot.slane %v494_v37, %v486_v24 }
 0x13d   :  { %v496_v50 = vcombine.high %v494_v37, %v494_v37 }
 0x13e   :  { %v536_v39 = vrot.slane %v517_v33, %v2288_v29  ;;  %v569_v41 = vadd.f32 %v532_v35, %v463_v34  ;;  %v570_v43 = vadd.f32 %v532_v35, %v464_v36  ;;  %v540_v45 = vrot.slane %v525_v38, %v2288_v29 }
 0x13f   :  { %v527_v51 = vcombine.high %v517_v33, %v517_v33  ;;  %v548_v52 = vrot.slane %v510_v44, %v2288_v29  ;;  %v524_v57 = vrot.slane %v496_v50, %v486_v24  ;;  %v526_v63 = vcombine.high %v510_v44, %v510_v44 }
 0x140   :  { %v571_v46 = vadd.f32 %v536_v39, %v465_v40  ;;  %v572_v48 = vadd.f32 %v536_v39, %v466_v42  ;;  %1909 = vtanh.f32 %v569_v41  ;;  %v573_v53 = vadd.f32 %v540_v45, %v467_v47 }
 0x141   :  { %1911 = vtanh.f32 %v570_v43  ;;  %v574_v55 = vadd.f32 %v540_v45, %v468_v49  ;;  %v544_v58 = vrot.slane %v527_v51, %v2288_v29  ;;  %v577_v59 = vadd.f32 %v548_v52, %v471_v54 }
 0x142   :  { %1913 = vtanh.f32 %v571_v46  ;;  %v578_v61 = vadd.f32 %v548_v52, %v472_v56  ;;  %v552_v1 = vrot.slane %v524_v57, %v2288_v29  ;;  %v528_v8 = vcombine.high %v524_v57, %v524_v57 }
 0x143   :  { %1915 = vtanh.f32 %v572_v48  ;;  %v575_v2 = vadd.f32 %v544_v58, %v469_v60  ;;  %v576_v5 = vadd.f32 %v544_v58, %v470_v62  ;;  %v556_v10 = vrot.slane %v526_v63, %v2288_v29 }
 0x144   :  { %1917 = vtanh.f32 %v573_v53  ;;  %v579_v11 = vadd.f32 %v552_v1, %v473_v3  ;;  %v580_v15 = vadd.f32 %v552_v1, %v474_v7  ;;  %v560_v19 = vrot.slane %v528_v8, %v2288_v29 }
 0x145   :  { %1919 = vtanh.f32 %v574_v55  ;;  %v581_v21 = vadd.f32 %v556_v10, %v475_v14  ;;  %v582_v26 = vadd.f32 %v556_v10, %v476_v18 }
 0x146   :  { %1921 = vtanh.f32 %v577_v59  ;;  %v583_v31 = vadd.f32 %v560_v19, %v477_v25  ;;  %v584_v34 = vadd.f32 %v560_v19, %v478_v30 }
 0x147   :  { %1923 = vtanh.f32 %v578_v61  ;;  %v672_v61 = vand.u32 127, %v484_v20 }
 0x148   :  { %1925 = vtanh.f32 %v575_v2 }
 0x149   :  { %1927 = vtanh.f32 %v576_v5  ;;  %v677_v63 = vadd.s32 4294967288, %v672_v61  ;;  %v2344_v5 = vsub.s32 %v672_v61, %v2281_v22 }
 0x14a   :  { %1929 = vtanh.f32 %v579_v11 }
 0x14b   :  { %1931 = vtanh.f32 %v580_v15  ;;  %v2339_v3 = vsub.s32 %v677_v63, %v2281_v22  ;;  %v793_v63 = vsub.s32 6, %v2281_v22 }
 0x14c   :  { %1933 = vtanh.f32 %v581_v21 }
 0x14d   :  { %v1910_v6 = vpop.eup %1909  ;;  %1935 = vtanh.f32 %v582_v26 }
 0x14e   :  { %v1912_v9 = vpop.eup %1911  ;;  %v607_v12 = vmul.f32 %v1910_v6, %v2299_v4  ;;  %1937 = vtanh.f32 %v583_v31 }
 0x14f   :  { %v1914_v13 = vpop.eup %1913  ;;  %v608_v23 = vmul.f32 %v1912_v9, %v2299_v4  ;;  %1939 = vtanh.f32 %v584_v34 }
 0x150   :  { %623 = vadd.xlane.f32.xlu0 %v607_v12  ;;  %v609_v16 = vmul.f32 %v1914_v13, %v2299_v4  ;;  %v1916_v17 = vpop.eup %1915 }
 0x151   :  { %v1918_v24 = vpop.eup %1917  ;;  %v610_v27 = vmul.f32 %v1916_v17, %v2299_v4 }
 0x152   :  { %627 = vadd.xlane.f32.xlu1 %v609_v16  ;;  %v1920_v28 = vpop.eup %1919  ;;  %v611_v32 = vmul.f32 %v1918_v24, %v2299_v4 }
 0x153   :  { %v1922_v33 = vpop.eup %1921  ;;  %v612_v35 = vmul.f32 %v1920_v28, %v2299_v4 }
 0x154   :  { %625 = vadd.xlane.f32.xlu0 %v608_v23  ;;  %v1924_v36 = vpop.eup %1923  ;;  %v615_v37 = vmul.f32 %v1922_v33, %v2299_v4 }
 0x155   :  { %v1926_v38 = vpop.eup %1925  ;;  %v616_v39 = vmul.f32 %v1924_v36, %v2299_v4 }
 0x156   :  { %629 = vadd.xlane.f32.xlu1 %v610_v27  ;;  %v1928_v40 = vpop.eup %1927  ;;  %v613_v41 = vmul.f32 %v1926_v38, %v2299_v4 }
 0x157   :  { %v1930_v42 = vpop.eup %1929  ;;  %v614_v43 = vmul.f32 %v1928_v40, %v2299_v4 }
 0x158   :  { %631 = vadd.xlane.f32.xlu0 %v611_v32  ;;  %v1932_v44 = vpop.eup %1931  ;;  %v617_v45 = vmul.f32 %v1930_v42, %v2299_v4 }
 0x159   :  { %v1934_v46 = vpop.eup %1933  ;;  %v618_v47 = vmul.f32 %v1932_v44, %v2299_v4 }
 0x15a   :  { %633 = vadd.xlane.f32.xlu1 %v612_v35  ;;  %v1936_v48 = vpop.eup %1935  ;;  %v619_v49 = vmul.f32 %v1934_v46, %v2299_v4  ;;  %v2174_v46 = vmov 0  }
 0x15b   :  { %v1938_v50 = vpop.eup %1937  ;;  %v620_v51 = vmul.f32 %v1936_v48, %v2299_v4  ;;  %1908 = vset.pattern.permute.xlu0 %v2174_v46  ;;  %1907 = vset.pattern.permute.xlu1 %v2174_v46 }
 0x15c   :  { %639 = vadd.xlane.f32.xlu0 %v615_v37  ;;  %v1940_v52 = vpop.eup %1939  ;;  %v621_v53 = vmul.f32 %v1938_v50, %v2299_v4 }
 0x15d   :  { %v622_v54 = vmul.f32 %v1940_v52, %v2299_v4 }
 0x15e   :  { %641 = vadd.xlane.f32.xlu1 %v616_v39 }
 0x160   :  { %635 = vadd.xlane.f32.xlu0 %v613_v41 }
 0x162   :  { %637 = vadd.xlane.f32.xlu1 %v614_v43 }
 0x164   :  { %643 = vadd.xlane.f32.xlu0 %v617_v45 }
 0x166   :  { %645 = vadd.xlane.f32.xlu1 %v618_v47  ;;  %v2407_v47 = vsub.s32 1, %v2281_v22 }
 0x168   :  { %647 = vadd.xlane.f32.xlu0 %v619_v49 }
 0x16a   :  { %649 = vadd.xlane.f32.xlu1 %v620_v51  ;;  %v789_v51 = vsub.s32 5, %v2281_v22 }
 0x16c   :  { %651 = vadd.xlane.f32.xlu0 %v621_v53 }
 0x16e   :  { %653 = vadd.xlane.f32.xlu1 %v622_v54  ;;  %v2415_v54 = vsub.s32 2, %v2281_v22 }
 0x1d9   :  { %v2319_v55 = vpop.xlane.xlu0 %623 }
 0x1da   :  { %v676_v13 = vrot.slane %v2319_v55, %v2344_v5 }
 0x1db   :  { %v2321_v56 = vpop.xlane.xlu1 %627 }
 0x1dc   :  { %v687_v8 = vrot.slane %v2321_v56, %v2344_v5 }
 0x1dd   :  { %v2323_v57 = vpop.xlane.xlu0 %625 }
 0x1de   :  { %v681_v9 = vrot.slane %v2323_v57, %v2339_v3 }
 0x1df   :  { %v2325_v58 = vpop.xlane.xlu1 %629 }
 0x1e0   :  { %v691_v6 = vrot.slane %v2325_v58, %v2339_v3  ;;  %v683_v18 = vsel %vm682_vm1, %v681_v9, %v676_v13  ;;  %v2431_v13 = vsub.s32 3, %v2281_v22 }
 0x1e1   :  { %v2327_v59 = vpop.xlane.xlu0 %631 }
 0x1e2   :  { %v696_v11 = vrot.slane %v2327_v59, %v2344_v5  ;;  %v692_v14 = vsel %vm682_vm1, %v691_v6, %v687_v8 }
 0x1e3   :  { %v2329_v60 = vpop.xlane.xlu1 %633  ;;  %v748_v23 = vsel %vm747_vm2, %v692_v14, %v683_v18 }
 0x1e4   :  { %v700_v20 = vrot.slane %v2329_v60, %v2339_v3 }
 0x1e5   :  { %v2332_v62 = vpop.xlane.xlu0 %639 }
 0x1e6   :  { %v701_v16 = vsel %vm682_vm1, %v700_v20, %v696_v11  ;;  %v714_v30 = vrot.slane %v2332_v62, %v2344_v5 }
 0x1e7   :  { %v2334_v1 = vpop.xlane.xlu1 %641  ;;  %v750_v26 = vsel %vm749_vm3, %v701_v16, %v748_v23 }
 0x1e8   :  { %v718_v24 = vrot.slane %v2334_v1, %v2339_v3 }
 0x1e9   :  { %v2336_v2 = vpop.xlane.xlu0 %635 }
 0x1ea   :  { %v705_v15 = vrot.slane %v2336_v2, %v2344_v5  ;;  %v719_v35 = vsel %vm682_vm1, %v718_v24, %v714_v30 }
 0x1eb   :  { %v2341_v4 = vpop.xlane.xlu1 %637 }
 0x1ec   :  { %v709_v10 = vrot.slane %v2341_v4, %v2339_v3 }
 0x1ed   :  { %v2350_v7 = vpop.xlane.xlu0 %643 }
 0x1ee   :  { %v710_v19 = vsel %vm682_vm1, %v709_v10, %v705_v15  ;;  %v723_v27 = vrot.slane %v2350_v7, %v2344_v5 }
 0x1ef   :  { %v2360_v12 = vpop.xlane.xlu1 %645  ;;  %v752_v31 = vsel %vm751_vm4, %v710_v19, %v750_v26 }
 0x1f0   :  { %v727_v21 = vrot.slane %v2360_v12, %v2339_v3  ;;  %v754_v40 = vsel %vm753_vm5, %v719_v35, %v752_v31 }
 0x1f1   :  { %v2368_v17 = vpop.xlane.xlu0 %647 }
 0x1f2   :  { %v732_v32 = vrot.slane %v2368_v17, %v2344_v5  ;;  %v728_v34 = vsel %vm682_vm1, %v727_v21, %v723_v27 }
 0x1f3   :  { %v2377_v25 = vpop.xlane.xlu1 %649  ;;  %v756_v41 = vsel %vm755_vm6, %v728_v34, %v754_v40 }
 0x1f4   :  { %v736_v28 = vrot.slane %v2377_v25, %v2339_v3 }
 0x1f5   :  { %v2389_v33 = vpop.xlane.xlu0 %651 }
 0x1f6   :  { %v737_v37 = vsel %vm682_vm1, %v736_v28, %v732_v32  ;;  %v741_v38 = vrot.slane %v2389_v33, %v2344_v5 }
 0x1f7   :  { %v2393_v36 = vpop.xlane.xlu1 %653  ;;  %v758_v43 = vsel %vm757_vm7, %v737_v37, %v756_v41 }
 0x1f8   :  { %v745_v39 = vrot.slane %v2393_v36, %v2339_v3 }
 0x1fa   :  { %v746_v42 = vsel %vm682_vm1, %v745_v39, %v741_v38 }
 0x1fb   :  { %v760_v44 = vsel %vm759_vm8, %v746_v42, %v758_v43 }
 0x1fc   :  { %v763_v45 = vsel %vm762_vm9, %v760_v44, -inf }
 0x1fd   :  { %764 = vmax.xlane.f32.xlu0 %v763_v45 }
 0x286   :  { %v765_v48 = vpop.xlane.xlu0 %764 }
 0x287   :  { %v770_v49 = vrot.slane %v765_v48, %v2288_v29  ;;  %v774_v50 = vrot.slane %v765_v48, %v2407_v47  ;;  %v2421_v6 = vrot.slane %v765_v48, %v789_v51  ;;  %v778_v9 = vrot.slane %v765_v48, %v2415_v54 }
 0x288   :  { %v782_v19 = vrot.slane %v765_v48, %v2431_v13 }
 0x289   :  { %v807_v52 = vsub.f32 %v2319_v55, %v770_v49  ;;  %v808_v53 = vsub.f32 %v2323_v57, %v770_v49  ;;  %v809_v61 = vsub.f32 %v2321_v56, %v774_v50  ;;  %v810_v10 = vsub.f32 %v2325_v58, %v774_v50 }
 0x28a   :  { %v797_v57 = vsub.s32 7, %v2281_v22  ;;  %v794_v56 = vrot.slane %v765_v48, %v793_v63  ;;  %v817_v11 = vsub.f32 %v2350_v7, %v2421_v6  ;;  %v811_v14 = vsub.f32 %v2327_v59, %v778_v9 }
 0x28b   :  { %v823_v20 = vmul.f32 1.442695, %v807_v52  ;;  %v825_v8 = vmul.f32 1.442695, %v808_v53  ;;  %v827_v55 = vmul.f32 1.442695, %v809_v61  ;;  %v812_v21 = vsub.f32 %v2329_v60, %v778_v9 }
 0x28c   :  { %v829_v15 = vmul.f32 1.442695, %v810_v10  ;;  %v798_v58 = vrot.slane %v765_v48, %v797_v57  ;;  %v819_v16 = vsub.f32 %v2368_v17, %v794_v56  ;;  %v843_v18 = vmul.f32 1.442695, %v817_v11 }
 0x28d   :  { %1941 = vpow2.f32 %v823_v20  ;;  %v831_v23 = vmul.f32 1.442695, %v811_v14  ;;  %v2441_v59 = vsub.s32 4, %v2281_v22  ;;  %v813_v26 = vsub.f32 %v2336_v2, %v782_v19  ;;  %v226_v22 = vld [vmem:[#allocation13 + $0x280] sm:$0xff] }
 0x28e   :  { %1943 = vpow2.f32 %v825_v8  ;;  %v821_v7 = vsub.f32 %v2389_v33, %v798_v58  ;;  %v847_v24 = vmul.f32 1.442695, %v819_v16  ;;  %v833_v27 = vmul.f32 1.442695, %v812_v21 }
 0x28f   :  { %1945 = vpow2.f32 %v827_v55  ;;  %v786_v60 = vrot.slane %v765_v48, %v2441_v59  ;;  %v814_v31 = vsub.f32 %v2341_v4, %v782_v19  ;;  %v835_v32 = vmul.f32 1.442695, %v813_v26 }
 0x290   :  { %1947 = vpow2.f32 %v829_v15  ;;  %v851_v30 = vmul.f32 1.442695, %v821_v7  ;;  %v820_v43 = vsub.f32 %v2377_v25, %v794_v56 }
 0x291   :  { %1949 = vpow2.f32 %v843_v18  ;;  %v815_v2 = vsub.f32 %v2332_v62, %v786_v60  ;;  %v837_v34 = vmul.f32 1.442695, %v814_v31  ;;  %v816_v38 = vsub.f32 %v2334_v1, %v786_v60 }
 0x292   :  { %1951 = vpow2.f32 %v831_v23  ;;  %v818_v62 = vsub.f32 %v2360_v12, %v2421_v6  ;;  %v822_v12 = vsub.f32 %v2393_v36, %v798_v58  ;;  %v849_v46 = vmul.f32 1.442695, %v820_v43 }
 0x293   :  { %1953 = vpow2.f32 %v847_v24  ;;  %v839_v4 = vmul.f32 1.442695, %v815_v2  ;;  %v841_v41 = vmul.f32 1.442695, %v816_v38 }
 0x294   :  { %1955 = vpow2.f32 %v833_v27  ;;  %v845_v44 = vmul.f32 1.442695, %v818_v62  ;;  %v853_v49 = vmul.f32 1.442695, %v822_v12 }
 0x295   :  { %1957 = vpow2.f32 %v851_v30 }
 0x296   :  { %1959 = vpow2.f32 %v835_v32 }
 0x297   :  { %1961 = vpow2.f32 %v837_v34 }
 0x298   :  { %1963 = vpow2.f32 %v839_v4 }
 0x299   :  { %1965 = vpow2.f32 %v841_v41 }
 0x29a   :  { %v2444_v28 = vpop.eup %1941  ;;  %1967 = vpow2.f32 %v845_v44 }
 0x29b   :  { %v2446_v17 = vpop.eup %1943  ;;  %872 = vperm.xlu1 %1907, %v2444_v28   ;;  %1969 = vpow2.f32 %v849_v46 }
 0x29c   :  { %875 = vperm.xlu0 %1908, %v2446_v17   ;;  %v2452_v33 = vpop.eup %1945  ;;  %1971 = vpow2.f32 %v853_v49 }
 0x29d   :  { %v2456_v35 = vpop.eup %1947 }
 0x29e   :  { %v2459_v37 = vpop.eup %1949 }
 0x29f   :  { %878 = vperm.xlu1 %1907, %v2452_v33   ;;  %v2463_v39 = vpop.eup %1951 }
 0x2a0   :  { %902 = vperm.xlu0 %1908, %v2459_v37   ;;  %v2466_v40 = vpop.eup %1953 }
 0x2a1   :  { %v2471_v42 = vpop.eup %1955 }
 0x2a2   :  { %v2474_v1 = vpop.eup %1957 }
 0x2a3   :  { %881 = vperm.xlu1 %1907, %v2456_v35   ;;  %v2478_v45 = vpop.eup %1959 }
 0x2a4   :  { %908 = vperm.xlu0 %1908, %v2466_v40   ;;  %v2482_v48 = vpop.eup %1961 }
 0x2a5   :  { %v2485_v50 = vpop.eup %1963 }
 0x2a6   :  { %v2488_v25 = vpop.eup %1965 }
 0x2a7   :  { %884 = vperm.xlu1 %1907, %v2463_v39   ;;  %v2491_v52 = vpop.eup %1967 }
 0x2a8   :  { %914 = vperm.xlu0 %1908, %v2474_v1   ;;  %v2494_v36 = vpop.eup %1969 }
 0x2a9   :  { %v2497_v53 = vpop.eup %1971 }
 0x2ab   :  { %887 = vperm.xlu1 %1907, %v2471_v42  }
 0x2af   :  { %890 = vperm.xlu1 %1907, %v2478_v45  }
 0x2b3   :  { %893 = vperm.xlu1 %1907, %v2482_v48  }
 0x2b7   :  { %896 = vperm.xlu1 %1907, %v2485_v50  }
 0x2bb   :  { %899 = vperm.xlu1 %1907, %v2488_v25  }
 0x2bf   :  { %905 = vperm.xlu1 %1907, %v2491_v52  }
 0x2c3   :  { %911 = vperm.xlu1 %1907, %v2494_v36  }
 0x2c7   :  { %917 = vperm.xlu1 %1907, %v2497_v53  }
 0x316   :  { %v873_v61 = vpop.permute.xlu1 %872 }
 0x317   :  { %v876_v55 = vpop.permute.xlu0 %875  ;;  %v922_v23 = vrot.slane %v873_v61, %v2344_v5 }
 0x318   :  { %v926_v21 = vrot.slane %v876_v55, %v2339_v3 }
 0x31a   :  { %v879_v6 = vpop.permute.xlu1 %878  ;;  %v927_v38 = vsel %vm682_vm1, %v926_v21, %v922_v23  ;;  %v212_v21 = vld [vmem:[#allocation13 + $0x210] sm:$0xff]  ;;  %v207_v23 = vld [vmem:[#allocation13 + $0x1e8] sm:$0xff] }
 0x31b   :  { %v903_v14 = vpop.permute.xlu0 %902  ;;  %v931_v7 = vrot.slane %v879_v6, %v2344_v5 }
 0x31c   :  { %v967_v4 = vrot.slane %v903_v14, %v2344_v5 }
 0x31e   :  { %v882_v20 = vpop.permute.xlu1 %881 }
 0x31f   :  { %v935_v58 = vrot.slane %v882_v20, %v2339_v3  ;;  %v909_v16 = vpop.permute.xlu0 %908 }
 0x320   :  { %v976_v43 = vrot.slane %v909_v16, %v2344_v5  ;;  %v222_v16 = vld [vmem:[#allocation13 + $0x260] sm:$0xff] }
 0x321   :  { %v936_v30 = vsel %vm682_vm1, %v935_v58, %v931_v7  ;;  %1279 = vmatprep.subr.mxu1 %v222_v16  ;;  %v206_v7 = vld [vmem:[#allocation13 + $0x1e0] sm:$0xff]  ;;  %v147_v16 = vld [vmem:[#allocation13 + $0x8] sm:$0xff] }
 0x322   :  { %v885_v8 = vpop.permute.xlu1 %884  ;;  %v991_v44 = vsel %vm747_vm2, %v936_v30, %v927_v38  ;;  %v196_v30 = vld [vmem:[#allocation13 + $0x190] sm:$0xff]  ;;  %v181_v38 = vld [vmem:[#allocation13 + $0x118] sm:$0xff] }
 0x323   :  { %v940_v26 = vrot.slane %v885_v8, %v2344_v5  ;;  %v915_v12 = vpop.permute.xlu0 %914 }
 0x326   :  { %v888_v9 = vpop.permute.xlu1 %887 }
 0x327   :  { %v944_v18 = vrot.slane %v888_v9, %v2339_v3  ;;  %v985_v9 = vrot.slane %v915_v12, %v2344_v5  ;;  %v166_v12 = vld [vmem:[#allocation13 + $0xa0] sm:$0xff] }
 0x329   :  { %v945_v32 = vsel %vm682_vm1, %v944_v18, %v940_v26  ;;  %v221_v18 = vld [vmem:[#allocation13 + $0x258] sm:$0xff] }
 0x32a   :  { %v891_v10 = vpop.permute.xlu1 %890  ;;  %v992_v49 = vsel %vm749_vm3, %v945_v32, %v991_v44  ;;  %1280 = vmatpush1.msra.mxu1 %v221_v18  ;;  %v201_v26 = vld [vmem:[#allocation13 + $0x1b8] sm:$0xff]  ;;  %v187_v32 = vld [vmem:[#allocation13 + $0x148] sm:$0xff] }
 0x32b   :  { %v949_v60 = vrot.slane %v891_v10, %v2344_v5  ;;  %v167_v44 = vld [vmem:[#allocation13 + $0xa8] sm:$0xff] }
 0x32e   :  { %v894_v56 = vpop.permute.xlu1 %893 }
 0x32f   :  { %v953_v24 = vrot.slane %v894_v56, %v2339_v3 }
 0x331   :  { %v954_v62 = vsel %vm682_vm1, %v953_v24, %v949_v60  ;;  %v202_v24 = vld [vmem:[#allocation13 + $0x1c0] sm:$0xff]  ;;  %v192_v60 = vld [vmem:[#allocation13 + $0x170] sm:$0xff] }
 0x332   :  { %v897_v11 = vpop.permute.xlu1 %896  ;;  %v993_v6 = vsel %vm751_vm4, %v954_v62, %v992_v49  ;;  %v176_v62 = vld [vmem:[#allocation13 + $0xf0] sm:$0xff]  ;;  %v161_v49 = vld [vmem:[#allocation13 + $0x78] sm:$0xff] }
 0x333   :  { %v958_v2 = vrot.slane %v897_v11, %v2344_v5  ;;  %v216_v5 = vld [vmem:[#allocation13 + $0x230] sm:$0xff] }
 0x336   :  { %v900_v15 = vpop.permute.xlu1 %899 }
 0x337   :  { %v962_v27 = vrot.slane %v900_v15, %v2339_v3 }
 0x339   :  { %v963_v46 = vsel %vm682_vm1, %v962_v27, %v958_v2  ;;  %v197_v27 = vld [vmem:[#allocation13 + $0x198] sm:$0xff]  ;;  %v186_v2 = vld [vmem:[#allocation13 + $0x140] sm:$0xff] }
 0x33a   :  { %v906_v19 = vpop.permute.xlu1 %905  ;;  %v994_v10 = vsel %vm753_vm5, %v963_v46, %v993_v6  ;;  %v162_v46 = vld [vmem:[#allocation13 + $0x80] sm:$0xff] }
 0x33b   :  { %v971_v31 = vrot.slane %v906_v19, %v2339_v3  ;;  %v217_v19 = vld [vmem:[#allocation13 + $0x238] sm:$0xff] }
 0x33c   :  { %1281 = vmatprep.subr.mxu1 %v217_v19 }
 0x33d   :  { %v972_v61 = vsel %vm682_vm1, %v971_v31, %v967_v4  ;;  %1282 = vmatpush1.msra.mxu1 %v216_v5  ;;  %v191_v31 = vld [vmem:[#allocation13 + $0x168] sm:$0xff]  ;;  %v177_v4 = vld [vmem:[#allocation13 + $0xf8] sm:$0xff] }
 0x33e   :  { %v912_v34 = vpop.permute.xlu1 %911  ;;  %v995_v56 = vsel %vm755_vm6, %v972_v61, %v994_v10  ;;  %1283 = vmatprep.subr.mxu1 %v212_v21  ;;  %v157_v61 = vld [vmem:[#allocation13 + $0x58] sm:$0xff] }
 0x33f   :  { %v980_v41 = vrot.slane %v912_v34, %v2339_v3  ;;  %v182_v34 = vld [vmem:[#allocation13 + $0x120] sm:$0xff] }
 0x341   :  { %v981_v20 = vsel %vm682_vm1, %v980_v41, %v976_v43  ;;  %v172_v41 = vld [vmem:[#allocation13 + $0xd0] sm:$0xff]  ;;  %v171_v43 = vld [vmem:[#allocation13 + $0xc8] sm:$0xff] }
 0x342   :  { %v918_v8 = vpop.permute.xlu1 %917  ;;  %v996_v14 = vsel %vm757_vm7, %v981_v20, %v995_v56  ;;  %v152_v56 = vld [vmem:[#allocation13 + $0x30] sm:$0xff] }
 0x343   :  { %v989_v55 = vrot.slane %v918_v8, %v2339_v3  ;;  %v211_v3 = vld [vmem:[#allocation13 + $0x208] sm:$0xff] }
 0x344   :  { %1284 = vmatpush1.msra.mxu1 %v211_v3  ;;  %v146_v3 = vld [vmem:[#allocation13] sm:$0xff] }
 0x345   :  { %v990_v11 = vsel %vm682_vm1, %v989_v55, %v985_v9  ;;  %1285 = vmatprep.subr.mxu1 %v207_v23  ;;  %v156_v55 = vld [vmem:[#allocation13 + $0x50] sm:$0xff]  ;;  %v301_v23 = vld [vmem:[#allocation13 + $0x4d8] sm:$0xff] }
 0x346   :  { %v997_v15 = vsel %vm759_vm8, %v990_v11, %v996_v14  ;;  %1286 = vmatpush1.msra.mxu1 %v206_v7  ;;  %v151_v11 = vld [vmem:[#allocation13 + $0x28] sm:$0xff]  ;;  %v296_v7 = vld [vmem:[#allocation13 + $0x4b0] sm:$0xff] }
 0x347   :  { %v999_v58 = vsel %vm762_vm9, %v997_v15, 0.0  ;;  %1287 = vmatprep.subr.mxu1 %v202_v24  ;;  %v292_v24 = vld [vmem:[#allocation13 + $0x490] sm:$0xff] }
 0x348   :  { %1000 = vadd.xlane.f32.xlu0 %v999_v58  ;;  %1288 = vmatpush1.msra.mxu1 %v201_v26  ;;  %v291_v26 = vld [vmem:[#allocation13 + $0x488] sm:$0xff] }
 0x349   :  { %1289 = vmatprep.subr.mxu1 %v197_v27  ;;  %v287_v27 = vld [vmem:[#allocation13 + $0x468] sm:$0xff] }
 0x34a   :  { %1290 = vmatpush1.msra.mxu1 %v196_v30  ;;  %v286_v30 = vld [vmem:[#allocation13 + $0x460] sm:$0xff] }
 0x34b   :  { %1291 = vmatprep.subr.mxu1 %v192_v60  ;;  %v282_v60 = vld [vmem:[#allocation13 + $0x440] sm:$0xff] }
 0x34c   :  { %1292 = vmatpush1.msra.mxu1 %v191_v31  ;;  %v281_v31 = vld [vmem:[#allocation13 + $0x438] sm:$0xff] }
 0x34d   :  { %1293 = vmatprep.subr.mxu1 %v187_v32  ;;  %v276_v32 = vld [vmem:[#allocation13 + $0x410] sm:$0xff] }
 0x34e   :  { %1294 = vmatpush1.msra.mxu1 %v186_v2  ;;  %v272_v2 = vld [vmem:[#allocation13 + $0x3f0] sm:$0xff] }
 0x34f   :  { %1295 = vmatprep.subr.mxu1 %v182_v34 }
 0x350   :  { %1296 = vmatpush1.msra.mxu1 %v181_v38  ;;  %v271_v38 = vld [vmem:[#allocation13 + $0x3e8] sm:$0xff] }
 0x351   :  { %1297 = vmatprep.subr.mxu1 %v177_v4  ;;  %v267_v4 = vld [vmem:[#allocation13 + $0x3c8] sm:$0xff] }
 0x352   :  { %1298 = vmatpush1.msra.mxu1 %v176_v62 }
 0x353   :  { %1299 = vmatprep.subr.mxu1 %v172_v41  ;;  %v266_v41 = vld [vmem:[#allocation13 + $0x3c0] sm:$0xff] }
 0x354   :  { %1300 = vmatpush1.msra.mxu1 %v171_v43  ;;  %v262_v43 = vld [vmem:[#allocation13 + $0x3a0] sm:$0xff] }
 0x355   :  { %1301 = vmatprep.subr.mxu1 %v167_v44  ;;  %v257_v44 = vld [vmem:[#allocation13 + $0x378] sm:$0xff] }
 0x356   :  { %1302 = vmatpush1.msra.mxu1 %v166_v12  ;;  %v256_v12 = vld [vmem:[#allocation13 + $0x370] sm:$0xff] }
 0x357   :  { %1303 = vmatprep.subr.mxu1 %v162_v46  ;;  %v252_v46 = vld [vmem:[#allocation13 + $0x350] sm:$0xff] }
 0x358   :  { %1304 = vmatpush1.msra.mxu1 %v161_v49 }
 0x359   :  { %1305 = vmatprep.subr.mxu1 %v157_v61  ;;  %v251_v61 = vld [vmem:[#allocation13 + $0x348] sm:$0xff] }
 0x35a   :  { %1306 = vmatpush1.msra.mxu1 %v156_v55  ;;  %v237_v55 = vld [vmem:[#allocation13 + $0x2d8] sm:$0xff] }
 0x35b   :  { %1307 = vmatprep.subr.mxu1 %v152_v56  ;;  %v236_v56 = vld [vmem:[#allocation13 + $0x2d0] sm:$0xff] }
 0x35c   :  { %1308 = vmatpush1.msra.mxu1 %v151_v11  ;;  %v232_v11 = vld [vmem:[#allocation13 + $0x2b0] sm:$0xff] }
 0x35d   :  { %1309 = vmatprep.subr.mxu1 %v147_v16  ;;  %v377_v16 = vld [vmem:[#allocation13 + $0x738] sm:$0xff] }
 0x35e   :  { %1310 = vmatpush1.msra.mxu1 %v146_v3  ;;  %v374_v3 = vld [vmem:[#allocation13 + $0x720] sm:$0xff] }
 0x3d1   :  { %v1001_v6 = vpop.xlane.xlu0 %1000 }
 0x3d2   :  { %v1002_v20 = vmax.f32 %v1001_v6, 1e-09 }
 0x3d4   :  { %1973 = vrcp.f32 %v1002_v20  ;;  %v246_v20 = vld [vmem:[#allocation13 + $0x320] sm:$0xff] }
 0x3e1   :  { %v2532_v8 = vpop.eup %1973 }
 0x3e2   :  { %v2536_v9 = vrot.slane %v2532_v8, %v2441_v59  ;;  %v1008_v10 = vrot.slane %v2532_v8, %v2288_v29  ;;  %v2546_v58 = vrot.slane %v2532_v8, %v797_v57  ;;  %v1016_v5 = vrot.slane %v2532_v8, %v2415_v54 }
 0x3e3   :  { %v1028_v62 = vrot.slane %v2532_v8, %v789_v51  ;;  %v1032_v6 = vrot.slane %v2532_v8, %v793_v63  ;;  %v382_v63 = vld [vmem:[#allocation13 + $0x760] sm:$0xff] }
 0x3e4   :  { %v1053_v14 = vmul.f32 %v2485_v50, %v2536_v9  ;;  %v1045_v15 = vmul.f32 %v2444_v28, %v1008_v10  ;;  %v1059_v18 = vmul.f32 %v2474_v1, %v2546_v58  ;;  %v1046_v19 = vmul.f32 %v2446_v17, %v1008_v10  ;;  %v302_v1 = vld [vmem:[#allocation13 + $0x4e0] sm:$0xff]  ;;  %v297_v17 = vld [vmem:[#allocation13 + $0x4b8] sm:$0xff]  ;;  %1350 = vmatprep.subr.mxu0 %v382_v63  ;;  %v312_v63 = vld [vmem:[#allocation13 + $0x530] sm:$0xff] }
 0x3e5   :  { %v1012_v50 = vrot.slane %v2532_v8, %v2407_v47  ;;  %v1049_v21 = vmul.f32 %v2463_v39, %v1016_v5  ;;  %1311 = vmatprep.subr.mxu1 %v302_v1  ;;  %v1055_v49 = vmul.f32 %v2459_v37, %v1028_v62  ;;  %v1056_v51 = vmul.f32 %v2491_v52, %v1028_v62  ;;  %v241_v10 = vld [vmem:[#allocation13 + $0x2f8] sm:$0xff]  ;;  %v227_v52 = vld [vmem:[#allocation13 + $0x288] sm:$0xff] }
 0x3e6   :  { %1119 = vperm.xlu0 %1908, %v1053_v14   ;;  %1079 = vperm.xlu1 %1907, %v1045_v15   ;;  %v1057_v37 = vmul.f32 %v2466_v40, %v1032_v6  ;;  %v231_v14 = vld [vmem:[#allocation13 + $0x2a8] sm:$0xff]  ;;  %v384_v15 = vld [vmem:[#allocation13 + $0x770] sm:$0xff]  ;;  %v341_v62 = vld [vmem:[#allocation13 + $0x618] sm:$0xff] }
 0x3e7   :  { %v1047_v28 = vmul.f32 %v2452_v33, %v1012_v50  ;;  %v1048_v57 = vmul.f32 %v2456_v35, %v1012_v50  ;;  %1312 = vmatpush2.msra.mxu1 %v301_v23  ;;  %v1050_v33 = vmul.f32 %v2471_v42, %v1016_v5  ;;  %v1020_v35 = vrot.slane %v2532_v8, %v2431_v13  ;;  %v277_v42 = vld [vmem:[#allocation13 + $0x418] sm:$0xff]  ;;  %v2575_v40 = vld [vmem:[#allocation2] sm:$0xff]  ;;  %v372_v5 = vld [vmem:[#allocation13 + $0x710] sm:$0xff] }
 0x3e8   :  { %1313 = vmatprep.subr.mxu1 %v297_v17  ;;  %v381_v8 = vld [vmem:[#allocation13 + $0x758] sm:$0xff]  ;;  %v383_v50 = vld [vmem:[#allocation13 + $0x768] sm:$0xff]  ;;  %v366_v17 = vld [vmem:[#allocation13 + $0x6e0] sm:$0xff] }
 0x3e9   :  { %1314 = vmatpush2.msra.mxu1 %v296_v7  ;;  %v1051_v39 = vmul.f32 %v2478_v45, %v1020_v35  ;;  %v1052_v34 = vmul.f32 %v2482_v48, %v1020_v35  ;;  %v1054_v45 = vmul.f32 %v2488_v25, %v2536_v9  ;;  %v261_v48 = vld [vmem:[#allocation13 + $0x398] sm:$0xff]  ;;  %v247_v25 = vld [vmem:[#allocation13 + $0x328] sm:$0xff]  ;;  %v242_v9 = vld [vmem:[#allocation13 + $0x300] sm:$0xff]  ;;  %1351 = vmatpush1.msra.mxu0 %v381_v8 }
 0x3ea   :  { %1149 = vperm.xlu0 %1908, %v1059_v18   ;;  %1084 = vperm.xlu1 %1907, %v1046_v19   ;;  %v1058_v18 = vmul.f32 %v2494_v36, %v1032_v6  ;;  %v376_v19 = vld [vmem:[#allocation13 + $0x730] sm:$0xff]  ;;  %v378_v36 = vld [vmem:[#allocation13 + $0x740] sm:$0xff]  ;;  %v367_v1 = vld [vmem:[#allocation13 + $0x6e8] sm:$0xff] }
 0x3eb   :  { %1315 = vmatprep.subr.mxu1 %v292_v24  ;;  %1352 = vmatprep.subr.mxu0 %v377_v16  ;;  %v373_v23 = vld [vmem:[#allocation13 + $0x718] sm:$0xff]  ;;  %v362_v24 = vld [vmem:[#allocation13 + $0x6c0] sm:$0xff] }
 0x3ec   :  { %1316 = vmatpush2.msra.mxu1 %v291_v26  ;;  %1353 = vmatpush1.msra.mxu0 %v376_v19  ;;  %v369_v7 = vld [vmem:[#allocation13 + $0x6f8] sm:$0xff]  ;;  %v363_v26 = vld [vmem:[#allocation13 + $0x6c8] sm:$0xff]  ;;  %v318_v8 = vld [vmem:[#allocation13 + $0x560] sm:$0xff] }
 0x3ed   :  { %1317 = vmatprep.subr.mxu1 %v287_v27  ;;  %1354 = vmatprep.subr.mxu0 %v372_v5  ;;  %v357_v35 = vld [vmem:[#allocation13 + $0x698] sm:$0xff]  ;;  %v356_v27 = vld [vmem:[#allocation13 + $0x690] sm:$0xff]  ;;  %v314_v16 = vld [vmem:[#allocation13 + $0x540] sm:$0xff] }
 0x3ee   :  { %1089 = vperm.xlu1 %1907, %v1047_v28   ;;  %1318 = vmatpush2.msra.mxu1 %v286_v30  ;;  %v379_v28 = vld [vmem:[#allocation13 + $0x748] sm:$0xff]  ;;  %v352_v30 = vld [vmem:[#allocation13 + $0x670] sm:$0xff]  ;;  %v333_v6 = vld [vmem:[#allocation13 + $0x5d8] sm:$0xff] }
 0x3ef   :  { %1319 = vmatprep.subr.mxu1 %v282_v60  ;;  %v358_v60 = vld [vmem:[#allocation13 + $0x6a0] sm:$0xff]  ;;  %v313_v19 = vld [vmem:[#allocation13 + $0x538] sm:$0xff]  ;;  %v308_v5 = vld [vmem:[#allocation13 + $0x510] sm:$0xff] }
 0x3f0   :  { %1320 = vmatpush2.msra.mxu1 %v281_v31  ;;  %v351_v31 = vld [vmem:[#allocation13 + $0x668] sm:$0xff] }
 0x3f1   :  { %1321 = vmatprep.subr.mxu1 %v277_v42  ;;  %v354_v42 = vld [vmem:[#allocation13 + $0x680] sm:$0xff] }
 0x3f2   :  { %1094 = vperm.xlu1 %1907, %v1048_v57   ;;  %1322 = vmatpush2.msra.mxu1 %v276_v32  ;;  %v1060_v57 = vmul.f32 %v2497_v53, %v2546_v58  ;;  %v361_v53 = vld [vmem:[#allocation13 + $0x6b8] sm:$0xff]  ;;  %v364_v58 = vld [vmem:[#allocation13 + $0x6d0] sm:$0xff]  ;;  %v347_v32 = vld [vmem:[#allocation13 + $0x648] sm:$0xff] }
 0x3f3   :  { %1323 = vmatprep.subr.mxu1 %v272_v2  ;;  %v353_v2 = vld [vmem:[#allocation13 + $0x678] sm:$0xff] }
 0x3f4   :  { %1324 = vmatpush2.msra.mxu1 %v271_v38  ;;  %v349_v38 = vld [vmem:[#allocation13 + $0x658] sm:$0xff] }
 0x3f5   :  { %1325 = vmatprep.subr.mxu1 %v267_v4  ;;  %v342_v4 = vld [vmem:[#allocation13 + $0x620] sm:$0xff] }
 0x3f6   :  { %1099 = vperm.xlu1 %1907, %v1049_v21   ;;  %1326 = vmatpush2.msra.mxu1 %v266_v41  ;;  %v371_v21 = vld [vmem:[#allocation13 + $0x708] sm:$0xff]  ;;  %v344_v41 = vld [vmem:[#allocation13 + $0x630] sm:$0xff] }
 0x3f7   :  { %1327 = vmatprep.subr.mxu1 %v262_v43  ;;  %1355 = vmatpush1.msra.mxu0 %v371_v21  ;;  %v337_v43 = vld [vmem:[#allocation13 + $0x5f8] sm:$0xff] }
 0x3f8   :  { %1328 = vmatpush2.msra.mxu1 %v261_v48  ;;  %1356 = vmatprep.subr.mxu0 %v367_v1  ;;  %v343_v48 = vld [vmem:[#allocation13 + $0x628] sm:$0xff] }
 0x3f9   :  { %1329 = vmatprep.subr.mxu1 %v257_v44  ;;  %1357 = vmatpush1.msra.mxu0 %v366_v17  ;;  %v336_v44 = vld [vmem:[#allocation13 + $0x5f0] sm:$0xff] }
 0x3fa   :  { %1104 = vperm.xlu1 %1907, %v1050_v33   ;;  %1330 = vmatpush2.msra.mxu1 %v256_v12  ;;  %v368_v33 = vld [vmem:[#allocation13 + $0x6f0] sm:$0xff]  ;;  %v339_v12 = vld [vmem:[#allocation13 + $0x608] sm:$0xff] }
 0x3fb   :  { %1331 = vmatprep.subr.mxu1 %v252_v46  ;;  %1358 = vmatprep.subr.mxu0 %v362_v24  ;;  %v332_v46 = vld [vmem:[#allocation13 + $0x5d0] sm:$0xff] }
 0x3fc   :  { %1332 = vmatpush2.msra.mxu1 %v251_v61  ;;  %1359 = vmatpush1.msra.mxu0 %v361_v53  ;;  %v331_v61 = vld [vmem:[#allocation13 + $0x5c8] sm:$0xff] }
 0x3fd   :  { %1333 = vmatprep.subr.mxu1 %v247_v25  ;;  %1360 = vmatprep.subr.mxu0 %v357_v35  ;;  %v334_v25 = vld [vmem:[#allocation13 + $0x5e0] sm:$0xff]  ;;  %v1062_v35 = vld [vmem:[#allocation8 + $0x8] sm:$0xff] }
 0x3fe   :  { %1109 = vperm.xlu1 %1907, %v1051_v39   ;;  %1334 = vmatpush2.msra.mxu1 %v246_v20  ;;  %v359_v39 = vld [vmem:[#allocation13 + $0x6a8] sm:$0xff]  ;;  %v326_v20 = vld [vmem:[#allocation13 + $0x5a0] sm:$0xff] }
 0x3ff   :  { %1335 = vmatprep.subr.mxu1 %v242_v9  ;;  %1361 = vmatpush1.msra.mxu0 %v356_v27  ;;  %v329_v9 = vld [vmem:[#allocation13 + $0x5b8] sm:$0xff] }
 0x400   :  { %1336 = vmatpush2.msra.mxu1 %v241_v10  ;;  %1362 = vmatprep.subr.mxu0 %v352_v30  ;;  %v322_v10 = vld [vmem:[#allocation13 + $0x580] sm:$0xff]  ;;  %v1068_v27 = vld [vmem:[#allocation8 + $0x38] sm:$0xff] }
 0x401   :  { %1337 = vmatprep.subr.mxu1 %v237_v55  ;;  %1363 = vmatpush1.msra.mxu0 %v351_v31  ;;  %v328_v55 = vld [vmem:[#allocation13 + $0x5b0] sm:$0xff]  ;;  %v1065_v30 = vld [vmem:[#allocation8 + $0x20] sm:$0xff] }
 0x402   :  { %1114 = vperm.xlu1 %1907, %v1052_v34   ;;  %1338 = vmatpush2.msra.mxu1 %v236_v56  ;;  %v346_v34 = vld [vmem:[#allocation13 + $0x640] sm:$0xff]  ;;  %v324_v56 = vld [vmem:[#allocation13 + $0x590] sm:$0xff] }
 0x403   :  { %1339 = vmatprep.subr.mxu1 %v232_v11  ;;  %1364 = vmatprep.subr.mxu0 %v347_v32  ;;  %v317_v11 = vld [vmem:[#allocation13 + $0x558] sm:$0xff]  ;;  %v1061_v31 = vld [vmem:[#allocation8] sm:$0xff]  ;;  %v1067_v32 = vld [vmem:[#allocation8 + $0x30] sm:$0xff] }
 0x404   :  { %1340 = vmatpush2.msra.mxu1 %v231_v14  ;;  %1365 = vmatpush1.msra.mxu0 %v346_v34  ;;  %v323_v14 = vld [vmem:[#allocation13 + $0x588] sm:$0xff]  ;;  %v1069_v34 = vld [vmem:[#allocation8 + $0x40] sm:$0xff] }
 0x405   :  { %1341 = vmatprep.subr.mxu1 %v227_v52  ;;  %1366 = vmatprep.subr.mxu0 %v342_v4  ;;  %v316_v52 = vld [vmem:[#allocation13 + $0x550] sm:$0xff] }
 0x406   :  { %1124 = vperm.xlu1 %1907, %v1054_v45   ;;  %1342 = vmatpush2.msra.mxu1 %v226_v22  ;;  %v348_v45 = vld [vmem:[#allocation13 + $0x650] sm:$0xff]  ;;  %v319_v22 = vld [vmem:[#allocation13 + $0x568] sm:$0xff] }
 0x407   :  { %1492 = vmatprep.subr.mxu1 %v384_v15  ;;  %1344 = vmatmul.mubr.f32.vlgmr.msra.gmra.mxu1 %v2575_v40  ;;  %v311_v15 = vld [vmem:[#allocation13 + $0x528] sm:$0xff] }
 0x408   :  { %1493 = vmatpush1.msra.mxu1 %v383_v50  ;;  %1556 = vmatprep.mubr.f32.mxu1 %v2171_v0  ;;  %v306_v50 = vld [vmem:[#allocation13 + $0x500] sm:$0xff] }
 0x409   :  { %1494 = vmatprep.subr.mxu1 %v379_v28  ;;  %1367 = vmatpush1.msra.mxu0 %v341_v62  ;;  %v309_v28 = vld [vmem:[#allocation13 + $0x518] sm:$0xff] }
 0x40a   :  { %1129 = vperm.xlu1 %1907, %v1055_v49   ;;  %1495 = vmatpush1.msra.mxu1 %v378_v36  ;;  %v338_v49 = vld [vmem:[#allocation13 + $0x600] sm:$0xff]  ;;  %v305_v36 = vld [vmem:[#allocation13 + $0x4f8] sm:$0xff] }
 0x40b   :  { %1496 = vmatprep.subr.mxu1 %v374_v3  ;;  %1368 = vmatprep.subr.mxu0 %v337_v43 }
 0x40c   :  { %1497 = vmatpush1.msra.mxu1 %v373_v23  ;;  %1369 = vmatpush1.msra.mxu0 %v336_v44 }
 0x40d   :  { %1498 = vmatprep.subr.mxu1 %v369_v7  ;;  %1370 = vmatprep.subr.mxu0 %v332_v46 }
 0x40e   :  { %1134 = vperm.xlu1 %1907, %v1056_v51   ;;  %1499 = vmatpush1.msra.mxu1 %v368_v33  ;;  %v327_v51 = vld [vmem:[#allocation13 + $0x5a8] sm:$0xff]  ;;  %v1064_v33 = vld [vmem:[#allocation8 + $0x18] sm:$0xff] }
 0x40f   :  { %1500 = vmatprep.subr.mxu1 %v364_v58  ;;  %1371 = vmatpush1.msra.mxu0 %v331_v61  ;;  %v1066_v58 = vld [vmem:[#allocation8 + $0x28] sm:$0xff] }
 0x410   :  { %1501 = vmatpush1.msra.mxu1 %v363_v26  ;;  %1372 = vmatprep.subr.mxu0 %v327_v51  ;;  %v1063_v26 = vld [vmem:[#allocation8 + $0x10] sm:$0xff] }
 0x411   :  { %1502 = vmatprep.subr.mxu1 %v359_v39  ;;  %1373 = vmatpush1.msra.mxu0 %v326_v20  ;;  %v1071_v20 = vld [vmem:[#allocation8 + $0x50] sm:$0xff] }
 0x412   :  { %1139 = vperm.xlu1 %1907, %v1057_v37   ;;  %1503 = vmatpush1.msra.mxu1 %v358_v60  ;;  %v321_v37 = vld [vmem:[#allocation13 + $0x578] sm:$0xff]  ;;  %v1070_v60 = vld [vmem:[#allocation8 + $0x48] sm:$0xff] }
 0x413   :  { %1504 = vmatprep.subr.mxu1 %v354_v42  ;;  %1374 = vmatprep.subr.mxu0 %v322_v10 }
 0x414   :  { %1505 = vmatpush1.msra.mxu1 %v353_v2  ;;  %1375 = vmatpush1.msra.mxu0 %v321_v37 }
 0x415   :  { %1506 = vmatprep.subr.mxu1 %v349_v38  ;;  %1376 = vmatprep.subr.mxu0 %v317_v11 }
 0x416   :  { %1144 = vperm.xlu1 %1907, %v1058_v18   ;;  %1507 = vmatpush1.msra.mxu1 %v348_v45  ;;  %v307_v18 = vld [vmem:[#allocation13 + $0x508] sm:$0xff] }
 0x417   :  { %1508 = vmatprep.subr.mxu1 %v344_v41  ;;  %1377 = vmatpush1.msra.mxu0 %v316_v52 }
 0x418   :  { %1509 = vmatpush1.msra.mxu1 %v343_v48  ;;  %1378 = vmatprep.subr.mxu0 %v312_v63 }
 0x419   :  { %1510 = vmatprep.subr.mxu1 %v339_v12  ;;  %1379 = vmatpush1.msra.mxu0 %v311_v15 }
 0x41a   :  { %1154 = vperm.xlu1 %1907, %v1060_v57   ;;  %1511 = vmatpush1.msra.mxu1 %v338_v49  ;;  %v224_v57 = vld [vmem:[#allocation13 + $0x270] sm:$0xff] }
 0x41b   :  { %1512 = vmatprep.subr.mxu1 %v334_v25  ;;  %1380 = vmatprep.subr.mxu0 %v307_v18 }
 0x41c   :  { %1513 = vmatpush1.msra.mxu1 %v333_v6  ;;  %1381 = vmatpush1.msra.mxu0 %v306_v50 }
 0x41d   :  { %1514 = vmatprep.subr.mxu1 %v329_v9  ;;  %1421 = vmatprep.subr.mxu0 %v224_v57  ;;  %v1072_v9 = vld [vmem:[#allocation8 + $0x58] sm:$0xff]  ;;  %v1073_v57 = vld [vmem:[#allocation8 + $0x60] sm:$0xff] }
 0x41e   :  { %1515 = vmatpush1.msra.mxu1 %v328_v55 }
 0x41f   :  { %1516 = vmatprep.subr.mxu1 %v324_v56 }
 0x420   :  { %1517 = vmatpush1.msra.mxu1 %v323_v14 }
 0x421   :  { %1518 = vmatprep.subr.mxu1 %v319_v22 }
 0x422   :  { %1519 = vmatpush1.msra.mxu1 %v318_v8 }
 0x423   :  { %1520 = vmatprep.subr.mxu1 %v314_v16 }
 0x424   :  { %1521 = vmatpush1.msra.mxu1 %v313_v19 }
 0x425   :  { %1522 = vmatprep.subr.mxu1 %v309_v28 }
 0x426   :  { %1523 = vmatpush1.msra.mxu1 %v308_v5  ;;  %v1074_v5 = vld [vmem:[#allocation8 + $0x68] sm:$0xff] }
 0x427   :  { %1769 = vmatprep.subr.mxu1 %v305_v36 }
 0x461   :  { %v1080_v21 = vpop.permute.xlu1 %1079  ;;  %v1120_v38 = vpop.permute.xlu0 %1119 }
 0x462   :  { %v1157_v48 = vmul.f32 %v1080_v21, %v1061_v31  ;;  %v1165_v46 = vmul.f32 %v1120_v38, %v1069_v34 }
 0x465   :  { %v1085_v3 = vpop.permute.xlu1 %1084 }
 0x466   :  { %v1158_v4 = vmul.f32 %v1085_v3, %v1062_v35  ;;  %v1076_v35 = vld [vmem:[#allocation8 + $0x78] sm:$0xff] }
 0x468   :  { %v1173_v25 = vadd.f32 %v1158_v4, %v1157_v48 }
 0x469   :  { %v1090_v1 = vpop.permute.xlu1 %1089 }
 0x46a   :  { %v1159_v45 = vmul.f32 %v1090_v1, %v1063_v26  ;;  %v1174_v56 = vrot.slane %v1173_v25, 4 }
 0x46c   :  { %v1175_v18 = vadd.f32 %v1174_v56, %v1173_v25 }
 0x46d   :  { %v1095_v23 = vpop.permute.xlu1 %1094 }
 0x46e   :  { %v1160_v39 = vmul.f32 %v1095_v23, %v1064_v33  ;;  %v1075_v23 = vld [vmem:[#allocation8 + $0x70] sm:$0xff] }
 0x470   :  { %v1180_v44 = vadd.f32 %v1160_v39, %v1159_v45 }
 0x471   :  { %v1100_v17 = vpop.permute.xlu1 %1099 }
 0x472   :  { %v1161_v41 = vmul.f32 %v1100_v17, %v1065_v30  ;;  %v1181_v10 = vrot.slane %v1180_v44, 4  ;;  %v1150_v17 = vpop.permute.xlu0 %1149 }
 0x473   :  { %v1171_v30 = vmul.f32 %v1150_v17, %v1075_v23  ;;  %v214_v23 = vld [vmem:[#allocation13 + $0x220] sm:$0xff]  ;;  %v295_v17 = vld [vmem:[#allocation13 + $0x4a8] sm:$0xff] }
 0x474   :  { %v1182_v63 = vadd.f32 %v1181_v10, %v1180_v44 }
 0x475   :  { %v1105_v7 = vpop.permute.xlu1 %1104 }
 0x476   :  { %v1162_v42 = vmul.f32 %v1105_v7, %v1066_v58  ;;  %v1183_v36 = vrot.slane %v1182_v63, 2  ;;  %v1176_v7 = vrot.slane %v1175_v18, 2 }
 0x478   :  { %v1187_v49 = vadd.f32 %v1162_v42, %v1161_v41  ;;  %v1184_v26 = vadd.f32 %v1183_v36, %v1182_v63  ;;  %v1177_v42 = vadd.f32 %v1176_v7, %v1175_v18  ;;  %v219_v36 = vld [vmem:[#allocation13 + $0x248] sm:$0xff]  ;;  %v213_v7 = vld [vmem:[#allocation13 + $0x218] sm:$0xff] }
 0x479   :  { %v1110_v24 = vpop.permute.xlu1 %1109 }
 0x47a   :  { %v1163_v12 = vmul.f32 %v1110_v24, %v1067_v32  ;;  %v1188_v55 = vrot.slane %v1187_v49, 4  ;;  %v1185_v4 = vrot.slane %v1184_v26, 1  ;;  %v1178_v48 = vrot.slane %v1177_v42, 1 }
 0x47c   :  { %v1189_v15 = vadd.f32 %v1188_v55, %v1187_v49 }
 0x47d   :  { %v1115_v53 = vpop.permute.xlu1 %1114 }
 0x47e   :  { %v1164_v62 = vmul.f32 %v1115_v53, %v1068_v27  ;;  %v1190_v3 = vrot.slane %v1189_v15, 2 }
 0x480   :  { %v1194_v51 = vadd.f32 %v1164_v62, %v1163_v12 }
 0x481   :  { %v1125_v2 = vpop.permute.xlu1 %1124 }
 0x482   :  { %v1166_v43 = vmul.f32 %v1125_v2, %v1070_v60  ;;  %v1195_v11 = vrot.slane %v1194_v51, 4  ;;  %v1191_v60 = vadd.f32 %v1190_v3, %v1189_v15  ;;  %v218_v3 = vld [vmem:[#allocation13 + $0x240] sm:$0xff] }
 0x484   :  { %v1201_v6 = vadd.f32 %v1166_v43, %v1165_v46  ;;  %v1196_v19 = vadd.f32 %v1195_v11, %v1194_v51  ;;  %v1192_v43 = vrot.slane %v1191_v60, 1 }
 0x485   :  { %v1130_v61 = vpop.permute.xlu1 %1129 }
 0x486   :  { %v1167_v14 = vmul.f32 %v1130_v61, %v1071_v20  ;;  %v1202_v22 = vrot.slane %v1201_v6, 4  ;;  %v1197_v24 = vrot.slane %v1196_v19, 2  ;;  %v1186_v61 = vadd.f32 %v1185_v4, %v1184_v26  ;;  %v210_v26 = vld [vmem:[#allocation13 + $0x200] sm:$0xff]  ;;  %v275_v4 = vld [vmem:[#allocation13 + $0x408] sm:$0xff] }
 0x487   :  { %v1193_v20 = vadd.f32 %v1192_v43, %v1191_v60  ;;  %v2592_v60 = vld [vmem:[#allocation5] sm:$0xff]  ;;  %v270_v43 = vld [vmem:[#allocation13 + $0x3e0] sm:$0xff] }
 0x488   :  { %v1203_v28 = vadd.f32 %v1202_v22, %v1201_v6  ;;  %v1198_v32 = vadd.f32 %v1197_v24, %v1196_v19  ;;  %v215_v24 = vld [vmem:[#allocation13 + $0x228] sm:$0xff] }
 0x489   :  { %v1135_v37 = vpop.permute.xlu1 %1134 }
 0x48a   :  { %v1168_v52 = vmul.f32 %v1135_v37, %v1072_v9  ;;  %v1204_v58 = vrot.slane %v1203_v28, 2  ;;  %v1199_v44 = vrot.slane %v1198_v32, 1  ;;  %v1179_v9 = vadd.f32 %v1178_v48, %v1177_v42  ;;  %v198_v42 = vld [vmem:[#allocation13 + $0x1a0] sm:$0xff]  ;;  %v184_v48 = vld [vmem:[#allocation13 + $0x130] sm:$0xff] }
 0x48c   :  { %v1208_v8 = vadd.f32 %v1168_v52, %v1167_v14  ;;  %v1205_v38 = vadd.f32 %v1204_v58, %v1203_v28  ;;  %v1200_v10 = vadd.f32 %v1199_v44, %v1198_v32  ;;  %v1245_v11 = vsel %vm747_vm2, %v1186_v61, %v1179_v9  ;;  %v223_v28 = vld [vmem:[#allocation13 + $0x268] sm:$0xff]  ;;  %v208_v58 = vld [vmem:[#allocation13 + $0x1f0] sm:$0xff]  ;;  %v190_v44 = vld [vmem:[#allocation13 + $0x160] sm:$0xff] }
 0x48d   :  { %v1140_v16 = vpop.permute.xlu1 %1139  ;;  %v1246_v22 = vsel %vm749_vm3, %v1193_v20, %v1245_v11  ;;  %v280_v32 = vld [vmem:[#allocation13 + $0x430] sm:$0xff]  ;;  %v185_v61 = vld [vmem:[#allocation13 + $0x138] sm:$0xff]  ;;  %v250_v11 = vld [vmem:[#allocation13 + $0x340] sm:$0xff] }
 0x48e   :  { %v1209_v50 = vrot.slane %v1208_v8, 4  ;;  %v1169_v33 = vmul.f32 %v1140_v16, %v1073_v57  ;;  %v1206_v49 = vrot.slane %v1205_v38, 1  ;;  %v1247_v15 = vsel %vm751_vm4, %v1200_v10, %v1246_v22  ;;  %v225_v57 = vld [vmem:[#allocation13 + $0x278] sm:$0xff]  ;;  %v180_v20 = vld [vmem:[#allocation13 + $0x110] sm:$0xff]  ;;  %v255_v10 = vld [vmem:[#allocation13 + $0x368] sm:$0xff] }
 0x48f   :  { %v173_v9 = vld [vmem:[#allocation13 + $0xd8] sm:$0xff]  ;;  %v163_v22 = vld [vmem:[#allocation13 + $0x88] sm:$0xff] }
 0x490   :  { %v1210_v21 = vadd.f32 %v1209_v50, %v1208_v8  ;;  %v1207_v56 = vadd.f32 %v1206_v49, %v1205_v38  ;;  %v193_v38 = vld [vmem:[#allocation13 + $0x178] sm:$0xff]  ;;  %v179_v49 = vld [vmem:[#allocation13 + $0x108] sm:$0xff] }
 0x491   :  { %v1145_v1 = vpop.permute.xlu1 %1144 }
 0x492   :  { %v1170_v53 = vmul.f32 %v1145_v1, %v1074_v5  ;;  %v1211_v27 = vrot.slane %v1210_v21, 2  ;;  %v1248_v16 = vsel %vm753_vm5, %v1207_v56, %v1247_v15  ;;  %v220_v1 = vld [vmem:[#allocation13 + $0x250] sm:$0xff]  ;;  %v165_v15 = vld [vmem:[#allocation13 + $0x98] sm:$0xff] }
 0x493   :  { %v168_v56 = vld [vmem:[#allocation13 + $0xb0] sm:$0xff] }
 0x494   :  { %v1215_v39 = vadd.f32 %v1170_v53, %v1169_v33  ;;  %v1212_v45 = vadd.f32 %v1211_v27, %v1210_v21  ;;  %v300_v21 = vld [vmem:[#allocation13 + $0x4d0] sm:$0xff]  ;;  %v209_v33 = vld [vmem:[#allocation13 + $0x1f8] sm:$0xff]  ;;  %v290_v53 = vld [vmem:[#allocation13 + $0x480] sm:$0xff] }
 0x495   :  { %v1155_v31 = vpop.permute.xlu1 %1154  ;;  %v203_v27 = vld [vmem:[#allocation13 + $0x1c8] sm:$0xff] }
 0x496   :  { %v1216_v2 = vrot.slane %v1215_v39, 4  ;;  %v1172_v34 = vmul.f32 %v1155_v31, %v1076_v35  ;;  %v1213_v25 = vrot.slane %v1212_v45, 1  ;;  %v204_v35 = vld [vmem:[#allocation13 + $0x1d0] sm:$0xff]  ;;  %v205_v31 = vld [vmem:[#allocation13 + $0x1d8] sm:$0xff] }
 0x498   :  { %v1217_v62 = vadd.f32 %v1216_v2, %v1215_v39  ;;  %v1222_v41 = vadd.f32 %v1172_v34, %v1171_v30  ;;  %v1214_v14 = vadd.f32 %v1213_v25, %v1212_v45  ;;  %v285_v39 = vld [vmem:[#allocation13 + $0x458] sm:$0xff]  ;;  %v199_v30 = vld [vmem:[#allocation13 + $0x1a8] sm:$0xff]  ;;  %v194_v2 = vld [vmem:[#allocation13 + $0x180] sm:$0xff] }
 0x499   :  { %v200_v34 = vld [vmem:[#allocation13 + $0x1b0] sm:$0xff]  ;;  %v189_v45 = vld [vmem:[#allocation13 + $0x158] sm:$0xff]  ;;  %v178_v25 = vld [vmem:[#allocation13 + $0x100] sm:$0xff] }
 0x49a   :  { %v1218_v12 = vrot.slane %v1217_v62, 2  ;;  %v1223_v46 = vrot.slane %v1222_v41, 4  ;;  %v1249_v19 = vsel %vm755_vm6, %v1214_v14, %v1248_v16  ;;  %v164_v14 = vld [vmem:[#allocation13 + $0x90] sm:$0xff]  ;;  %v158_v16 = vld [vmem:[#allocation13 + $0x60] sm:$0xff] }
 0x49c   :  { %v1219_v51 = vadd.f32 %v1218_v12, %v1217_v62  ;;  %v1224_v6 = vadd.f32 %v1223_v46, %v1222_v41  ;;  %v195_v62 = vld [vmem:[#allocation13 + $0x188] sm:$0xff]  ;;  %v188_v41 = vld [vmem:[#allocation13 + $0x150] sm:$0xff]  ;;  %v265_v46 = vld [vmem:[#allocation13 + $0x3b8] sm:$0xff] }
 0x49d   :  { %v183_v12 = vld [vmem:[#allocation13 + $0x128] sm:$0xff] }
 0x49e   :  { %v1220_v55 = vrot.slane %v1219_v51, 1  ;;  %v1225_v37 = vrot.slane %v1224_v6, 2 }
 0x4a0   :  { %v1226_v52 = vadd.f32 %v1225_v37, %v1224_v6  ;;  %v1221_v63 = vadd.f32 %v1220_v55, %v1219_v51  ;;  %v260_v51 = vld [vmem:[#allocation13 + $0x390] sm:$0xff]  ;;  %v174_v6 = vld [vmem:[#allocation13 + $0xe0] sm:$0xff]  ;;  %v169_v55 = vld [vmem:[#allocation13 + $0xb8] sm:$0xff] }
 0x4a1   :  { %v175_v37 = vld [vmem:[#allocation13 + $0xe8] sm:$0xff] }
 0x4a2   :  { %v1227_v8 = vrot.slane %v1226_v52, 1  ;;  %v1250_v50 = vsel %vm757_vm7, %v1221_v63, %v1249_v19  ;;  %v245_v63 = vld [vmem:[#allocation13 + $0x318] sm:$0xff]  ;;  %v154_v19 = vld [vmem:[#allocation13 + $0x40] sm:$0xff] }
 0x4a4   :  { %v1228_v18 = vadd.f32 %v1227_v8, %v1226_v52  ;;  %v170_v52 = vld [vmem:[#allocation13 + $0xc0] sm:$0xff]  ;;  %v159_v8 = vld [vmem:[#allocation13 + $0x68] sm:$0xff] }
 0x4a6   :  { %v2588_v5 = vsel %vm759_vm8, %v1228_v18, %v1250_v50  ;;  %v240_v18 = vld [vmem:[#allocation13 + $0x2f0] sm:$0xff] }
 0x4a7   :  { %1415 = vmatmul.mubr.f32.vlgmr.msra.gmra.mxu0 %v2588_v5  ;;  %1557 = vmatmul.mubr.f32.vlgmr.msra.gmra.mxu1 %v2588_v5  ;;  %v160_v50 = vld [vmem:[#allocation13 + $0x70] sm:$0xff] }
 0x4a8   :  { %1422 = vmatpush1.msra.mxu0 %v223_v28  ;;  %1770 = vmatpush3.msra.mxu1 %v225_v57  ;;  %v153_v28 = vld [vmem:[#allocation13 + $0x38] sm:$0xff]  ;;  %v235_v57 = vld [vmem:[#allocation13 + $0x2c8] sm:$0xff] }
 0x4a9   :  { %1423 = vmatprep.subr.mxu0 %v219_v36  ;;  %1771 = vmatprep.subr.mxu1 %v300_v21  ;;  %v149_v36 = vld [vmem:[#allocation13 + $0x18] sm:$0xff]  ;;  %v155_v21 = vld [vmem:[#allocation13 + $0x48] sm:$0xff] }
 0x4aa   :  { %1424 = vmatpush1.msra.mxu0 %v218_v3  ;;  %1772 = vmatpush3.msra.mxu1 %v220_v1  ;;  %v148_v3 = vld [vmem:[#allocation13 + $0x10] sm:$0xff]  ;;  %v230_v1 = vld [vmem:[#allocation13 + $0x2a0] sm:$0xff] }
 0x4ab   :  { %1425 = vmatprep.subr.mxu0 %v214_v23  ;;  %1773 = vmatprep.subr.mxu1 %v295_v17  ;;  %v304_v23 = vld [vmem:[#allocation13 + $0x4f0] sm:$0xff]  ;;  %v150_v17 = vld [vmem:[#allocation13 + $0x20] sm:$0xff] }
 0x4ac   :  { %1426 = vmatpush1.msra.mxu0 %v213_v7  ;;  %1774 = vmatpush3.msra.mxu1 %v215_v24  ;;  %v303_v7 = vld [vmem:[#allocation13 + $0x4e8] sm:$0xff] }
 0x4ad   :  { %1427 = vmatprep.subr.mxu0 %v209_v33  ;;  %1775 = vmatprep.subr.mxu1 %v290_v53  ;;  %v299_v24 = vld [vmem:[#allocation13 + $0x4c8] sm:$0xff]  ;;  %v298_v33 = vld [vmem:[#allocation13 + $0x4c0] sm:$0xff] }
 0x4ae   :  { %1428 = vmatpush1.msra.mxu0 %v208_v58  ;;  %1485 = vmatprep.mubr.f32.mxu0 %v2592_v60  ;;  %v294_v53 = vld [vmem:[#allocation13 + $0x4a0] sm:$0xff]  ;;  %v293_v58 = vld [vmem:[#allocation13 + $0x498] sm:$0xff] }
 0x4af   :  { %1429 = vmatprep.subr.mxu0 %v204_v35  ;;  %1776 = vmatpush3.msra.mxu1 %v210_v26  ;;  %v289_v35 = vld [vmem:[#allocation13 + $0x478] sm:$0xff]  ;;  %v288_v26 = vld [vmem:[#allocation13 + $0x470] sm:$0xff] }
 0x4b0   :  { %1430 = vmatpush1.msra.mxu0 %v203_v27  ;;  %1777 = vmatprep.subr.mxu1 %v285_v39  ;;  %v284_v27 = vld [vmem:[#allocation13 + $0x450] sm:$0xff]  ;;  %v283_v39 = vld [vmem:[#allocation13 + $0x448] sm:$0xff] }
 0x4b1   :  { %1431 = vmatprep.subr.mxu0 %v199_v30  ;;  %1778 = vmatpush3.msra.mxu1 %v205_v31  ;;  %v279_v30 = vld [vmem:[#allocation13 + $0x428] sm:$0xff]  ;;  %v278_v31 = vld [vmem:[#allocation13 + $0x420] sm:$0xff] }
 0x4b2   :  { %1432 = vmatpush1.msra.mxu0 %v198_v42  ;;  %1779 = vmatprep.subr.mxu1 %v280_v32  ;;  %v274_v42 = vld [vmem:[#allocation13 + $0x400] sm:$0xff]  ;;  %v269_v32 = vld [vmem:[#allocation13 + $0x3d8] sm:$0xff] }
 0x4b3   :  { %1433 = vmatprep.subr.mxu0 %v194_v2  ;;  %1780 = vmatpush3.msra.mxu1 %v200_v34  ;;  %v268_v2 = vld [vmem:[#allocation13 + $0x3d0] sm:$0xff] }
 0x4b4   :  { %1434 = vmatpush1.msra.mxu0 %v193_v38  ;;  %1781 = vmatprep.subr.mxu1 %v275_v4  ;;  %v264_v34 = vld [vmem:[#allocation13 + $0x3b0] sm:$0xff]  ;;  %v263_v38 = vld [vmem:[#allocation13 + $0x3a8] sm:$0xff] }
 0x4b5   :  { %1435 = vmatprep.subr.mxu0 %v189_v45  ;;  %1782 = vmatpush3.msra.mxu1 %v195_v62  ;;  %v259_v4 = vld [vmem:[#allocation13 + $0x388] sm:$0xff]  ;;  %v258_v45 = vld [vmem:[#allocation13 + $0x380] sm:$0xff] }
 0x4b6   :  { %1436 = vmatpush1.msra.mxu0 %v188_v41  ;;  %1783 = vmatprep.subr.mxu1 %v270_v43  ;;  %v254_v62 = vld [vmem:[#allocation13 + $0x360] sm:$0xff]  ;;  %v253_v41 = vld [vmem:[#allocation13 + $0x358] sm:$0xff] }
 0x4b7   :  { %1437 = vmatprep.subr.mxu0 %v184_v48  ;;  %1784 = vmatpush3.msra.mxu1 %v190_v44  ;;  %v249_v43 = vld [vmem:[#allocation13 + $0x338] sm:$0xff]  ;;  %v248_v48 = vld [vmem:[#allocation13 + $0x330] sm:$0xff] }
 0x4b8   :  { %1438 = vmatpush1.msra.mxu0 %v183_v12  ;;  %1785 = vmatprep.subr.mxu1 %v265_v46  ;;  %v244_v44 = vld [vmem:[#allocation13 + $0x310] sm:$0xff]  ;;  %v243_v12 = vld [vmem:[#allocation13 + $0x308] sm:$0xff] }
 0x4b9   :  { %1439 = vmatprep.subr.mxu0 %v179_v49  ;;  %1786 = vmatpush3.msra.mxu1 %v185_v61  ;;  %v239_v46 = vld [vmem:[#allocation13 + $0x2e8] sm:$0xff]  ;;  %v238_v49 = vld [vmem:[#allocation13 + $0x2e0] sm:$0xff] }
 0x4ba   :  { %1440 = vmatpush1.msra.mxu0 %v178_v25  ;;  %1787 = vmatprep.subr.mxu1 %v260_v51  ;;  %v234_v61 = vld [vmem:[#allocation13 + $0x2c0] sm:$0xff]  ;;  %v233_v25 = vld [vmem:[#allocation13 + $0x2b8] sm:$0xff] }
 0x4bb   :  { %1441 = vmatprep.subr.mxu0 %v174_v6  ;;  %1788 = vmatpush3.msra.mxu1 %v180_v20  ;;  %v229_v51 = vld [vmem:[#allocation13 + $0x298] sm:$0xff]  ;;  %v228_v6 = vld [vmem:[#allocation13 + $0x290] sm:$0xff] }
 0x4bc   :  { %1442 = vmatpush1.msra.mxu0 %v173_v9  ;;  %1789 = vmatprep.subr.mxu1 %v255_v10  ;;  %v385_v20 = vld [vmem:[#allocation13 + $0x778] sm:$0xff]  ;;  %v380_v9 = vld [vmem:[#allocation13 + $0x750] sm:$0xff]  ;;  %v375_v10 = vld [vmem:[#allocation13 + $0x728] sm:$0xff] }
 0x4bd   :  { %1443 = vmatprep.subr.mxu0 %v169_v55  ;;  %1790 = vmatpush3.msra.mxu1 %v175_v37  ;;  %v370_v55 = vld [vmem:[#allocation13 + $0x700] sm:$0xff]  ;;  %v365_v37 = vld [vmem:[#allocation13 + $0x6d8] sm:$0xff] }
 0x4be   :  { %1444 = vmatpush1.msra.mxu0 %v168_v56  ;;  %1791 = vmatprep.subr.mxu1 %v250_v11  ;;  %v355_v56 = vld [vmem:[#allocation13 + $0x688] sm:$0xff]  ;;  %v350_v11 = vld [vmem:[#allocation13 + $0x660] sm:$0xff] }
 0x4bf   :  { %1445 = vmatprep.subr.mxu0 %v164_v14  ;;  %1792 = vmatpush3.msra.mxu1 %v170_v52  ;;  %v345_v14 = vld [vmem:[#allocation13 + $0x638] sm:$0xff]  ;;  %v340_v52 = vld [vmem:[#allocation13 + $0x610] sm:$0xff] }
 0x4c0   :  { %1446 = vmatpush1.msra.mxu0 %v163_v22  ;;  %1793 = vmatprep.subr.mxu1 %v245_v63  ;;  %v335_v22 = vld [vmem:[#allocation13 + $0x5e8] sm:$0xff]  ;;  %v330_v63 = vld [vmem:[#allocation13 + $0x5c0] sm:$0xff] }
 0x4c1   :  { %1447 = vmatprep.subr.mxu0 %v159_v8  ;;  %1794 = vmatpush3.msra.mxu1 %v165_v15  ;;  %v325_v8 = vld [vmem:[#allocation13 + $0x598] sm:$0xff]  ;;  %v320_v15 = vld [vmem:[#allocation13 + $0x570] sm:$0xff] }
 0x4c2   :  { %1448 = vmatpush1.msra.mxu0 %v158_v16  ;;  %1795 = vmatprep.subr.mxu1 %v240_v18  ;;  %v315_v16 = vld [vmem:[#allocation13 + $0x548] sm:$0xff]  ;;  %v310_v18 = vld [vmem:[#allocation13 + $0x520] sm:$0xff] }
 0x4c3   :  { %1449 = vmatprep.subr.mxu0 %v154_v19  ;;  %1796 = vmatpush3.msra.mxu1 %v160_v50  ;;  %v386_v19 = vld [vmem:[%s2637_s9] sm:$0x1f]  ;;  %s2175_s9 = smov [#allocation14]  }
 0x4c4   :  { %1450 = vmatpush1.msra.mxu0 %v153_v28  ;;  %1797 = vmatprep.subr.mxu1 %v235_v57  ;;  %v1261_v28 = vrot.slane %v386_v19, %v2407_v47  ;;  %s1735_s28 = sshll.u32 %s2175_s9, 4  ;;  %s1736_s28 = int_to_ptr.vmem [resolvable:$true] %s1735_s28 }
 0x4c5   :  { %1451 = vmatprep.subr.mxu0 %v149_v36  ;;  %1798 = vmatpush3.msra.mxu1 %v155_v21  ;;  %v1257_v36 = vrot.slane %v386_v19, %v2288_v29  ;;  %s2130_s29 = scalar_lea.vmem %s1736_s28, 256  ;;  %p2135_p8 = scmp.lt.s32.totalorder %s1736_s28, %s1736_s28 }
 0x4c6   :  { %1452 = vmatpush1.msra.mxu0 %v148_v3  ;;  %1799 = vmatprep.subr.mxu1 %v230_v1  ;;  %p2131_p7 = scmp.ne.s32.totalorder %s1736_s28, %s2130_s29  ;;  %p2136_p9 = scmp.lt.s32.totalorder %s2130_s29, %s2130_s29 }
 0x4c7   :  { %1453 = vmatprep.subr.mxu0 %v304_v23  ;;  %1800 = vmatpush3.msra.mxu1 %v150_v17  ;;  %v1345_v50 = vpop.f32.mrf.mxu1 }
 0x4c8   :  { %1454 = vmatpush2.msra.mxu0 %v303_v7  ;;  %1627 = vmatprep.mubr.f32.mxu1 %v2592_v60  ;;  %v273_v60 = vld [vmem:[#allocation13 + $0x3f8] sm:$0xff]  ;;  %v1346_v23 = vadd.f32 %v1345_v50, %v1257_v36  ;;  %p2137_p10 = por %p2136_p9, %p2135_p8 }
 0x4c9   :  { %1455 = vmatprep.subr.mxu0 %v299_v24  ;;  %1628 = vmatmul.mubr.f32.vlgmr.msra.gmra.mxu1 %v2575_v40  ;;  %v1347_v21 = vpop.f32.mrf.mxu1 }
 0x4ca   :  { %1456 = vmatpush2.msra.mxu0 %v298_v33  ;;  %v1348_v3 = vadd.f32 %v1347_v21, %v1261_v28  ;;  %p2138_p11 = pnand %p2137_p10, %p2131_p7 }
 0x4cb   :  { %1457 = vmatprep.subr.mxu0 %v294_v53 }
 0x4cc   :  { %1458 = vmatpush2.msra.mxu0 %v293_v58 }
 0x4cd   :  { %1459 = vmatprep.subr.mxu0 %v289_v35 }
 0x4ce   :  { %1460 = vmatpush2.msra.mxu0 %v288_v26 }
 0x4cf   :  { %1461 = vmatprep.subr.mxu0 %v284_v27 }
 0x4d0   :  { %1462 = vmatpush2.msra.mxu0 %v283_v39 }
 0x4d1   :  { %1463 = vmatprep.subr.mxu0 %v279_v30 }
 0x4d2   :  { %1464 = vmatpush2.msra.mxu0 %v278_v31 }
 0x4d3   :  { %1465 = vmatprep.subr.mxu0 %v274_v42 }
 0x4d4   :  { %1466 = vmatpush2.msra.mxu0 %v273_v60  ;;  %v1269_v60 = vrot.slane %v386_v19, %v2431_v13 }
 0x4d5   :  { %1467 = vmatprep.subr.mxu0 %v269_v32 }
 0x4d6   :  { %1468 = vmatpush2.msra.mxu0 %v268_v2 }
 0x4d7   :  { %1469 = vmatprep.subr.mxu0 %v264_v34 }
 0x4d8   :  { %1470 = vmatpush2.msra.mxu0 %v263_v38 }
 0x4d9   :  { %1471 = vmatprep.subr.mxu0 %v259_v4 }
 0x4da   :  { %1472 = vmatpush2.msra.mxu0 %v258_v45 }
 0x4db   :  { %1473 = vmatprep.subr.mxu0 %v254_v62 }
 0x4dc   :  { %1474 = vmatpush2.msra.mxu0 %v253_v41 }
 0x4dd   :  { %1475 = vmatprep.subr.mxu0 %v249_v43 }
 0x4de   :  { %1476 = vmatpush2.msra.mxu0 %v248_v48 }
 0x4df   :  { %1477 = vmatprep.subr.mxu0 %v244_v44  ;;  %v127_v44 = vld [vmem:[#allocation7] sm:$0xff] }
 0x4e0   :  { %1478 = vmatpush2.msra.mxu0 %v243_v12 }
 0x4e1   :  { %1479 = vmatprep.subr.mxu0 %v239_v46 }
 0x4e2   :  { %1480 = vmatpush2.msra.mxu0 %v238_v49 }
 0x4e3   :  { %1481 = vmatprep.subr.mxu0 %v234_v61 }
 0x4e4   :  { %1482 = vmatpush2.msra.mxu0 %v233_v25 }
 0x4e5   :  { %1483 = vmatprep.subr.mxu0 %v229_v51 }
 0x4e6   :  { %1484 = vmatpush2.msra.mxu0 %v228_v6 }
 0x4e7   :  { %1486 = vmatmul.mubr.f32.vlgmr.msra.gmra.mxu0 %v2575_v40  ;;  %1856 = vmatprep.subr.mxu0 %v2171_v0  ;;  %v360_v40 = vld [vmem:[#allocation13 + $0x6b0] sm:$0xff] }
 0x4e8   :  { %1857 = vmatpush3.msra.mxu0 %v385_v20  ;;  %1888 = vmatprep.mubr.msk.f32.mxu0 %vm2172_vm0, %v2171_v0 }
 0x4e9   :  { %1858 = vmatprep.subr.mxu0 %v2171_v0 }
 0x4ea   :  { %1859 = vmatpush3.msra.mxu0 %v380_v9 }
 0x4eb   :  { %1860 = vmatprep.subr.mxu0 %v2171_v0 }
 0x4ec   :  { %1861 = vmatpush3.msra.mxu0 %v375_v10 }
 0x4ed   :  { %1862 = vmatprep.subr.mxu0 %v2171_v0 }
 0x4ee   :  { %1863 = vmatpush3.msra.mxu0 %v370_v55 }
 0x4ef   :  { %1864 = vmatprep.subr.mxu0 %v2171_v0 }
 0x4f0   :  { %1865 = vmatpush3.msra.mxu0 %v365_v37 }
 0x4f1   :  { %1866 = vmatprep.subr.mxu0 %v2171_v0 }
 0x4f2   :  { %1867 = vmatpush3.msra.mxu0 %v360_v40 }
 0x4f3   :  { %1868 = vmatprep.subr.mxu0 %v2171_v0 }
 0x4f4   :  { %1869 = vmatpush3.msra.mxu0 %v355_v56 }
 0x4f5   :  { %1870 = vmatprep.subr.mxu0 %v2171_v0 }
 0x4f6   :  { %1871 = vmatpush3.msra.mxu0 %v350_v11 }
 0x4f7   :  { %1872 = vmatprep.subr.mxu0 %v2171_v0 }
 0x4f8   :  { %1873 = vmatpush3.msra.mxu0 %v345_v14 }
 0x4f9   :  { %1874 = vmatprep.subr.mxu0 %v2171_v0 }
 0x4fa   :  { %1875 = vmatpush3.msra.mxu0 %v340_v52 }
 0x4fb   :  { %1876 = vmatprep.subr.mxu0 %v2171_v0 }
 0x4fc   :  { %1877 = vmatpush3.msra.mxu0 %v335_v22 }
 0x4fd   :  { %1878 = vmatprep.subr.mxu0 %v2171_v0 }
 0x4fe   :  { %1879 = vmatpush3.msra.mxu0 %v330_v63 }
 0x4ff   :  { %1880 = vmatprep.subr.mxu0 %v2171_v0 }
 0x500   :  { %1881 = vmatpush3.msra.mxu0 %v325_v8 }
 0x501   :  { %1882 = vmatprep.subr.mxu0 %v2171_v0 }
 0x502   :  { %1883 = vmatpush3.msra.mxu0 %v320_v15 }
 0x503   :  { %1884 = vmatprep.subr.mxu0 %v2171_v0 }
 0x504   :  { %1885 = vmatpush3.msra.mxu0 %v315_v16 }
 0x505   :  { %1886 = vmatprep.subr.mxu0 %v2171_v0 }
 0x506   :  { %1887 = vmatpush3.msra.mxu0 %v310_v18 }
 0x507   :  { %1889 = vmatmul.mubr.f32.vlgmr.msra.gmra.mxu0 %v2588_v5  ;;  %v1265_v5 = vrot.slane %v386_v19, %v2415_v54  ;;  %v1273_v54 = vrot.slane %v386_v19, %v2441_v59 }
 0x567   :  { %v1416_v57 = vpop.f32.mrf.mxu0  ;;  %v1558_v58 = vpop.f32.mrf.mxu1 }
 0x568   :  { %v1417_v7 = vadd.f32 %v1416_v57, %v1346_v23 }
 0x569   :  { %v1418_v1 = vpop.f32.mrf.mxu0  ;;  %v1560_v39 = vpop.f32.mrf.mxu1 }
 0x56a   :  { %v1419_v17 = vadd.f32 %v1418_v1, %v1348_v3  ;;  %v1749_v24 = vmul.f32 -1.442695, %v1417_v7 }
 0x56c   :  { %v1750_v0 = vmul.f32 -1.442695, %v1419_v17 }
 0x56e   :  { %1975 = vpow2.f32 %v1750_v0 }
 0x56f   :  { %1977 = vpow2.f32 %v1749_v24 }
 0x57b   :  { %v1976_v47 = vpop.eup %1975 }
 0x57c   :  { %v1978_v26 = vpop.eup %1977  ;;  %v1713_v29 = vadd.f32 1.0, %v1976_v47 }
 0x57d   :  { %v1712_v30 = vadd.f32 1.0, %v1978_v26 }
 0x589   :  { %v1801_v31 = vpop.f32.mrf.mxu1 }
 0x58b   :  { %v1802_v42 = vpop.f32.mrf.mxu1 }
 0x58c   :  { %v1803_v2 = vadd.f32 %v1802_v42, %v1801_v31 }
 0x58e   :  { %v1630_v38 = vadd.f32 %v1803_v2, %v1273_v54 }
 0x5a7   :  { %v1487_v33 = vpop.f32.mrf.mxu0 }
 0x5a8   :  { %v1488_v53 = vadd.f32 %v1487_v33, %v1265_v5 }
 0x5a9   :  { %v1489_v32 = vpop.f32.mrf.mxu0 }
 0x5aa   :  { %v1559_v35 = vadd.f32 %v1558_v58, %v1488_v53  ;;  %v1490_v34 = vadd.f32 %v1489_v32, %v1269_v60 }
 0x5ac   :  { %v1751_v27 = vmul.f32 -1.442695, %v1559_v35  ;;  %v1561_v62 = vadd.f32 %v1560_v39, %v1490_v34 }
 0x5ae   :  { %1979 = vpow2.f32 %v1751_v27 }
 0x5af   :  { %1981 = vrcp.f32 %v1713_v29 }
 0x5b0   :  { %1983 = vrcp.f32 %v1712_v30 }
 0x5bb   :  { %v1980_v45 = vpop.eup %1979 }
 0x5bc   :  { %v1982_v43 = vpop.eup %1981  ;;  %v1714_v49 = vadd.f32 1.0, %v1980_v45 }
 0x5bd   :  { %v1984_v46 = vpop.eup %1983  ;;  %v1722_v25 = vmul.f32 %v1982_v43, %v127_v44 }
 0x5be   :  { %1985 = vrcp.f32 %v1714_v49 }
 0x5c7   :  { %v1699_v4 = vpop.f32.mrf.mxu0 }
 0x5c8   :  { %v1700_v41 = vadd.f32 %v1699_v4, %v1630_v38 }
 0x5c9   :  { %v1890_v48 = vpop.f32.mrf.mxu0 }
 0x5ca   :  { %v1721_v12 = vmax.f32 %v1561_v62, %v1700_v41 }
 0x5cb   :  { %v1986_v13 = vpop.eup %1985 }
 0x5cc   :  { %v1723_v61 = vmul.f32 %v1984_v46, %v1721_v12 }
 0x5ce   :  { %v1724_v51 = vadd.f32 %v1723_v61, %v1722_v25 }
 0x5d0   :  { %1987 = vtanh.f32 %v1724_v51  ;;  %1728 = vst [vmem:[#allocation14 + $0x8] sm:$0xff] %v1724_v51 }
 0x5dd   :  { %v1988_v59 = vpop.eup %1987 }
 0x5de   :  { %v1726_v6 = vmul.f32 %v1988_v59, %v1986_v13 }
 0x5e0   :  { %1727 = vst [vmem:[#allocation14] sm:$0xff] %v1726_v6 }
 0x5e1   :  { %2141 = shalt.err (!%p2138_p11)
}
 0x5e2   :  { %1738 = dma.vmem_to_hbm [thread:$0]  %s1736_s28, 256, %s2638_s10, [#allocation4]  }
 0x5e3   :  { %2158 = dma.done.wait [#allocation4], 256  }
 0x5e4   :  { %2159 = vsyncadd [#allocation4], 4294967040 }
 0x5e5   :  { %1742 = vsyncpa [#allocation3], 1 }
 0x5e6   :  { %1743 = vsyncpa [#allocation6], 1 }
 0x5e7   :  { %1744 = vsyncpa [#allocation9], 1 }
 0x5e8   :  { %1745 = vsyncpa [#allocation12], 1 }
 0x5e9   :  { %1746 = vsyncpa [#allocation4], 1 }

// kernel: tpu_custom_call.1
= control target key start
LH: loop header
LB: loop body
LE: loop exit
PB: predicated region body
PF: predicated region fallthrough
CT: control target
= control target key end

     0   :  { %15 = vsyncpa [#allocation3], 0  ;;  %s2628_s0 = inlined_call_operand.hbm [shape: f32[8,128], index: 0, kind: input, shape index: {}]   ;;  %s2629_s1 = inlined_call_operand.hbm [shape: f32[8,128], index: 1, kind: input, shape index: {}]   ;;  %s2630_s2 = inlined_call_operand.hbm [shape: f32[8,128], index: 2, kind: input, shape index: {}]   ;;  %s2631_s3 = inlined_call_operand.hbm [shape: f32[8,16,128], index: 3, kind: input, shape index: {}]   ;;  %s2632_s4 = inlined_call_operand.hbm [shape: f32[8,16,128], index: 4, kind: input, shape index: {}]   ;;  %s2633_s5 = inlined_call_operand.hbm [shape: f32[128,128], index: 5, kind: input, shape index: {}]   ;;  %s2634_s6 = inlined_call_operand.vmem [shape: f32[1,128], index: 6, kind: input, shape index: {}]   ;;  %s2635_s7 = inlined_call_operand.vmem [shape: f32[1,1,128], index: 7, kind: input, shape index: {}]   ;;  %s2636_s8 = inlined_call_operand.hbm [shape: f32[384,640], index: 8, kind: input, shape index: {}]   ;;  %s2637_s9 = inlined_call_operand.vmem [shape: f32[1,640], index: 9, kind: input, shape index: {}]   ;;  %s2638_s10 = inlined_call_operand.hbm [shape: f32[8,256], index: 10, kind: output, shape index: {}]  }
   0x1   :  { %16 = vsyncpa [#allocation6], 0 }
   0x2   :  { %17 = vsyncpa [#allocation9], 0 }
   0x3   :  { %18 = vsyncpa [#allocation12], 0 }
   0x4   :  { %19 = vsyncpa [#allocation4], 0  ;;  %s2160_s13 = smov [#allocation5]   ;;  %s2161_s15 = smov [#allocation8]  }
   0x5   :  { %s36_s14 = sshll.u32 %s2160_s13, 4  ;;  %s55_s16 = sshll.u32 %s2161_s15, 4  ;;  %s37_s14 = int_to_ptr.vmem [resolvable:$true] %s36_s14  ;;  %s56_s16 = int_to_ptr.vmem [resolvable:$true] %s55_s16 }
   0x6   :  { %s1998_s17 = scalar_lea.vmem %s37_s14, 128  ;;  %p2003_p1 = scmp.lt.s32.totalorder %s37_s14, %s37_s14 }
   0x7   :  { %p1999_p0 = scmp.ne.s32.totalorder %s37_s14, %s1998_s17  ;;  %p2004_p2 = scmp.lt.s32.totalorder %s1998_s17, %s1998_s17 }
   0x9   :  { %p2005_p3 = por %p2004_p2, %p2003_p1 }
   0xb   :  { %p2006_p4 = pnand %p2005_p3, %p1999_p0 }
   0xd   :  { %2009 = shalt.err (!%p2006_p4)
}
   0xe   :  { %39 = dma.hbm_to_vmem [thread:$0]  %s2629_s1, 128, %s37_s14, [#allocation6]  }
   0xf   :  { %s2018_s20 = scalar_lea.vmem %s56_s16, 2048  ;;  %p2023_p6 = scmp.lt.s32.totalorder %s56_s16, %s56_s16 }
  0x10   :  { %p2019_p5 = scmp.ne.s32.totalorder %s56_s16, %s2018_s20  ;;  %p2024_p7 = scmp.lt.s32.totalorder %s2018_s20, %s2018_s20 }
  0x12   :  { %p2025_p8 = por %p2024_p7, %p2023_p6 }
  0x14   :  { %p2026_p9 = pnand %p2025_p8, %p2019_p5 }
  0x16   :  { %2029 = shalt.err (!%p2026_p9)
}
  0x17   :  { %s2162_s21 = smov 128   ;;  %s2163_s22 = smov 8  }
  0x18   :  { %61 = dma.hbm_to_vmem [thread:$0]  %s2631_s3, 2048, %s56_s16, [#allocation9], %s2162_s21, %s2162_s21, %s2163_s22  }
  0x19   :  { %s2164_s25 = smov [#allocation11]   ;;  %s2165_s27 = smov [#allocation2]  }
  0x1a   :  { %s79_s26 = sshll.u32 %s2164_s25, 4  ;;  %s26_s1 = sshll.u32 %s2165_s27, 4  ;;  %s80_s26 = int_to_ptr.vmem [resolvable:$true] %s79_s26  ;;  %s27_s1 = int_to_ptr.vmem [resolvable:$true] %s26_s1 }
  0x1b   :  { %s2038_s28 = scalar_lea.vmem %s80_s26, 2048  ;;  %p2043_p11 = scmp.lt.s32.totalorder %s80_s26, %s80_s26 }
  0x1c   :  { %p2039_p10 = scmp.ne.s32.totalorder %s80_s26, %s2038_s28  ;;  %p2044_p12 = scmp.lt.s32.totalorder %s2038_s28, %s2038_s28 }
  0x1e   :  { %p2045_p13 = por %p2044_p12, %p2043_p11 }
  0x20   :  { %p2046_p0 = pnand %p2045_p13, %p2039_p10 }
  0x22   :  { %2049 = shalt.err (!%p2046_p0)
}
  0x23   :  { %85 = dma.hbm_to_vmem [thread:$0]  %s2633_s5, 2048, %s80_s26, [#allocation12], %s2162_s21, %s2162_s21, %s2163_s22  }
  0x24   :  { %s2058_s3 = scalar_lea.vmem %s27_s1, 128  ;;  %p2063_p2 = scmp.lt.s32.totalorder %s27_s1, %s27_s1 }
  0x25   :  { %p2059_p1 = scmp.ne.s32.totalorder %s27_s1, %s2058_s3  ;;  %p2064_p3 = scmp.lt.s32.totalorder %s2058_s3, %s2058_s3 }
  0x27   :  { %p2065_p4 = por %p2064_p3, %p2063_p2 }
  0x29   :  { %p2066_p5 = pnand %p2065_p4, %p2059_p1 }
  0x2b   :  { %2069 = shalt.err (!%p2066_p5)
}
  0x2c   :  { %29 = dma.hbm_to_vmem [thread:$0]  %s2628_s0, 128, %s27_s1, [#allocation3]  }
  0x2d   :  { %s2166_s13 = smov [#allocation7]   ;;  %s2167_s15 = smov [#allocation10]  }
  0x2e   :  { %s46_s14 = sshll.u32 %s2166_s13, 4  ;;  %s67_s16 = sshll.u32 %s2167_s15, 4  ;;  %s47_s14 = int_to_ptr.vmem [resolvable:$true] %s46_s14  ;;  %s68_s16 = int_to_ptr.vmem [resolvable:$true] %s67_s16 }
  0x2f   :  { %s2078_s17 = scalar_lea.vmem %s47_s14, 128  ;;  %p2083_p7 = scmp.lt.s32.totalorder %s47_s14, %s47_s14 }
  0x30   :  { %p2079_p6 = scmp.ne.s32.totalorder %s47_s14, %s2078_s17  ;;  %p2084_p8 = scmp.lt.s32.totalorder %s2078_s17, %s2078_s17 }
  0x32   :  { %p2085_p9 = por %p2084_p8, %p2083_p7 }
  0x34   :  { %p2086_p10 = pnand %p2085_p9, %p2079_p6 }
  0x36   :  { %2089 = shalt.err (!%p2086_p10)
}
  0x37   :  { %49 = dma.hbm_to_vmem [thread:$0]  %s2630_s2, 128, %s47_s14, [#allocation6]  }
  0x38   :  { %s2098_s19 = scalar_lea.vmem %s68_s16, 2048  ;;  %p2103_p12 = scmp.lt.s32.totalorder %s68_s16, %s68_s16 }
  0x39   :  { %p2099_p11 = scmp.ne.s32.totalorder %s68_s16, %s2098_s19  ;;  %p2104_p13 = scmp.lt.s32.totalorder %s2098_s19, %s2098_s19 }
  0x3b   :  { %p2105_p0 = por %p2104_p13, %p2103_p12 }
  0x3d   :  { %p2106_p1 = pnand %p2105_p0, %p2099_p11 }
  0x3f   :  { %2109 = shalt.err (!%p2106_p1)
}
  0x40   :  { %73 = dma.hbm_to_vmem [thread:$0]  %s2632_s4, 2048, %s68_s16, [#allocation9], %s2162_s21, %s2162_s21, %s2163_s22  }
  0x41   :  { %s2168_s23 = smov [#allocation13]  }
  0x42   :  { %s95_s24 = sshll.u32 %s2168_s23, 4  ;;  %s96_s24 = int_to_ptr.vmem [resolvable:$true] %s95_s24 }
  0x43   :  { %s2118_s25 = scalar_lea.vmem %s96_s24, 30720  ;;  %p2123_p3 = scmp.lt.s32.totalorder %s96_s24, %s96_s24 }
  0x44   :  { %p2119_p2 = scmp.ne.s32.totalorder %s96_s24, %s2118_s25  ;;  %p2124_p4 = scmp.lt.s32.totalorder %s2118_s25, %s2118_s25 }
  0x46   :  { %p2125_p5 = por %p2124_p4, %p2123_p3 }
  0x48   :  { %p2126_p6 = pnand %p2125_p5, %p2119_p2 }
  0x4a   :  { %2129 = shalt.err (!%p2126_p6)
}
  0x4b   :  { %s2169_s2 = smov 640   ;;  %s2170_s26 = smov 40  }
  0x4c   :  { %101 = dma.hbm_to_vmem [thread:$0]  %s2636_s8, 30720, %s96_s24, [#allocation12], %s2169_s2, %s2169_s2, %s2170_s26  }
  0x4d   :  { %2150 = dma.done.wait [#allocation3], 128  }
  0x4e   :  { %2151 = vsyncadd [#allocation3], 4294967168 }
  0x4f   :  { %2152 = dma.done.wait [#allocation6], 256  }
  0x50   :  { %2153 = vsyncadd [#allocation6], 4294967040 }
  0x51   :  { %2154 = dma.done.wait [#allocation9], 4096  }
  0x52   :  { %2155 = vsyncadd [#allocation9], 4294963200 }
  0x53   :  { %2156 = dma.done.wait [#allocation12], 32768  }
  0x54   :  { %2157 = vsyncadd [#allocation12], 4294934528  ;;  %v2171_v0 = vmov 0.0   ;;  %vm2172_vm0 = vmmov 0   ;;  %v143_v1 = vld [vmem:[#allocation11 + $0x78] sm:$0xff]  ;;  %v142_v2 = vld [vmem:[#allocation11 + $0x70] sm:$0xff]  ;;  %v484_v20 = vlaneseq }
  0x55   :  { %1821 = vmatprep.subr.mxu0 %v2171_v0  ;;  %1853 = vmatprep.mubr.msk.f32.mxu0 %vm2172_vm0, %v2171_v0  ;;  %v141_v3 = vld [vmem:[#allocation11 + $0x68] sm:$0xff]  ;;  %v140_v4 = vld [vmem:[#allocation11 + $0x60] sm:$0xff]  ;;  %v126_v5 = vld [vmem:[#allocation5] sm:$0xff]  ;;  %v2173_v18 = vmov 1966171168   ;;  %vm682_vm1 = vcmask 130112  }
  0x56   :  { %1822 = vmatpush3.msra.mxu0 %v143_v1  ;;  %v139_v6 = vld [vmem:[#allocation11 + $0x58] sm:$0xff]  ;;  %1343 = vmatprep.mubr.f32.mxu1 %v126_v5  ;;  %v138_v7 = vld [vmem:[#allocation11 + $0x50] sm:$0xff]  ;;  %v137_v8 = vld [vmem:[#allocation11 + $0x48] sm:$0xff]  ;;  %v482_v19 = vunpack.c.l.s4 %v2173_v18  ;;  %v2281_v22 = vshrl.u32 %v484_v20, 7  ;;  %vm747_vm2 = vcmask 1041409   ;;  %vm749_vm3 = vcmask 1042434  }
  0x57   :  { %1823 = vmatprep.subr.mxu0 %v2171_v0  ;;  %v136_v9 = vld [vmem:[#allocation11 + $0x40] sm:$0xff]  ;;  %v135_v10 = vld [vmem:[#allocation11 + $0x38] sm:$0xff]  ;;  %v134_v11 = vld [vmem:[#allocation11 + $0x30] sm:$0xff]  ;;  %vm751_vm4 = vcmask 1043459   ;;  %vm753_vm5 = vcmask 1044484   ;;  %vm755_vm6 = vcmask 1045509  }
  0x58   :  { %1824 = vmatpush3.msra.mxu0 %v142_v2  ;;  %v133_v12 = vld [vmem:[#allocation11 + $0x28] sm:$0xff]  ;;  %v132_v13 = vld [vmem:[#allocation11 + $0x20] sm:$0xff]  ;;  %v131_v14 = vld [vmem:[#allocation11 + $0x18] sm:$0xff]  ;;  %v483_v21 = vunpack.c.0.s8 %v482_v19  ;;  %v2288_v29 = vsub.s32 0, %v2281_v22  ;;  %vm757_vm7 = vcmask 1046534   ;;  %vm759_vm8 = vcmask 1047559  }
  0x59   :  { %1825 = vmatprep.subr.mxu0 %v2171_v0  ;;  %v130_v15 = vld [vmem:[#allocation11 + $0x10] sm:$0xff]  ;;  %v129_v16 = vld [vmem:[#allocation11 + $0x8] sm:$0xff]  ;;  %v128_v17 = vld [vmem:[#allocation11] sm:$0xff]  ;;  %vm762_vm9 = vcmask 130048  }
  0x5a   :  { %1826 = vmatpush3.msra.mxu0 %v141_v3  ;;  %v1747_v23 = vld [vmem:[%s2634_s6] ss:$0 sm:$0xff]  ;;  %v486_v24 = vsub.s32 %v483_v21, %v2281_v22  ;;  %v463_v34 = vld [vmem:[#allocation10] sm:$0xff]  ;;  %v465_v40 = vld [vmem:[#allocation10 + $0x10] sm:$0xff] }
  0x5b   :  { %1827 = vmatprep.subr.mxu0 %v2171_v0  ;;  %v464_v36 = vld [vmem:[#allocation10 + $0x8] sm:$0xff]  ;;  %v466_v42 = vld [vmem:[#allocation10 + $0x18] sm:$0xff]  ;;  %v467_v47 = vld [vmem:[#allocation10 + $0x20] sm:$0xff] }
  0x5c   :  { %1828 = vmatpush3.msra.mxu0 %v140_v4  ;;  %v468_v49 = vld [vmem:[#allocation10 + $0x28] sm:$0xff]  ;;  %v471_v54 = vld [vmem:[#allocation10 + $0x40] sm:$0xff]  ;;  %v469_v60 = vld [vmem:[#allocation10 + $0x30] sm:$0xff] }
  0x5d   :  { %1829 = vmatprep.subr.mxu0 %v2171_v0  ;;  %v472_v56 = vld [vmem:[#allocation10 + $0x48] sm:$0xff]  ;;  %v470_v62 = vld [vmem:[#allocation10 + $0x38] sm:$0xff]  ;;  %v473_v3 = vld [vmem:[#allocation10 + $0x50] sm:$0xff] }
  0x5e   :  { %1830 = vmatpush3.msra.mxu0 %v139_v6  ;;  %v2299_v4 = vld [vmem:[%s2635_s7] ss:$0 sm:$0xff] }
  0x5f   :  { %1831 = vmatprep.subr.mxu0 %v2171_v0  ;;  %v476_v18 = vld [vmem:[#allocation10 + $0x68] sm:$0xff] }
  0x60   :  { %1832 = vmatpush3.msra.mxu0 %v138_v7  ;;  %v474_v7 = vld [vmem:[#allocation10 + $0x58] sm:$0xff] }
  0x61   :  { %1833 = vmatprep.subr.mxu0 %v2171_v0 }
  0x62   :  { %1834 = vmatpush3.msra.mxu0 %v137_v8 }
  0x63   :  { %1835 = vmatprep.subr.mxu0 %v2171_v0 }
  0x64   :  { %1836 = vmatpush3.msra.mxu0 %v136_v9 }
  0x65   :  { %1837 = vmatprep.subr.mxu0 %v2171_v0 }
  0x66   :  { %1838 = vmatpush3.msra.mxu0 %v135_v10 }
  0x67   :  { %1839 = vmatprep.subr.mxu0 %v2171_v0 }
  0x68   :  { %1840 = vmatpush3.msra.mxu0 %v134_v11 }
  0x69   :  { %1841 = vmatprep.subr.mxu0 %v2171_v0 }
  0x6a   :  { %1842 = vmatpush3.msra.mxu0 %v133_v12 }
  0x6b   :  { %1843 = vmatprep.subr.mxu0 %v2171_v0 }
  0x6c   :  { %1844 = vmatpush3.msra.mxu0 %v132_v13 }
  0x6d   :  { %1845 = vmatprep.subr.mxu0 %v2171_v0 }
  0x6e   :  { %1846 = vmatpush3.msra.mxu0 %v131_v14  ;;  %v475_v14 = vld [vmem:[#allocation10 + $0x60] sm:$0xff] }
  0x6f   :  { %1847 = vmatprep.subr.mxu0 %v2171_v0 }
  0x70   :  { %1848 = vmatpush3.msra.mxu0 %v130_v15 }
  0x71   :  { %1849 = vmatprep.subr.mxu0 %v2171_v0 }
  0x72   :  { %1850 = vmatpush3.msra.mxu0 %v129_v16 }
  0x73   :  { %1851 = vmatprep.subr.mxu0 %v2171_v0 }
  0x74   :  { %1852 = vmatpush3.msra.mxu0 %v128_v17 }
  0x75   :  { %1854 = vmatmul.mubr.f32.vlgmr.msra.gmra.mxu0 %v126_v5 }
  0x76   :  { %1414 = vmatprep.mubr.f32.mxu0 %v2171_v0 }
 0x135   :  { %v459_v25 = vpop.f32.mrf.mxu0 }
 0x136   :  { %v460_v26 = vadd.f32 %v1747_v23, %v459_v25  ;;  %v477_v25 = vld [vmem:[#allocation10 + $0x70] sm:$0xff] }
 0x137   :  { %v1855_v27 = vpop.f32.mrf.mxu0 }
 0x138   :  { %v487_v28 = vrot.slane %v460_v26, %v486_v24  ;;  %v480_v30 = vcombine.high %v460_v26, %v460_v26 }
 0x13a   :  { %v495_v31 = vcombine.high %v487_v28, %v487_v28  ;;  %v503_v32 = vrot.slane %v487_v28, %v486_v24  ;;  %v494_v37 = vrot.slane %v480_v30, %v486_v24  ;;  %v478_v30 = vld [vmem:[#allocation10 + $0x78] sm:$0xff] }
 0x13c   :  { %v517_v33 = vrot.slane %v495_v31, %v486_v24  ;;  %v532_v35 = vrot.slane %v503_v32, %v2288_v29  ;;  %v525_v38 = vcombine.high %v503_v32, %v503_v32  ;;  %v510_v44 = vrot.slane %v494_v37, %v486_v24 }
 0x13d   :  { %v496_v50 = vcombine.high %v494_v37, %v494_v37 }
 0x13e   :  { %v536_v39 = vrot.slane %v517_v33, %v2288_v29  ;;  %v569_v41 = vadd.f32 %v532_v35, %v463_v34  ;;  %v570_v43 = vadd.f32 %v532_v35, %v464_v36  ;;  %v540_v45 = vrot.slane %v525_v38, %v2288_v29 }
 0x13f   :  { %v527_v51 = vcombine.high %v517_v33, %v517_v33  ;;  %v548_v52 = vrot.slane %v510_v44, %v2288_v29  ;;  %v524_v57 = vrot.slane %v496_v50, %v486_v24  ;;  %v526_v63 = vcombine.high %v510_v44, %v510_v44 }
 0x140   :  { %v571_v46 = vadd.f32 %v536_v39, %v465_v40  ;;  %v572_v48 = vadd.f32 %v536_v39, %v466_v42  ;;  %1909 = vtanh.f32 %v569_v41  ;;  %v573_v53 = vadd.f32 %v540_v45, %v467_v47 }
 0x141   :  { %1911 = vtanh.f32 %v570_v43  ;;  %v574_v55 = vadd.f32 %v540_v45, %v468_v49  ;;  %v544_v58 = vrot.slane %v527_v51, %v2288_v29  ;;  %v577_v59 = vadd.f32 %v548_v52, %v471_v54 }
 0x142   :  { %1913 = vtanh.f32 %v571_v46  ;;  %v578_v61 = vadd.f32 %v548_v52, %v472_v56  ;;  %v552_v1 = vrot.slane %v524_v57, %v2288_v29  ;;  %v528_v8 = vcombine.high %v524_v57, %v524_v57 }
 0x143   :  { %1915 = vtanh.f32 %v572_v48  ;;  %v575_v2 = vadd.f32 %v544_v58, %v469_v60  ;;  %v576_v5 = vadd.f32 %v544_v58, %v470_v62  ;;  %v556_v10 = vrot.slane %v526_v63, %v2288_v29 }
 0x144   :  { %1917 = vtanh.f32 %v573_v53  ;;  %v579_v11 = vadd.f32 %v552_v1, %v473_v3  ;;  %v580_v15 = vadd.f32 %v552_v1, %v474_v7  ;;  %v560_v19 = vrot.slane %v528_v8, %v2288_v29 }
 0x145   :  { %1919 = vtanh.f32 %v574_v55  ;;  %v581_v21 = vadd.f32 %v556_v10, %v475_v14  ;;  %v582_v26 = vadd.f32 %v556_v10, %v476_v18 }
 0x146   :  { %1921 = vtanh.f32 %v577_v59  ;;  %v583_v31 = vadd.f32 %v560_v19, %v477_v25  ;;  %v584_v34 = vadd.f32 %v560_v19, %v478_v30 }
 0x147   :  { %1923 = vtanh.f32 %v578_v61  ;;  %v672_v61 = vand.u32 127, %v484_v20 }
 0x148   :  { %1925 = vtanh.f32 %v575_v2 }
 0x149   :  { %1927 = vtanh.f32 %v576_v5  ;;  %v677_v63 = vadd.s32 4294967288, %v672_v61  ;;  %v2344_v5 = vsub.s32 %v672_v61, %v2281_v22 }
 0x14a   :  { %1929 = vtanh.f32 %v579_v11 }
 0x14b   :  { %1931 = vtanh.f32 %v580_v15  ;;  %v2339_v3 = vsub.s32 %v677_v63, %v2281_v22  ;;  %v793_v63 = vsub.s32 6, %v2281_v22 }
 0x14c   :  { %1933 = vtanh.f32 %v581_v21 }
 0x14d   :  { %v1910_v6 = vpop.eup %1909  ;;  %1935 = vtanh.f32 %v582_v26 }
 0x14e   :  { %v1912_v9 = vpop.eup %1911  ;;  %v607_v12 = vmul.f32 %v1910_v6, %v2299_v4  ;;  %1937 = vtanh.f32 %v583_v31 }
 0x14f   :  { %v1914_v13 = vpop.eup %1913  ;;  %v608_v23 = vmul.f32 %v1912_v9, %v2299_v4  ;;  %1939 = vtanh.f32 %v584_v34 }
 0x150   :  { %623 = vadd.xlane.f32.xlu0 %v607_v12  ;;  %v609_v16 = vmul.f32 %v1914_v13, %v2299_v4  ;;  %v1916_v17 = vpop.eup %1915 }
 0x151   :  { %v1918_v24 = vpop.eup %1917  ;;  %v610_v27 = vmul.f32 %v1916_v17, %v2299_v4 }
 0x152   :  { %627 = vadd.xlane.f32.xlu1 %v609_v16  ;;  %v1920_v28 = vpop.eup %1919  ;;  %v611_v32 = vmul.f32 %v1918_v24, %v2299_v4 }
 0x153   :  { %v1922_v33 = vpop.eup %1921  ;;  %v612_v35 = vmul.f32 %v1920_v28, %v2299_v4 }
 0x154   :  { %625 = vadd.xlane.f32.xlu0 %v608_v23  ;;  %v1924_v36 = vpop.eup %1923  ;;  %v615_v37 = vmul.f32 %v1922_v33, %v2299_v4 }
 0x155   :  { %v1926_v38 = vpop.eup %1925  ;;  %v616_v39 = vmul.f32 %v1924_v36, %v2299_v4 }
 0x156   :  { %629 = vadd.xlane.f32.xlu1 %v610_v27  ;;  %v1928_v40 = vpop.eup %1927  ;;  %v613_v41 = vmul.f32 %v1926_v38, %v2299_v4 }
 0x157   :  { %v1930_v42 = vpop.eup %1929  ;;  %v614_v43 = vmul.f32 %v1928_v40, %v2299_v4 }
 0x158   :  { %631 = vadd.xlane.f32.xlu0 %v611_v32  ;;  %v1932_v44 = vpop.eup %1931  ;;  %v617_v45 = vmul.f32 %v1930_v42, %v2299_v4 }
 0x159   :  { %v1934_v46 = vpop.eup %1933  ;;  %v618_v47 = vmul.f32 %v1932_v44, %v2299_v4 }
 0x15a   :  { %633 = vadd.xlane.f32.xlu1 %v612_v35  ;;  %v1936_v48 = vpop.eup %1935  ;;  %v619_v49 = vmul.f32 %v1934_v46, %v2299_v4  ;;  %v2174_v46 = vmov 0  }
 0x15b   :  { %v1938_v50 = vpop.eup %1937  ;;  %v620_v51 = vmul.f32 %v1936_v48, %v2299_v4  ;;  %1908 = vset.pattern.permute.xlu0 %v2174_v46  ;;  %1907 = vset.pattern.permute.xlu1 %v2174_v46 }
 0x15c   :  { %639 = vadd.xlane.f32.xlu0 %v615_v37  ;;  %v1940_v52 = vpop.eup %1939  ;;  %v621_v53 = vmul.f32 %v1938_v50, %v2299_v4 }
 0x15d   :  { %v622_v54 = vmul.f32 %v1940_v52, %v2299_v4 }
 0x15e   :  { %641 = vadd.xlane.f32.xlu1 %v616_v39 }
 0x160   :  { %635 = vadd.xlane.f32.xlu0 %v613_v41 }
 0x162   :  { %637 = vadd.xlane.f32.xlu1 %v614_v43 }
 0x164   :  { %643 = vadd.xlane.f32.xlu0 %v617_v45 }
 0x166   :  { %645 = vadd.xlane.f32.xlu1 %v618_v47  ;;  %v2407_v47 = vsub.s32 1, %v2281_v22 }
 0x168   :  { %647 = vadd.xlane.f32.xlu0 %v619_v49 }
 0x16a   :  { %649 = vadd.xlane.f32.xlu1 %v620_v51  ;;  %v789_v51 = vsub.s32 5, %v2281_v22 }
 0x16c   :  { %651 = vadd.xlane.f32.xlu0 %v621_v53 }
 0x16e   :  { %653 = vadd.xlane.f32.xlu1 %v622_v54  ;;  %v2415_v54 = vsub.s32 2, %v2281_v22 }
 0x1d9   :  { %v2319_v55 = vpop.xlane.xlu0 %623 }
 0x1da   :  { %v676_v13 = vrot.slane %v2319_v55, %v2344_v5 }
 0x1db   :  { %v2321_v56 = vpop.xlane.xlu1 %627 }
 0x1dc   :  { %v687_v8 = vrot.slane %v2321_v56, %v2344_v5 }
 0x1dd   :  { %v2323_v57 = vpop.xlane.xlu0 %625 }
 0x1de   :  { %v681_v9 = vrot.slane %v2323_v57, %v2339_v3 }
 0x1df   :  { %v2325_v58 = vpop.xlane.xlu1 %629 }
 0x1e0   :  { %v691_v6 = vrot.slane %v2325_v58, %v2339_v3  ;;  %v683_v18 = vsel %vm682_vm1, %v681_v9, %v676_v13  ;;  %v2431_v13 = vsub.s32 3, %v2281_v22 }
 0x1e1   :  { %v2327_v59 = vpop.xlane.xlu0 %631 }
 0x1e2   :  { %v696_v11 = vrot.slane %v2327_v59, %v2344_v5  ;;  %v692_v14 = vsel %vm682_vm1, %v691_v6, %v687_v8 }
 0x1e3   :  { %v2329_v60 = vpop.xlane.xlu1 %633  ;;  %v748_v23 = vsel %vm747_vm2, %v692_v14, %v683_v18 }
 0x1e4   :  { %v700_v20 = vrot.slane %v2329_v60, %v2339_v3 }
 0x1e5   :  { %v2332_v62 = vpop.xlane.xlu0 %639 }
 0x1e6   :  { %v701_v16 = vsel %vm682_vm1, %v700_v20, %v696_v11  ;;  %v714_v30 = vrot.slane %v2332_v62, %v2344_v5 }
 0x1e7   :  { %v2334_v1 = vpop.xlane.xlu1 %641  ;;  %v750_v26 = vsel %vm749_vm3, %v701_v16, %v748_v23 }
 0x1e8   :  { %v718_v24 = vrot.slane %v2334_v1, %v2339_v3 }
 0x1e9   :  { %v2336_v2 = vpop.xlane.xlu0 %635 }
 0x1ea   :  { %v705_v15 = vrot.slane %v2336_v2, %v2344_v5  ;;  %v719_v35 = vsel %vm682_vm1, %v718_v24, %v714_v30 }
 0x1eb   :  { %v2341_v4 = vpop.xlane.xlu1 %637 }
 0x1ec   :  { %v709_v10 = vrot.slane %v2341_v4, %v2339_v3 }
 0x1ed   :  { %v2350_v7 = vpop.xlane.xlu0 %643 }
 0x1ee   :  { %v710_v19 = vsel %vm682_vm1, %v709_v10, %v705_v15  ;;  %v723_v27 = vrot.slane %v2350_v7, %v2344_v5 }
 0x1ef   :  { %v2360_v12 = vpop.xlane.xlu1 %645  ;;  %v752_v31 = vsel %vm751_vm4, %v710_v19, %v750_v26 }
 0x1f0   :  { %v727_v21 = vrot.slane %v2360_v12, %v2339_v3  ;;  %v754_v40 = vsel %vm753_vm5, %v719_v35, %v752_v31 }
 0x1f1   :  { %v2368_v17 = vpop.xlane.xlu0 %647 }
 0x1f2   :  { %v732_v32 = vrot.slane %v2368_v17, %v2344_v5  ;;  %v728_v34 = vsel %vm682_vm1, %v727_v21, %v723_v27 }
 0x1f3   :  { %v2377_v25 = vpop.xlane.xlu1 %649  ;;  %v756_v41 = vsel %vm755_vm6, %v728_v34, %v754_v40 }
 0x1f4   :  { %v736_v28 = vrot.slane %v2377_v25, %v2339_v3 }
 0x1f5   :  { %v2389_v33 = vpop.xlane.xlu0 %651 }
 0x1f6   :  { %v737_v37 = vsel %vm682_vm1, %v736_v28, %v732_v32  ;;  %v741_v38 = vrot.slane %v2389_v33, %v2344_v5 }
 0x1f7   :  { %v2393_v36 = vpop.xlane.xlu1 %653  ;;  %v758_v43 = vsel %vm757_vm7, %v737_v37, %v756_v41 }
 0x1f8   :  { %v745_v39 = vrot.slane %v2393_v36, %v2339_v3 }
 0x1fa   :  { %v746_v42 = vsel %vm682_vm1, %v745_v39, %v741_v38 }
 0x1fb   :  { %v760_v44 = vsel %vm759_vm8, %v746_v42, %v758_v43 }
 0x1fc   :  { %v763_v45 = vsel %vm762_vm9, %v760_v44, -inf }
 0x1fd   :  { %764 = vmax.xlane.f32.xlu0 %v763_v45 }
 0x286   :  { %v765_v48 = vpop.xlane.xlu0 %764 }
 0x287   :  { %v770_v49 = vrot.slane %v765_v48, %v2288_v29  ;;  %v774_v50 = vrot.slane %v765_v48, %v2407_v47  ;;  %v2421_v6 = vrot.slane %v765_v48, %v789_v51  ;;  %v778_v9 = vrot.slane %v765_v48, %v2415_v54 }
 0x288   :  { %v782_v19 = vrot.slane %v765_v48, %v2431_v13 }
 0x289   :  { %v807_v52 = vsub.f32 %v2319_v55, %v770_v49  ;;  %v808_v53 = vsub.f32 %v2323_v57, %v770_v49  ;;  %v809_v61 = vsub.f32 %v2321_v56, %v774_v50  ;;  %v810_v10 = vsub.f32 %v2325_v58, %v774_v50 }
 0x28a   :  { %v797_v57 = vsub.s32 7, %v2281_v22  ;;  %v794_v56 = vrot.slane %v765_v48, %v793_v63  ;;  %v817_v11 = vsub.f32 %v2350_v7, %v2421_v6  ;;  %v811_v14 = vsub.f32 %v2327_v59, %v778_v9 }
 0x28b   :  { %v823_v20 = vmul.f32 1.442695, %v807_v52  ;;  %v825_v8 = vmul.f32 1.442695, %v808_v53  ;;  %v827_v55 = vmul.f32 1.442695, %v809_v61  ;;  %v812_v21 = vsub.f32 %v2329_v60, %v778_v9 }
 0x28c   :  { %v829_v15 = vmul.f32 1.442695, %v810_v10  ;;  %v798_v58 = vrot.slane %v765_v48, %v797_v57  ;;  %v819_v16 = vsub.f32 %v2368_v17, %v794_v56  ;;  %v843_v18 = vmul.f32 1.442695, %v817_v11 }
 0x28d   :  { %1941 = vpow2.f32 %v823_v20  ;;  %v831_v23 = vmul.f32 1.442695, %v811_v14  ;;  %v2441_v59 = vsub.s32 4, %v2281_v22  ;;  %v813_v26 = vsub.f32 %v2336_v2, %v782_v19  ;;  %v226_v22 = vld [vmem:[#allocation13 + $0x280] sm:$0xff] }
 0x28e   :  { %1943 = vpow2.f32 %v825_v8  ;;  %v821_v7 = vsub.f32 %v2389_v33, %v798_v58  ;;  %v847_v24 = vmul.f32 1.442695, %v819_v16  ;;  %v833_v27 = vmul.f32 1.442695, %v812_v21 }
 0x28f   :  { %1945 = vpow2.f32 %v827_v55  ;;  %v786_v60 = vrot.slane %v765_v48, %v2441_v59  ;;  %v814_v31 = vsub.f32 %v2341_v4, %v782_v19  ;;  %v835_v32 = vmul.f32 1.442695, %v813_v26 }
 0x290   :  { %1947 = vpow2.f32 %v829_v15  ;;  %v851_v30 = vmul.f32 1.442695, %v821_v7  ;;  %v820_v43 = vsub.f32 %v2377_v25, %v794_v56 }
 0x291   :  { %1949 = vpow2.f32 %v843_v18  ;;  %v815_v2 = vsub.f32 %v2332_v62, %v786_v60  ;;  %v837_v34 = vmul.f32 1.442695, %v814_v31  ;;  %v816_v38 = vsub.f32 %v2334_v1, %v786_v60 }
 0x292   :  { %1951 = vpow2.f32 %v831_v23  ;;  %v818_v62 = vsub.f32 %v2360_v12, %v2421_v6  ;;  %v822_v12 = vsub.f32 %v2393_v36, %v798_v58  ;;  %v849_v46 = vmul.f32 1.442695, %v820_v43 }
 0x293   :  { %1953 = vpow2.f32 %v847_v24  ;;  %v839_v4 = vmul.f32 1.442695, %v815_v2  ;;  %v841_v41 = vmul.f32 1.442695, %v816_v38 }
 0x294   :  { %1955 = vpow2.f32 %v833_v27  ;;  %v845_v44 = vmul.f32 1.442695, %v818_v62  ;;  %v853_v49 = vmul.f32 1.442695, %v822_v12 }
 0x295   :  { %1957 = vpow2.f32 %v851_v30 }
 0x296   :  { %1959 = vpow2.f32 %v835_v32 }
 0x297   :  { %1961 = vpow2.f32 %v837_v34 }
 0x298   :  { %1963 = vpow2.f32 %v839_v4 }
 0x299   :  { %1965 = vpow2.f32 %v841_v41 }
 0x29a   :  { %v2444_v28 = vpop.eup %1941  ;;  %1967 = vpow2.f32 %v845_v44 }
 0x29b   :  { %v2446_v17 = vpop.eup %1943  ;;  %872 = vperm.xlu1 %1907, %v2444_v28   ;;  %1969 = vpow2.f32 %v849_v46 }
 0x29c   :  { %875 = vperm.xlu0 %1908, %v2446_v17   ;;  %v2452_v33 = vpop.eup %1945  ;;  %1971 = vpow2.f32 %v853_v49 }
 0x29d   :  { %v2456_v35 = vpop.eup %1947 }
 0x29e   :  { %v2459_v37 = vpop.eup %1949 }
 0x29f   :  { %878 = vperm.xlu1 %1907, %v2452_v33   ;;  %v2463_v39 = vpop.eup %1951 }
 0x2a0   :  { %902 = vperm.xlu0 %1908, %v2459_v37   ;;  %v2466_v40 = vpop.eup %1953 }
 0x2a1   :  { %v2471_v42 = vpop.eup %1955 }
 0x2a2   :  { %v2474_v1 = vpop.eup %1957 }
 0x2a3   :  { %881 = vperm.xlu1 %1907, %v2456_v35   ;;  %v2478_v45 = vpop.eup %1959 }
 0x2a4   :  { %908 = vperm.xlu0 %1908, %v2466_v40   ;;  %v2482_v48 = vpop.eup %1961 }
 0x2a5   :  { %v2485_v50 = vpop.eup %1963 }
 0x2a6   :  { %v2488_v25 = vpop.eup %1965 }
 0x2a7   :  { %884 = vperm.xlu1 %1907, %v2463_v39   ;;  %v2491_v52 = vpop.eup %1967 }
 0x2a8   :  { %914 = vperm.xlu0 %1908, %v2474_v1   ;;  %v2494_v36 = vpop.eup %1969 }
 0x2a9   :  { %v2497_v53 = vpop.eup %1971 }
 0x2ab   :  { %887 = vperm.xlu1 %1907, %v2471_v42  }
 0x2af   :  { %890 = vperm.xlu1 %1907, %v2478_v45  }
 0x2b3   :  { %893 = vperm.xlu1 %1907, %v2482_v48  }
 0x2b7   :  { %896 = vperm.xlu1 %1907, %v2485_v50  }
 0x2bb   :  { %899 = vperm.xlu1 %1907, %v2488_v25  }
 0x2bf   :  { %905 = vperm.xlu1 %1907, %v2491_v52  }
 0x2c3   :  { %911 = vperm.xlu1 %1907, %v2494_v36  }
 0x2c7   :  { %917 = vperm.xlu1 %1907, %v2497_v53  }
 0x316   :  { %v873_v61 = vpop.permute.xlu1 %872 }
 0x317   :  { %v876_v55 = vpop.permute.xlu0 %875  ;;  %v922_v23 = vrot.slane %v873_v61, %v2344_v5 }
 0x318   :  { %v926_v21 = vrot.slane %v876_v55, %v2339_v3 }
 0x31a   :  { %v879_v6 = vpop.permute.xlu1 %878  ;;  %v927_v38 = vsel %vm682_vm1, %v926_v21, %v922_v23  ;;  %v212_v21 = vld [vmem:[#allocation13 + $0x210] sm:$0xff]  ;;  %v207_v23 = vld [vmem:[#allocation13 + $0x1e8] sm:$0xff] }
 0x31b   :  { %v903_v14 = vpop.permute.xlu0 %902  ;;  %v931_v7 = vrot.slane %v879_v6, %v2344_v5 }
 0x31c   :  { %v967_v4 = vrot.slane %v903_v14, %v2344_v5 }
 0x31e   :  { %v882_v20 = vpop.permute.xlu1 %881 }
 0x31f   :  { %v935_v58 = vrot.slane %v882_v20, %v2339_v3  ;;  %v909_v16 = vpop.permute.xlu0 %908 }
 0x320   :  { %v976_v43 = vrot.slane %v909_v16, %v2344_v5  ;;  %v222_v16 = vld [vmem:[#allocation13 + $0x260] sm:$0xff] }
 0x321   :  { %v936_v30 = vsel %vm682_vm1, %v935_v58, %v931_v7  ;;  %1279 = vmatprep.subr.mxu1 %v222_v16  ;;  %v206_v7 = vld [vmem:[#allocation13 + $0x1e0] sm:$0xff]  ;;  %v147_v16 = vld [vmem:[#allocation13 + $0x8] sm:$0xff] }
 0x322   :  { %v885_v8 = vpop.permute.xlu1 %884  ;;  %v991_v44 = vsel %vm747_vm2, %v936_v30, %v927_v38  ;;  %v196_v30 = vld [vmem:[#allocation13 + $0x190] sm:$0xff]  ;;  %v181_v38 = vld [vmem:[#allocation13 + $0x118] sm:$0xff] }
 0x323   :  { %v940_v26 = vrot.slane %v885_v8, %v2344_v5  ;;  %v915_v12 = vpop.permute.xlu0 %914 }
 0x326   :  { %v888_v9 = vpop.permute.xlu1 %887 }
 0x327   :  { %v944_v18 = vrot.slane %v888_v9, %v2339_v3  ;;  %v985_v9 = vrot.slane %v915_v12, %v2344_v5  ;;  %v166_v12 = vld [vmem:[#allocation13 + $0xa0] sm:$0xff] }
 0x329   :  { %v945_v32 = vsel %vm682_vm1, %v944_v18, %v940_v26  ;;  %v221_v18 = vld [vmem:[#allocation13 + $0x258] sm:$0xff] }
 0x32a   :  { %v891_v10 = vpop.permute.xlu1 %890  ;;  %v992_v49 = vsel %vm749_vm3, %v945_v32, %v991_v44  ;;  %1280 = vmatpush1.msra.mxu1 %v221_v18  ;;  %v201_v26 = vld [vmem:[#allocation13 + $0x1b8] sm:$0xff]  ;;  %v187_v32 = vld [vmem:[#allocation13 + $0x148] sm:$0xff] }
 0x32b   :  { %v949_v60 = vrot.slane %v891_v10, %v2344_v5  ;;  %v167_v44 = vld [vmem:[#allocation13 + $0xa8] sm:$0xff] }
 0x32e   :  { %v894_v56 = vpop.permute.xlu1 %893 }
 0x32f   :  { %v953_v24 = vrot.slane %v894_v56, %v2339_v3 }
 0x331   :  { %v954_v62 = vsel %vm682_vm1, %v953_v24, %v949_v60  ;;  %v202_v24 = vld [vmem:[#allocation13 + $0x1c0] sm:$0xff]  ;;  %v192_v60 = vld [vmem:[#allocation13 + $0x170] sm:$0xff] }
 0x332   :  { %v897_v11 = vpop.permute.xlu1 %896  ;;  %v993_v6 = vsel %vm751_vm4, %v954_v62, %v992_v49  ;;  %v176_v62 = vld [vmem:[#allocation13 + $0xf0] sm:$0xff]  ;;  %v161_v49 = vld [vmem:[#allocation13 + $0x78] sm:$0xff] }
 0x333   :  { %v958_v2 = vrot.slane %v897_v11, %v2344_v5  ;;  %v216_v5 = vld [vmem:[#allocation13 + $0x230] sm:$0xff] }
 0x336   :  { %v900_v15 = vpop.permute.xlu1 %899 }
 0x337   :  { %v962_v27 = vrot.slane %v900_v15, %v2339_v3 }
 0x339   :  { %v963_v46 = vsel %vm682_vm1, %v962_v27, %v958_v2  ;;  %v197_v27 = vld [vmem:[#allocation13 + $0x198] sm:$0xff]  ;;  %v186_v2 = vld [vmem:[#allocation13 + $0x140] sm:$0xff] }
 0x33a   :  { %v906_v19 = vpop.permute.xlu1 %905  ;;  %v994_v10 = vsel %vm753_vm5, %v963_v46, %v993_v6  ;;  %v162_v46 = vld [vmem:[#allocation13 + $0x80] sm:$0xff] }
 0x33b   :  { %v971_v31 = vrot.slane %v906_v19, %v2339_v3  ;;  %v217_v19 = vld [vmem:[#allocation13 + $0x238] sm:$0xff] }
 0x33c   :  { %1281 = vmatprep.subr.mxu1 %v217_v19 }
 0x33d   :  { %v972_v61 = vsel %vm682_vm1, %v971_v31, %v967_v4  ;;  %1282 = vmatpush1.msra.mxu1 %v216_v5  ;;  %v191_v31 = vld [vmem:[#allocation13 + $0x168] sm:$0xff]  ;;  %v177_v4 = vld [vmem:[#allocation13 + $0xf8] sm:$0xff] }
 0x33e   :  { %v912_v34 = vpop.permute.xlu1 %911  ;;  %v995_v56 = vsel %vm755_vm6, %v972_v61, %v994_v10  ;;  %1283 = vmatprep.subr.mxu1 %v212_v21  ;;  %v157_v61 = vld [vmem:[#allocation13 + $0x58] sm:$0xff] }
 0x33f   :  { %v980_v41 = vrot.slane %v912_v34, %v2339_v3  ;;  %v182_v34 = vld [vmem:[#allocation13 + $0x120] sm:$0xff] }
 0x341   :  { %v981_v20 = vsel %vm682_vm1, %v980_v41, %v976_v43  ;;  %v172_v41 = vld [vmem:[#allocation13 + $0xd0] sm:$0xff]  ;;  %v171_v43 = vld [vmem:[#allocation13 + $0xc8] sm:$0xff] }
 0x342   :  { %v918_v8 = vpop.permute.xlu1 %917  ;;  %v996_v14 = vsel %vm757_vm7, %v981_v20, %v995_v56  ;;  %v152_v56 = vld [vmem:[#allocation13 + $0x30] sm:$0xff] }
 0x343   :  { %v989_v55 = vrot.slane %v918_v8, %v2339_v3  ;;  %v211_v3 = vld [vmem:[#allocation13 + $0x208] sm:$0xff] }
 0x344   :  { %1284 = vmatpush1.msra.mxu1 %v211_v3  ;;  %v146_v3 = vld [vmem:[#allocation13] sm:$0xff] }
 0x345   :  { %v990_v11 = vsel %vm682_vm1, %v989_v55, %v985_v9  ;;  %1285 = vmatprep.subr.mxu1 %v207_v23  ;;  %v156_v55 = vld [vmem:[#allocation13 + $0x50] sm:$0xff]  ;;  %v301_v23 = vld [vmem:[#allocation13 + $0x4d8] sm:$0xff] }
 0x346   :  { %v997_v15 = vsel %vm759_vm8, %v990_v11, %v996_v14  ;;  %1286 = vmatpush1.msra.mxu1 %v206_v7  ;;  %v151_v11 = vld [vmem:[#allocation13 + $0x28] sm:$0xff]  ;;  %v296_v7 = vld [vmem:[#allocation13 + $0x4b0] sm:$0xff] }
 0x347   :  { %v999_v58 = vsel %vm762_vm9, %v997_v15, 0.0  ;;  %1287 = vmatprep.subr.mxu1 %v202_v24  ;;  %v292_v24 = vld [vmem:[#allocation13 + $0x490] sm:$0xff] }
 0x348   :  { %1000 = vadd.xlane.f32.xlu0 %v999_v58  ;;  %1288 = vmatpush1.msra.mxu1 %v201_v26  ;;  %v291_v26 = vld [vmem:[#allocation13 + $0x488] sm:$0xff] }
 0x349   :  { %1289 = vmatprep.subr.mxu1 %v197_v27  ;;  %v287_v27 = vld [vmem:[#allocation13 + $0x468] sm:$0xff] }
 0x34a   :  { %1290 = vmatpush1.msra.mxu1 %v196_v30  ;;  %v286_v30 = vld [vmem:[#allocation13 + $0x460] sm:$0xff] }
 0x34b   :  { %1291 = vmatprep.subr.mxu1 %v192_v60  ;;  %v282_v60 = vld [vmem:[#allocation13 + $0x440] sm:$0xff] }
 0x34c   :  { %1292 = vmatpush1.msra.mxu1 %v191_v31  ;;  %v281_v31 = vld [vmem:[#allocation13 + $0x438] sm:$0xff] }
 0x34d   :  { %1293 = vmatprep.subr.mxu1 %v187_v32  ;;  %v276_v32 = vld [vmem:[#allocation13 + $0x410] sm:$0xff] }
 0x34e   :  { %1294 = vmatpush1.msra.mxu1 %v186_v2  ;;  %v272_v2 = vld [vmem:[#allocation13 + $0x3f0] sm:$0xff] }
 0x34f   :  { %1295 = vmatprep.subr.mxu1 %v182_v34 }
 0x350   :  { %1296 = vmatpush1.msra.mxu1 %v181_v38  ;;  %v271_v38 = vld [vmem:[#allocation13 + $0x3e8] sm:$0xff] }
 0x351   :  { %1297 = vmatprep.subr.mxu1 %v177_v4  ;;  %v267_v4 = vld [vmem:[#allocation13 + $0x3c8] sm:$0xff] }
 0x352   :  { %1298 = vmatpush1.msra.mxu1 %v176_v62 }
 0x353   :  { %1299 = vmatprep.subr.mxu1 %v172_v41  ;;  %v266_v41 = vld [vmem:[#allocation13 + $0x3c0] sm:$0xff] }
 0x354   :  { %1300 = vmatpush1.msra.mxu1 %v171_v43  ;;  %v262_v43 = vld [vmem:[#allocation13 + $0x3a0] sm:$0xff] }
 0x355   :  { %1301 = vmatprep.subr.mxu1 %v167_v44  ;;  %v257_v44 = vld [vmem:[#allocation13 + $0x378] sm:$0xff] }
 0x356   :  { %1302 = vmatpush1.msra.mxu1 %v166_v12  ;;  %v256_v12 = vld [vmem:[#allocation13 + $0x370] sm:$0xff] }
 0x357   :  { %1303 = vmatprep.subr.mxu1 %v162_v46  ;;  %v252_v46 = vld [vmem:[#allocation13 + $0x350] sm:$0xff] }
 0x358   :  { %1304 = vmatpush1.msra.mxu1 %v161_v49 }
 0x359   :  { %1305 = vmatprep.subr.mxu1 %v157_v61  ;;  %v251_v61 = vld [vmem:[#allocation13 + $0x348] sm:$0xff] }
 0x35a   :  { %1306 = vmatpush1.msra.mxu1 %v156_v55  ;;  %v237_v55 = vld [vmem:[#allocation13 + $0x2d8] sm:$0xff] }
 0x35b   :  { %1307 = vmatprep.subr.mxu1 %v152_v56  ;;  %v236_v56 = vld [vmem:[#allocation13 + $0x2d0] sm:$0xff] }
 0x35c   :  { %1308 = vmatpush1.msra.mxu1 %v151_v11  ;;  %v232_v11 = vld [vmem:[#allocation13 + $0x2b0] sm:$0xff] }
 0x35d   :  { %1309 = vmatprep.subr.mxu1 %v147_v16  ;;  %v377_v16 = vld [vmem:[#allocation13 + $0x738] sm:$0xff] }
 0x35e   :  { %1310 = vmatpush1.msra.mxu1 %v146_v3  ;;  %v374_v3 = vld [vmem:[#allocation13 + $0x720] sm:$0xff] }
 0x3d1   :  { %v1001_v6 = vpop.xlane.xlu0 %1000 }
 0x3d2   :  { %v1002_v20 = vmax.f32 %v1001_v6, 1e-09 }
 0x3d4   :  { %1973 = vrcp.f32 %v1002_v20  ;;  %v246_v20 = vld [vmem:[#allocation13 + $0x320] sm:$0xff] }
 0x3e1   :  { %v2532_v8 = vpop.eup %1973 }
 0x3e2   :  { %v2536_v9 = vrot.slane %v2532_v8, %v2441_v59  ;;  %v1008_v10 = vrot.slane %v2532_v8, %v2288_v29  ;;  %v2546_v58 = vrot.slane %v2532_v8, %v797_v57  ;;  %v1016_v5 = vrot.slane %v2532_v8, %v2415_v54 }
 0x3e3   :  { %v1028_v62 = vrot.slane %v2532_v8, %v789_v51  ;;  %v1032_v6 = vrot.slane %v2532_v8, %v793_v63  ;;  %v382_v63 = vld [vmem:[#allocation13 + $0x760] sm:$0xff] }
 0x3e4   :  { %v1053_v14 = vmul.f32 %v2485_v50, %v2536_v9  ;;  %v1045_v15 = vmul.f32 %v2444_v28, %v1008_v10  ;;  %v1059_v18 = vmul.f32 %v2474_v1, %v2546_v58  ;;  %v1046_v19 = vmul.f32 %v2446_v17, %v1008_v10  ;;  %v302_v1 = vld [vmem:[#allocation13 + $0x4e0] sm:$0xff]  ;;  %v297_v17 = vld [vmem:[#allocation13 + $0x4b8] sm:$0xff]  ;;  %1350 = vmatprep.subr.mxu0 %v382_v63  ;;  %v312_v63 = vld [vmem:[#allocation13 + $0x530] sm:$0xff] }
 0x3e5   :  { %v1012_v50 = vrot.slane %v2532_v8, %v2407_v47  ;;  %v1049_v21 = vmul.f32 %v2463_v39, %v1016_v5  ;;  %1311 = vmatprep.subr.mxu1 %v302_v1  ;;  %v1055_v49 = vmul.f32 %v2459_v37, %v1028_v62  ;;  %v1056_v51 = vmul.f32 %v2491_v52, %v1028_v62  ;;  %v241_v10 = vld [vmem:[#allocation13 + $0x2f8] sm:$0xff]  ;;  %v227_v52 = vld [vmem:[#allocation13 + $0x288] sm:$0xff] }
 0x3e6   :  { %1119 = vperm.xlu0 %1908, %v1053_v14   ;;  %1079 = vperm.xlu1 %1907, %v1045_v15   ;;  %v1057_v37 = vmul.f32 %v2466_v40, %v1032_v6  ;;  %v231_v14 = vld [vmem:[#allocation13 + $0x2a8] sm:$0xff]  ;;  %v384_v15 = vld [vmem:[#allocation13 + $0x770] sm:$0xff]  ;;  %v341_v62 = vld [vmem:[#allocation13 + $0x618] sm:$0xff] }
 0x3e7   :  { %v1047_v28 = vmul.f32 %v2452_v33, %v1012_v50  ;;  %v1048_v57 = vmul.f32 %v2456_v35, %v1012_v50  ;;  %1312 = vmatpush2.msra.mxu1 %v301_v23  ;;  %v1050_v33 = vmul.f32 %v2471_v42, %v1016_v5  ;;  %v1020_v35 = vrot.slane %v2532_v8, %v2431_v13  ;;  %v277_v42 = vld [vmem:[#allocation13 + $0x418] sm:$0xff]  ;;  %v2575_v40 = vld [vmem:[#allocation2] sm:$0xff]  ;;  %v372_v5 = vld [vmem:[#allocation13 + $0x710] sm:$0xff] }
 0x3e8   :  { %1313 = vmatprep.subr.mxu1 %v297_v17  ;;  %v381_v8 = vld [vmem:[#allocation13 + $0x758] sm:$0xff]  ;;  %v383_v50 = vld [vmem:[#allocation13 + $0x768] sm:$0xff]  ;;  %v366_v17 = vld [vmem:[#allocation13 + $0x6e0] sm:$0xff] }
 0x3e9   :  { %1314 = vmatpush2.msra.mxu1 %v296_v7  ;;  %v1051_v39 = vmul.f32 %v2478_v45, %v1020_v35  ;;  %v1052_v34 = vmul.f32 %v2482_v48, %v1020_v35  ;;  %v1054_v45 = vmul.f32 %v2488_v25, %v2536_v9  ;;  %v261_v48 = vld [vmem:[#allocation13 + $0x398] sm:$0xff]  ;;  %v247_v25 = vld [vmem:[#allocation13 + $0x328] sm:$0xff]  ;;  %v242_v9 = vld [vmem:[#allocation13 + $0x300] sm:$0xff]  ;;  %1351 = vmatpush1.msra.mxu0 %v381_v8 }
 0x3ea   :  { %1149 = vperm.xlu0 %1908, %v1059_v18   ;;  %1084 = vperm.xlu1 %1907, %v1046_v19   ;;  %v1058_v18 = vmul.f32 %v2494_v36, %v1032_v6  ;;  %v376_v19 = vld [vmem:[#allocation13 + $0x730] sm:$0xff]  ;;  %v378_v36 = vld [vmem:[#allocation13 + $0x740] sm:$0xff]  ;;  %v367_v1 = vld [vmem:[#allocation13 + $0x6e8] sm:$0xff] }
 0x3eb   :  { %1315 = vmatprep.subr.mxu1 %v292_v24  ;;  %1352 = vmatprep.subr.mxu0 %v377_v16  ;;  %v373_v23 = vld [vmem:[#allocation13 + $0x718] sm:$0xff]  ;;  %v362_v24 = vld [vmem:[#allocation13 + $0x6c0] sm:$0xff] }
 0x3ec   :  { %1316 = vmatpush2.msra.mxu1 %v291_v26  ;;  %1353 = vmatpush1.msra.mxu0 %v376_v19  ;;  %v369_v7 = vld [vmem:[#allocation13 + $0x6f8] sm:$0xff]  ;;  %v363_v26 = vld [vmem:[#allocation13 + $0x6c8] sm:$0xff]  ;;  %v318_v8 = vld [vmem:[#allocation13 + $0x560] sm:$0xff] }
 0x3ed   :  { %1317 = vmatprep.subr.mxu1 %v287_v27  ;;  %1354 = vmatprep.subr.mxu0 %v372_v5  ;;  %v357_v35 = vld [vmem:[#allocation13 + $0x698] sm:$0xff]  ;;  %v356_v27 = vld [vmem:[#allocation13 + $0x690] sm:$0xff]  ;;  %v314_v16 = vld [vmem:[#allocation13 + $0x540] sm:$0xff] }
 0x3ee   :  { %1089 = vperm.xlu1 %1907, %v1047_v28   ;;  %1318 = vmatpush2.msra.mxu1 %v286_v30  ;;  %v379_v28 = vld [vmem:[#allocation13 + $0x748] sm:$0xff]  ;;  %v352_v30 = vld [vmem:[#allocation13 + $0x670] sm:$0xff]  ;;  %v333_v6 = vld [vmem:[#allocation13 + $0x5d8] sm:$0xff] }
 0x3ef   :  { %1319 = vmatprep.subr.mxu1 %v282_v60  ;;  %v358_v60 = vld [vmem:[#allocation13 + $0x6a0] sm:$0xff]  ;;  %v313_v19 = vld [vmem:[#allocation13 + $0x538] sm:$0xff]  ;;  %v308_v5 = vld [vmem:[#allocation13 + $0x510] sm:$0xff] }
 0x3f0   :  { %1320 = vmatpush2.msra.mxu1 %v281_v31  ;;  %v351_v31 = vld [vmem:[#allocation13 + $0x668] sm:$0xff] }
 0x3f1   :  { %1321 = vmatprep.subr.mxu1 %v277_v42  ;;  %v354_v42 = vld [vmem:[#allocation13 + $0x680] sm:$0xff] }
 0x3f2   :  { %1094 = vperm.xlu1 %1907, %v1048_v57   ;;  %1322 = vmatpush2.msra.mxu1 %v276_v32  ;;  %v1060_v57 = vmul.f32 %v2497_v53, %v2546_v58  ;;  %v361_v53 = vld [vmem:[#allocation13 + $0x6b8] sm:$0xff]  ;;  %v364_v58 = vld [vmem:[#allocation13 + $0x6d0] sm:$0xff]  ;;  %v347_v32 = vld [vmem:[#allocation13 + $0x648] sm:$0xff] }
 0x3f3   :  { %1323 = vmatprep.subr.mxu1 %v272_v2  ;;  %v353_v2 = vld [vmem:[#allocation13 + $0x678] sm:$0xff] }
 0x3f4   :  { %1324 = vmatpush2.msra.mxu1 %v271_v38  ;;  %v349_v38 = vld [vmem:[#allocation13 + $0x658] sm:$0xff] }
 0x3f5   :  { %1325 = vmatprep.subr.mxu1 %v267_v4  ;;  %v342_v4 = vld [vmem:[#allocation13 + $0x620] sm:$0xff] }
 0x3f6   :  { %1099 = vperm.xlu1 %1907, %v1049_v21   ;;  %1326 = vmatpush2.msra.mxu1 %v266_v41  ;;  %v371_v21 = vld [vmem:[#allocation13 + $0x708] sm:$0xff]  ;;  %v344_v41 = vld [vmem:[#allocation13 + $0x630] sm:$0xff] }
 0x3f7   :  { %1327 = vmatprep.subr.mxu1 %v262_v43  ;;  %1355 = vmatpush1.msra.mxu0 %v371_v21  ;;  %v337_v43 = vld [vmem:[#allocation13 + $0x5f8] sm:$0xff] }
 0x3f8   :  { %1328 = vmatpush2.msra.mxu1 %v261_v48  ;;  %1356 = vmatprep.subr.mxu0 %v367_v1  ;;  %v343_v48 = vld [vmem:[#allocation13 + $0x628] sm:$0xff] }
 0x3f9   :  { %1329 = vmatprep.subr.mxu1 %v257_v44  ;;  %1357 = vmatpush1.msra.mxu0 %v366_v17  ;;  %v336_v44 = vld [vmem:[#allocation13 + $0x5f0] sm:$0xff] }
 0x3fa   :  { %1104 = vperm.xlu1 %1907, %v1050_v33   ;;  %1330 = vmatpush2.msra.mxu1 %v256_v12  ;;  %v368_v33 = vld [vmem:[#allocation13 + $0x6f0] sm:$0xff]  ;;  %v339_v12 = vld [vmem:[#allocation13 + $0x608] sm:$0xff] }
 0x3fb   :  { %1331 = vmatprep.subr.mxu1 %v252_v46  ;;  %1358 = vmatprep.subr.mxu0 %v362_v24  ;;  %v332_v46 = vld [vmem:[#allocation13 + $0x5d0] sm:$0xff] }
 0x3fc   :  { %1332 = vmatpush2.msra.mxu1 %v251_v61  ;;  %1359 = vmatpush1.msra.mxu0 %v361_v53  ;;  %v331_v61 = vld [vmem:[#allocation13 + $0x5c8] sm:$0xff] }
 0x3fd   :  { %1333 = vmatprep.subr.mxu1 %v247_v25  ;;  %1360 = vmatprep.subr.mxu0 %v357_v35  ;;  %v334_v25 = vld [vmem:[#allocation13 + $0x5e0] sm:$0xff]  ;;  %v1062_v35 = vld [vmem:[#allocation8 + $0x8] sm:$0xff] }
 0x3fe   :  { %1109 = vperm.xlu1 %1907, %v1051_v39   ;;  %1334 = vmatpush2.msra.mxu1 %v246_v20  ;;  %v359_v39 = vld [vmem:[#allocation13 + $0x6a8] sm:$0xff]  ;;  %v326_v20 = vld [vmem:[#allocation13 + $0x5a0] sm:$0xff] }
 0x3ff   :  { %1335 = vmatprep.subr.mxu1 %v242_v9  ;;  %1361 = vmatpush1.msra.mxu0 %v356_v27  ;;  %v329_v9 = vld [vmem:[#allocation13 + $0x5b8] sm:$0xff] }
 0x400   :  { %1336 = vmatpush2.msra.mxu1 %v241_v10  ;;  %1362 = vmatprep.subr.mxu0 %v352_v30  ;;  %v322_v10 = vld [vmem:[#allocation13 + $0x580] sm:$0xff]  ;;  %v1068_v27 = vld [vmem:[#allocation8 + $0x38] sm:$0xff] }
 0x401   :  { %1337 = vmatprep.subr.mxu1 %v237_v55  ;;  %1363 = vmatpush1.msra.mxu0 %v351_v31  ;;  %v328_v55 = vld [vmem:[#allocation13 + $0x5b0] sm:$0xff]  ;;  %v1065_v30 = vld [vmem:[#allocation8 + $0x20] sm:$0xff] }
 0x402   :  { %1114 = vperm.xlu1 %1907, %v1052_v34   ;;  %1338 = vmatpush2.msra.mxu1 %v236_v56  ;;  %v346_v34 = vld [vmem:[#allocation13 + $0x640] sm:$0xff]  ;;  %v324_v56 = vld [vmem:[#allocation13 + $0x590] sm:$0xff] }
 0x403   :  { %1339 = vmatprep.subr.mxu1 %v232_v11  ;;  %1364 = vmatprep.subr.mxu0 %v347_v32  ;;  %v317_v11 = vld [vmem:[#allocation13 + $0x558] sm:$0xff]  ;;  %v1061_v31 = vld [vmem:[#allocation8] sm:$0xff]  ;;  %v1067_v32 = vld [vmem:[#allocation8 + $0x30] sm:$0xff] }
 0x404   :  { %1340 = vmatpush2.msra.mxu1 %v231_v14  ;;  %1365 = vmatpush1.msra.mxu0 %v346_v34  ;;  %v323_v14 = vld [vmem:[#allocation13 + $0x588] sm:$0xff]  ;;  %v1069_v34 = vld [vmem:[#allocation8 + $0x40] sm:$0xff] }
 0x405   :  { %1341 = vmatprep.subr.mxu1 %v227_v52  ;;  %1366 = vmatprep.subr.mxu0 %v342_v4  ;;  %v316_v52 = vld [vmem:[#allocation13 + $0x550] sm:$0xff] }
 0x406   :  { %1124 = vperm.xlu1 %1907, %v1054_v45   ;;  %1342 = vmatpush2.msra.mxu1 %v226_v22  ;;  %v348_v45 = vld [vmem:[#allocation13 + $0x650] sm:$0xff]  ;;  %v319_v22 = vld [vmem:[#allocation13 + $0x568] sm:$0xff] }
 0x407   :  { %1492 = vmatprep.subr.mxu1 %v384_v15  ;;  %1344 = vmatmul.mubr.f32.vlgmr.msra.gmra.mxu1 %v2575_v40  ;;  %v311_v15 = vld [vmem:[#allocation13 + $0x528] sm:$0xff] }
 0x408   :  { %1493 = vmatpush1.msra.mxu1 %v383_v50  ;;  %1556 = vmatprep.mubr.f32.mxu1 %v2171_v0  ;;  %v306_v50 = vld [vmem:[#allocation13 + $0x500] sm:$0xff] }
 0x409   :  { %1494 = vmatprep.subr.mxu1 %v379_v28  ;;  %1367 = vmatpush1.msra.mxu0 %v341_v62  ;;  %v309_v28 = vld [vmem:[#allocation13 + $0x518] sm:$0xff] }
 0x40a   :  { %1129 = vperm.xlu1 %1907, %v1055_v49   ;;  %1495 = vmatpush1.msra.mxu1 %v378_v36  ;;  %v338_v49 = vld [vmem:[#allocation13 + $0x600] sm:$0xff]  ;;  %v305_v36 = vld [vmem:[#allocation13 + $0x4f8] sm:$0xff] }
 0x40b   :  { %1496 = vmatprep.subr.mxu1 %v374_v3  ;;  %1368 = vmatprep.subr.mxu0 %v337_v43 }
 0x40c   :  { %1497 = vmatpush1.msra.mxu1 %v373_v23  ;;  %1369 = vmatpush1.msra.mxu0 %v336_v44 }
 0x40d   :  { %1498 = vmatprep.subr.mxu1 %v369_v7  ;;  %1370 = vmatprep.subr.mxu0 %v332_v46 }
 0x40e   :  { %1134 = vperm.xlu1 %1907, %v1056_v51   ;;  %1499 = vmatpush1.msra.mxu1 %v368_v33  ;;  %v327_v51 = vld [vmem:[#allocation13 + $0x5a8] sm:$0xff]  ;;  %v1064_v33 = vld [vmem:[#allocation8 + $0x18] sm:$0xff] }
 0x40f   :  { %1500 = vmatprep.subr.mxu1 %v364_v58  ;;  %1371 = vmatpush1.msra.mxu0 %v331_v61  ;;  %v1066_v58 = vld [vmem:[#allocation8 + $0x28] sm:$0xff] }
 0x410   :  { %1501 = vmatpush1.msra.mxu1 %v363_v26  ;;  %1372 = vmatprep.subr.mxu0 %v327_v51  ;;  %v1063_v26 = vld [vmem:[#allocation8 + $0x10] sm:$0xff] }
 0x411   :  { %1502 = vmatprep.subr.mxu1 %v359_v39  ;;  %1373 = vmatpush1.msra.mxu0 %v326_v20  ;;  %v1071_v20 = vld [vmem:[#allocation8 + $0x50] sm:$0xff] }
 0x412   :  { %1139 = vperm.xlu1 %1907, %v1057_v37   ;;  %1503 = vmatpush1.msra.mxu1 %v358_v60  ;;  %v321_v37 = vld [vmem:[#allocation13 + $0x578] sm:$0xff]  ;;  %v1070_v60 = vld [vmem:[#allocation8 + $0x48] sm:$0xff] }
 0x413   :  { %1504 = vmatprep.subr.mxu1 %v354_v42  ;;  %1374 = vmatprep.subr.mxu0 %v322_v10 }
 0x414   :  { %1505 = vmatpush1.msra.mxu1 %v353_v2  ;;  %1375 = vmatpush1.msra.mxu0 %v321_v37 }
 0x415   :  { %1506 = vmatprep.subr.mxu1 %v349_v38  ;;  %1376 = vmatprep.subr.mxu0 %v317_v11 }
 0x416   :  { %1144 = vperm.xlu1 %1907, %v1058_v18   ;;  %1507 = vmatpush1.msra.mxu1 %v348_v45  ;;  %v307_v18 = vld [vmem:[#allocation13 + $0x508] sm:$0xff] }
 0x417   :  { %1508 = vmatprep.subr.mxu1 %v344_v41  ;;  %1377 = vmatpush1.msra.mxu0 %v316_v52 }
 0x418   :  { %1509 = vmatpush1.msra.mxu1 %v343_v48  ;;  %1378 = vmatprep.subr.mxu0 %v312_v63 }
 0x419   :  { %1510 = vmatprep.subr.mxu1 %v339_v12  ;;  %1379 = vmatpush1.msra.mxu0 %v311_v15 }
 0x41a   :  { %1154 = vperm.xlu1 %1907, %v1060_v57   ;;  %1511 = vmatpush1.msra.mxu1 %v338_v49  ;;  %v224_v57 = vld [vmem:[#allocation13 + $0x270] sm:$0xff] }
 0x41b   :  { %1512 = vmatprep.subr.mxu1 %v334_v25  ;;  %1380 = vmatprep.subr.mxu0 %v307_v18 }
 0x41c   :  { %1513 = vmatpush1.msra.mxu1 %v333_v6  ;;  %1381 = vmatpush1.msra.mxu0 %v306_v50 }
 0x41d   :  { %1514 = vmatprep.subr.mxu1 %v329_v9  ;;  %1421 = vmatprep.subr.mxu0 %v224_v57  ;;  %v1072_v9 = vld [vmem:[#allocation8 + $0x58] sm:$0xff]  ;;  %v1073_v57 = vld [vmem:[#allocation8 + $0x60] sm:$0xff] }
 0x41e   :  { %1515 = vmatpush1.msra.mxu1 %v328_v55 }
 0x41f   :  { %1516 = vmatprep.subr.mxu1 %v324_v56 }
 0x420   :  { %1517 = vmatpush1.msra.mxu1 %v323_v14 }
 0x421   :  { %1518 = vmatprep.subr.mxu1 %v319_v22 }
 0x422   :  { %1519 = vmatpush1.msra.mxu1 %v318_v8 }
 0x423   :  { %1520 = vmatprep.subr.mxu1 %v314_v16 }
 0x424   :  { %1521 = vmatpush1.msra.mxu1 %v313_v19 }
 0x425   :  { %1522 = vmatprep.subr.mxu1 %v309_v28 }
 0x426   :  { %1523 = vmatpush1.msra.mxu1 %v308_v5  ;;  %v1074_v5 = vld [vmem:[#allocation8 + $0x68] sm:$0xff] }
 0x427   :  { %1769 = vmatprep.subr.mxu1 %v305_v36 }
 0x461   :  { %v1080_v21 = vpop.permute.xlu1 %1079  ;;  %v1120_v38 = vpop.permute.xlu0 %1119 }
 0x462   :  { %v1157_v48 = vmul.f32 %v1080_v21, %v1061_v31  ;;  %v1165_v46 = vmul.f32 %v1120_v38, %v1069_v34 }
 0x465   :  { %v1085_v3 = vpop.permute.xlu1 %1084 }
 0x466   :  { %v1158_v4 = vmul.f32 %v1085_v3, %v1062_v35  ;;  %v1076_v35 = vld [vmem:[#allocation8 + $0x78] sm:$0xff] }
 0x468   :  { %v1173_v25 = vadd.f32 %v1158_v4, %v1157_v48 }
 0x469   :  { %v1090_v1 = vpop.permute.xlu1 %1089 }
 0x46a   :  { %v1159_v45 = vmul.f32 %v1090_v1, %v1063_v26  ;;  %v1174_v56 = vrot.slane %v1173_v25, 4 }
 0x46c   :  { %v1175_v18 = vadd.f32 %v1174_v56, %v1173_v25 }
 0x46d   :  { %v1095_v23 = vpop.permute.xlu1 %1094 }
 0x46e   :  { %v1160_v39 = vmul.f32 %v1095_v23, %v1064_v33  ;;  %v1075_v23 = vld [vmem:[#allocation8 + $0x70] sm:$0xff] }
 0x470   :  { %v1180_v44 = vadd.f32 %v1160_v39, %v1159_v45 }
 0x471   :  { %v1100_v17 = vpop.permute.xlu1 %1099 }
 0x472   :  { %v1161_v41 = vmul.f32 %v1100_v17, %v1065_v30  ;;  %v1181_v10 = vrot.slane %v1180_v44, 4  ;;  %v1150_v17 = vpop.permute.xlu0 %1149 }
 0x473   :  { %v1171_v30 = vmul.f32 %v1150_v17, %v1075_v23  ;;  %v214_v23 = vld [vmem:[#allocation13 + $0x220] sm:$0xff]  ;;  %v295_v17 = vld [vmem:[#allocation13 + $0x4a8] sm:$0xff] }
 0x474   :  { %v1182_v63 = vadd.f32 %v1181_v10, %v1180_v44 }
 0x475   :  { %v1105_v7 = vpop.permute.xlu1 %1104 }
 0x476   :  { %v1162_v42 = vmul.f32 %v1105_v7, %v1066_v58  ;;  %v1183_v36 = vrot.slane %v1182_v63, 2  ;;  %v1176_v7 = vrot.slane %v1175_v18, 2 }
 0x478   :  { %v1187_v49 = vadd.f32 %v1162_v42, %v1161_v41  ;;  %v1184_v26 = vadd.f32 %v1183_v36, %v1182_v63  ;;  %v1177_v42 = vadd.f32 %v1176_v7, %v1175_v18  ;;  %v219_v36 = vld [vmem:[#allocation13 + $0x248] sm:$0xff]  ;;  %v213_v7 = vld [vmem:[#allocation13 + $0x218] sm:$0xff] }
 0x479   :  { %v1110_v24 = vpop.permute.xlu1 %1109 }
 0x47a   :  { %v1163_v12 = vmul.f32 %v1110_v24, %v1067_v32  ;;  %v1188_v55 = vrot.slane %v1187_v49, 4  ;;  %v1185_v4 = vrot.slane %v1184_v26, 1  ;;  %v1178_v48 = vrot.slane %v1177_v42, 1 }
 0x47c   :  { %v1189_v15 = vadd.f32 %v1188_v55, %v1187_v49 }
 0x47d   :  { %v1115_v53 = vpop.permute.xlu1 %1114 }
 0x47e   :  { %v1164_v62 = vmul.f32 %v1115_v53, %v1068_v27  ;;  %v1190_v3 = vrot.slane %v1189_v15, 2 }
 0x480   :  { %v1194_v51 = vadd.f32 %v1164_v62, %v1163_v12 }
 0x481   :  { %v1125_v2 = vpop.permute.xlu1 %1124 }
 0x482   :  { %v1166_v43 = vmul.f32 %v1125_v2, %v1070_v60  ;;  %v1195_v11 = vrot.slane %v1194_v51, 4  ;;  %v1191_v60 = vadd.f32 %v1190_v3, %v1189_v15  ;;  %v218_v3 = vld [vmem:[#allocation13 + $0x240] sm:$0xff] }
 0x484   :  { %v1201_v6 = vadd.f32 %v1166_v43, %v1165_v46  ;;  %v1196_v19 = vadd.f32 %v1195_v11, %v1194_v51  ;;  %v1192_v43 = vrot.slane %v1191_v60, 1 }
 0x485   :  { %v1130_v61 = vpop.permute.xlu1 %1129 }
 0x486   :  { %v1167_v14 = vmul.f32 %v1130_v61, %v1071_v20  ;;  %v1202_v22 = vrot.slane %v1201_v6, 4  ;;  %v1197_v24 = vrot.slane %v1196_v19, 2  ;;  %v1186_v61 = vadd.f32 %v1185_v4, %v1184_v26  ;;  %v210_v26 = vld [vmem:[#allocation13 + $0x200] sm:$0xff]  ;;  %v275_v4 = vld [vmem:[#allocation13 + $0x408] sm:$0xff] }
 0x487   :  { %v1193_v20 = vadd.f32 %v1192_v43, %v1191_v60  ;;  %v2592_v60 = vld [vmem:[#allocation5] sm:$0xff]  ;;  %v270_v43 = vld [vmem:[#allocation13 + $0x3e0] sm:$0xff] }
 0x488   :  { %v1203_v28 = vadd.f32 %v1202_v22, %v1201_v6  ;;  %v1198_v32 = vadd.f32 %v1197_v24, %v1196_v19  ;;  %v215_v24 = vld [vmem:[#allocation13 + $0x228] sm:$0xff] }
 0x489   :  { %v1135_v37 = vpop.permute.xlu1 %1134 }
 0x48a   :  { %v1168_v52 = vmul.f32 %v1135_v37, %v1072_v9  ;;  %v1204_v58 = vrot.slane %v1203_v28, 2  ;;  %v1199_v44 = vrot.slane %v1198_v32, 1  ;;  %v1179_v9 = vadd.f32 %v1178_v48, %v1177_v42  ;;  %v198_v42 = vld [vmem:[#allocation13 + $0x1a0] sm:$0xff]  ;;  %v184_v48 = vld [vmem:[#allocation13 + $0x130] sm:$0xff] }
 0x48c   :  { %v1208_v8 = vadd.f32 %v1168_v52, %v1167_v14  ;;  %v1205_v38 = vadd.f32 %v1204_v58, %v1203_v28  ;;  %v1200_v10 = vadd.f32 %v1199_v44, %v1198_v32  ;;  %v1245_v11 = vsel %vm747_vm2, %v1186_v61, %v1179_v9  ;;  %v223_v28 = vld [vmem:[#allocation13 + $0x268] sm:$0xff]  ;;  %v208_v58 = vld [vmem:[#allocation13 + $0x1f0] sm:$0xff]  ;;  %v190_v44 = vld [vmem:[#allocation13 + $0x160] sm:$0xff] }
 0x48d   :  { %v1140_v16 = vpop.permute.xlu1 %1139  ;;  %v1246_v22 = vsel %vm749_vm3, %v1193_v20, %v1245_v11  ;;  %v280_v32 = vld [vmem:[#allocation13 + $0x430] sm:$0xff]  ;;  %v185_v61 = vld [vmem:[#allocation13 + $0x138] sm:$0xff]  ;;  %v250_v11 = vld [vmem:[#allocation13 + $0x340] sm:$0xff] }
 0x48e   :  { %v1209_v50 = vrot.slane %v1208_v8, 4  ;;  %v1169_v33 = vmul.f32 %v1140_v16, %v1073_v57  ;;  %v1206_v49 = vrot.slane %v1205_v38, 1  ;;  %v1247_v15 = vsel %vm751_vm4, %v1200_v10, %v1246_v22  ;;  %v225_v57 = vld [vmem:[#allocation13 + $0x278] sm:$0xff]  ;;  %v180_v20 = vld [vmem:[#allocation13 + $0x110] sm:$0xff]  ;;  %v255_v10 = vld [vmem:[#allocation13 + $0x368] sm:$0xff] }
 0x48f   :  { %v173_v9 = vld [vmem:[#allocation13 + $0xd8] sm:$0xff]  ;;  %v163_v22 = vld [vmem:[#allocation13 + $0x88] sm:$0xff] }
 0x490   :  { %v1210_v21 = vadd.f32 %v1209_v50, %v1208_v8  ;;  %v1207_v56 = vadd.f32 %v1206_v49, %v1205_v38  ;;  %v193_v38 = vld [vmem:[#allocation13 + $0x178] sm:$0xff]  ;;  %v179_v49 = vld [vmem:[#allocation13 + $0x108] sm:$0xff] }
 0x491   :  { %v1145_v1 = vpop.permute.xlu1 %1144 }
 0x492   :  { %v1170_v53 = vmul.f32 %v1145_v1, %v1074_v5  ;;  %v1211_v27 = vrot.slane %v1210_v21, 2  ;;  %v1248_v16 = vsel %vm753_vm5, %v1207_v56, %v1247_v15  ;;  %v220_v1 = vld [vmem:[#allocation13 + $0x250] sm:$0xff]  ;;  %v165_v15 = vld [vmem:[#allocation13 + $0x98] sm:$0xff] }
 0x493   :  { %v168_v56 = vld [vmem:[#allocation13 + $0xb0] sm:$0xff] }
 0x494   :  { %v1215_v39 = vadd.f32 %v1170_v53, %v1169_v33  ;;  %v1212_v45 = vadd.f32 %v1211_v27, %v1210_v21  ;;  %v300_v21 = vld [vmem:[#allocation13 + $0x4d0] sm:$0xff]  ;;  %v209_v33 = vld [vmem:[#allocation13 + $0x1f8] sm:$0xff]  ;;  %v290_v53 = vld [vmem:[#allocation13 + $0x480] sm:$0xff] }
 0x495   :  { %v1155_v31 = vpop.permute.xlu1 %1154  ;;  %v203_v27 = vld [vmem:[#allocation13 + $0x1c8] sm:$0xff] }
 0x496   :  { %v1216_v2 = vrot.slane %v1215_v39, 4  ;;  %v1172_v34 = vmul.f32 %v1155_v31, %v1076_v35  ;;  %v1213_v25 = vrot.slane %v1212_v45, 1  ;;  %v204_v35 = vld [vmem:[#allocation13 + $0x1d0] sm:$0xff]  ;;  %v205_v31 = vld [vmem:[#allocation13 + $0x1d8] sm:$0xff] }
 0x498   :  { %v1217_v62 = vadd.f32 %v1216_v2, %v1215_v39  ;;  %v1222_v41 = vadd.f32 %v1172_v34, %v1171_v30  ;;  %v1214_v14 = vadd.f32 %v1213_v25, %v1212_v45  ;;  %v285_v39 = vld [vmem:[#allocation13 + $0x458] sm:$0xff]  ;;  %v199_v30 = vld [vmem:[#allocation13 + $0x1a8] sm:$0xff]  ;;  %v194_v2 = vld [vmem:[#allocation13 + $0x180] sm:$0xff] }
 0x499   :  { %v200_v34 = vld [vmem:[#allocation13 + $0x1b0] sm:$0xff]  ;;  %v189_v45 = vld [vmem:[#allocation13 + $0x158] sm:$0xff]  ;;  %v178_v25 = vld [vmem:[#allocation13 + $0x100] sm:$0xff] }
 0x49a   :  { %v1218_v12 = vrot.slane %v1217_v62, 2  ;;  %v1223_v46 = vrot.slane %v1222_v41, 4  ;;  %v1249_v19 = vsel %vm755_vm6, %v1214_v14, %v1248_v16  ;;  %v164_v14 = vld [vmem:[#allocation13 + $0x90] sm:$0xff]  ;;  %v158_v16 = vld [vmem:[#allocation13 + $0x60] sm:$0xff] }
 0x49c   :  { %v1219_v51 = vadd.f32 %v1218_v12, %v1217_v62  ;;  %v1224_v6 = vadd.f32 %v1223_v46, %v1222_v41  ;;  %v195_v62 = vld [vmem:[#allocation13 + $0x188] sm:$0xff]  ;;  %v188_v41 = vld [vmem:[#allocation13 + $0x150] sm:$0xff]  ;;  %v265_v46 = vld [vmem:[#allocation13 + $0x3b8] sm:$0xff] }
 0x49d   :  { %v183_v12 = vld [vmem:[#allocation13 + $0x128] sm:$0xff] }
 0x49e   :  { %v1220_v55 = vrot.slane %v1219_v51, 1  ;;  %v1225_v37 = vrot.slane %v1224_v6, 2 }
 0x4a0   :  { %v1226_v52 = vadd.f32 %v1225_v37, %v1224_v6  ;;  %v1221_v63 = vadd.f32 %v1220_v55, %v1219_v51  ;;  %v260_v51 = vld [vmem:[#allocation13 + $0x390] sm:$0xff]  ;;  %v174_v6 = vld [vmem:[#allocation13 + $0xe0] sm:$0xff]  ;;  %v169_v55 = vld [vmem:[#allocation13 + $0xb8] sm:$0xff] }
 0x4a1   :  { %v175_v37 = vld [vmem:[#allocation13 + $0xe8] sm:$0xff] }
 0x4a2   :  { %v1227_v8 = vrot.slane %v1226_v52, 1  ;;  %v1250_v50 = vsel %vm757_vm7, %v1221_v63, %v1249_v19  ;;  %v245_v63 = vld [vmem:[#allocation13 + $0x318] sm:$0xff]  ;;  %v154_v19 = vld [vmem:[#allocation13 + $0x40] sm:$0xff] }
 0x4a4   :  { %v1228_v18 = vadd.f32 %v1227_v8, %v1226_v52  ;;  %v170_v52 = vld [vmem:[#allocation13 + $0xc0] sm:$0xff]  ;;  %v159_v8 = vld [vmem:[#allocation13 + $0x68] sm:$0xff] }
 0x4a6   :  { %v2588_v5 = vsel %vm759_vm8, %v1228_v18, %v1250_v50  ;;  %v240_v18 = vld [vmem:[#allocation13 + $0x2f0] sm:$0xff] }
 0x4a7   :  { %1415 = vmatmul.mubr.f32.vlgmr.msra.gmra.mxu0 %v2588_v5  ;;  %1557 = vmatmul.mubr.f32.vlgmr.msra.gmra.mxu1 %v2588_v5  ;;  %v160_v50 = vld [vmem:[#allocation13 + $0x70] sm:$0xff] }
 0x4a8   :  { %1422 = vmatpush1.msra.mxu0 %v223_v28  ;;  %1770 = vmatpush3.msra.mxu1 %v225_v57  ;;  %v153_v28 = vld [vmem:[#allocation13 + $0x38] sm:$0xff]  ;;  %v235_v57 = vld [vmem:[#allocation13 + $0x2c8] sm:$0xff] }
 0x4a9   :  { %1423 = vmatprep.subr.mxu0 %v219_v36  ;;  %1771 = vmatprep.subr.mxu1 %v300_v21  ;;  %v149_v36 = vld [vmem:[#allocation13 + $0x18] sm:$0xff]  ;;  %v155_v21 = vld [vmem:[#allocation13 + $0x48] sm:$0xff] }
 0x4aa   :  { %1424 = vmatpush1.msra.mxu0 %v218_v3  ;;  %1772 = vmatpush3.msra.mxu1 %v220_v1  ;;  %v148_v3 = vld [vmem:[#allocation13 + $0x10] sm:$0xff]  ;;  %v230_v1 = vld [vmem:[#allocation13 + $0x2a0] sm:$0xff] }
 0x4ab   :  { %1425 = vmatprep.subr.mxu0 %v214_v23  ;;  %1773 = vmatprep.subr.mxu1 %v295_v17  ;;  %v304_v23 = vld [vmem:[#allocation13 + $0x4f0] sm:$0xff]  ;;  %v150_v17 = vld [vmem:[#allocation13 + $0x20] sm:$0xff] }
 0x4ac   :  { %1426 = vmatpush1.msra.mxu0 %v213_v7  ;;  %1774 = vmatpush3.msra.mxu1 %v215_v24  ;;  %v303_v7 = vld [vmem:[#allocation13 + $0x4e8] sm:$0xff] }
 0x4ad   :  { %1427 = vmatprep.subr.mxu0 %v209_v33  ;;  %1775 = vmatprep.subr.mxu1 %v290_v53  ;;  %v299_v24 = vld [vmem:[#allocation13 + $0x4c8] sm:$0xff]  ;;  %v298_v33 = vld [vmem:[#allocation13 + $0x4c0] sm:$0xff] }
 0x4ae   :  { %1428 = vmatpush1.msra.mxu0 %v208_v58  ;;  %1485 = vmatprep.mubr.f32.mxu0 %v2592_v60  ;;  %v294_v53 = vld [vmem:[#allocation13 + $0x4a0] sm:$0xff]  ;;  %v293_v58 = vld [vmem:[#allocation13 + $0x498] sm:$0xff] }
 0x4af   :  { %1429 = vmatprep.subr.mxu0 %v204_v35  ;;  %1776 = vmatpush3.msra.mxu1 %v210_v26  ;;  %v289_v35 = vld [vmem:[#allocation13 + $0x478] sm:$0xff]  ;;  %v288_v26 = vld [vmem:[#allocation13 + $0x470] sm:$0xff] }
 0x4b0   :  { %1430 = vmatpush1.msra.mxu0 %v203_v27  ;;  %1777 = vmatprep.subr.mxu1 %v285_v39  ;;  %v284_v27 = vld [vmem:[#allocation13 + $0x450] sm:$0xff]  ;;  %v283_v39 = vld [vmem:[#allocation13 + $0x448] sm:$0xff] }
 0x4b1   :  { %1431 = vmatprep.subr.mxu0 %v199_v30  ;;  %1778 = vmatpush3.msra.mxu1 %v205_v31  ;;  %v279_v30 = vld [vmem:[#allocation13 + $0x428] sm:$0xff]  ;;  %v278_v31 = vld [vmem:[#allocation13 + $0x420] sm:$0xff] }
 0x4b2   :  { %1432 = vmatpush1.msra.mxu0 %v198_v42  ;;  %1779 = vmatprep.subr.mxu1 %v280_v32  ;;  %v274_v42 = vld [vmem:[#allocation13 + $0x400] sm:$0xff]  ;;  %v269_v32 = vld [vmem:[#allocation13 + $0x3d8] sm:$0xff] }
 0x4b3   :  { %1433 = vmatprep.subr.mxu0 %v194_v2  ;;  %1780 = vmatpush3.msra.mxu1 %v200_v34  ;;  %v268_v2 = vld [vmem:[#allocation13 + $0x3d0] sm:$0xff] }
 0x4b4   :  { %1434 = vmatpush1.msra.mxu0 %v193_v38  ;;  %1781 = vmatprep.subr.mxu1 %v275_v4  ;;  %v264_v34 = vld [vmem:[#allocation13 + $0x3b0] sm:$0xff]  ;;  %v263_v38 = vld [vmem:[#allocation13 + $0x3a8] sm:$0xff] }
 0x4b5   :  { %1435 = vmatprep.subr.mxu0 %v189_v45  ;;  %1782 = vmatpush3.msra.mxu1 %v195_v62  ;;  %v259_v4 = vld [vmem:[#allocation13 + $0x388] sm:$0xff]  ;;  %v258_v45 = vld [vmem:[#allocation13 + $0x380] sm:$0xff] }
 0x4b6   :  { %1436 = vmatpush1.msra.mxu0 %v188_v41  ;;  %1783 = vmatprep.subr.mxu1 %v270_v43  ;;  %v254_v62 = vld [vmem:[#allocation13 + $0x360] sm:$0xff]  ;;  %v253_v41 = vld [vmem:[#allocation13 + $0x358] sm:$0xff] }
 0x4b7   :  { %1437 = vmatprep.subr.mxu0 %v184_v48  ;;  %1784 = vmatpush3.msra.mxu1 %v190_v44  ;;  %v249_v43 = vld [vmem:[#allocation13 + $0x338] sm:$0xff]  ;;  %v248_v48 = vld [vmem:[#allocation13 + $0x330] sm:$0xff] }
 0x4b8   :  { %1438 = vmatpush1.msra.mxu0 %v183_v12  ;;  %1785 = vmatprep.subr.mxu1 %v265_v46  ;;  %v244_v44 = vld [vmem:[#allocation13 + $0x310] sm:$0xff]  ;;  %v243_v12 = vld [vmem:[#allocation13 + $0x308] sm:$0xff] }
 0x4b9   :  { %1439 = vmatprep.subr.mxu0 %v179_v49  ;;  %1786 = vmatpush3.msra.mxu1 %v185_v61  ;;  %v239_v46 = vld [vmem:[#allocation13 + $0x2e8] sm:$0xff]  ;;  %v238_v49 = vld [vmem:[#allocation13 + $0x2e0] sm:$0xff] }
 0x4ba   :  { %1440 = vmatpush1.msra.mxu0 %v178_v25  ;;  %1787 = vmatprep.subr.mxu1 %v260_v51  ;;  %v234_v61 = vld [vmem:[#allocation13 + $0x2c0] sm:$0xff]  ;;  %v233_v25 = vld [vmem:[#allocation13 + $0x2b8] sm:$0xff] }
 0x4bb   :  { %1441 = vmatprep.subr.mxu0 %v174_v6  ;;  %1788 = vmatpush3.msra.mxu1 %v180_v20  ;;  %v229_v51 = vld [vmem:[#allocation13 + $0x298] sm:$0xff]  ;;  %v228_v6 = vld [vmem:[#allocation13 + $0x290] sm:$0xff] }
 0x4bc   :  { %1442 = vmatpush1.msra.mxu0 %v173_v9  ;;  %1789 = vmatprep.subr.mxu1 %v255_v10  ;;  %v385_v20 = vld [vmem:[#allocation13 + $0x778] sm:$0xff]  ;;  %v380_v9 = vld [vmem:[#allocation13 + $0x750] sm:$0xff]  ;;  %v375_v10 = vld [vmem:[#allocation13 + $0x728] sm:$0xff] }
 0x4bd   :  { %1443 = vmatprep.subr.mxu0 %v169_v55  ;;  %1790 = vmatpush3.msra.mxu1 %v175_v37  ;;  %v370_v55 = vld [vmem:[#allocation13 + $0x700] sm:$0xff]  ;;  %v365_v37 = vld [vmem:[#allocation13 + $0x6d8] sm:$0xff] }
 0x4be   :  { %1444 = vmatpush1.msra.mxu0 %v168_v56  ;;  %1791 = vmatprep.subr.mxu1 %v250_v11  ;;  %v355_v56 = vld [vmem:[#allocation13 + $0x688] sm:$0xff]  ;;  %v350_v11 = vld [vmem:[#allocation13 + $0x660] sm:$0xff] }
 0x4bf   :  { %1445 = vmatprep.subr.mxu0 %v164_v14  ;;  %1792 = vmatpush3.msra.mxu1 %v170_v52  ;;  %v345_v14 = vld [vmem:[#allocation13 + $0x638] sm:$0xff]  ;;  %v340_v52 = vld [vmem:[#allocation13 + $0x610] sm:$0xff] }
 0x4c0   :  { %1446 = vmatpush1.msra.mxu0 %v163_v22  ;;  %1793 = vmatprep.subr.mxu1 %v245_v63  ;;  %v335_v22 = vld [vmem:[#allocation13 + $0x5e8] sm:$0xff]  ;;  %v330_v63 = vld [vmem:[#allocation13 + $0x5c0] sm:$0xff] }
 0x4c1   :  { %1447 = vmatprep.subr.mxu0 %v159_v8  ;;  %1794 = vmatpush3.msra.mxu1 %v165_v15  ;;  %v325_v8 = vld [vmem:[#allocation13 + $0x598] sm:$0xff]  ;;  %v320_v15 = vld [vmem:[#allocation13 + $0x570] sm:$0xff] }
 0x4c2   :  { %1448 = vmatpush1.msra.mxu0 %v158_v16  ;;  %1795 = vmatprep.subr.mxu1 %v240_v18  ;;  %v315_v16 = vld [vmem:[#allocation13 + $0x548] sm:$0xff]  ;;  %v310_v18 = vld [vmem:[#allocation13 + $0x520] sm:$0xff] }
 0x4c3   :  { %1449 = vmatprep.subr.mxu0 %v154_v19  ;;  %1796 = vmatpush3.msra.mxu1 %v160_v50  ;;  %v386_v19 = vld [vmem:[%s2637_s9] sm:$0x1f]  ;;  %s2175_s9 = smov [#allocation14]  }
 0x4c4   :  { %1450 = vmatpush1.msra.mxu0 %v153_v28  ;;  %1797 = vmatprep.subr.mxu1 %v235_v57  ;;  %v1261_v28 = vrot.slane %v386_v19, %v2407_v47  ;;  %s1735_s28 = sshll.u32 %s2175_s9, 4  ;;  %s1736_s28 = int_to_ptr.vmem [resolvable:$true] %s1735_s28 }
 0x4c5   :  { %1451 = vmatprep.subr.mxu0 %v149_v36  ;;  %1798 = vmatpush3.msra.mxu1 %v155_v21  ;;  %v1257_v36 = vrot.slane %v386_v19, %v2288_v29  ;;  %s2130_s29 = scalar_lea.vmem %s1736_s28, 256  ;;  %p2135_p8 = scmp.lt.s32.totalorder %s1736_s28, %s1736_s28 }
 0x4c6   :  { %1452 = vmatpush1.msra.mxu0 %v148_v3  ;;  %1799 = vmatprep.subr.mxu1 %v230_v1  ;;  %p2131_p7 = scmp.ne.s32.totalorder %s1736_s28, %s2130_s29  ;;  %p2136_p9 = scmp.lt.s32.totalorder %s2130_s29, %s2130_s29 }
 0x4c7   :  { %1453 = vmatprep.subr.mxu0 %v304_v23  ;;  %1800 = vmatpush3.msra.mxu1 %v150_v17  ;;  %v1345_v50 = vpop.f32.mrf.mxu1 }
 0x4c8   :  { %1454 = vmatpush2.msra.mxu0 %v303_v7  ;;  %1627 = vmatprep.mubr.f32.mxu1 %v2592_v60  ;;  %v273_v60 = vld [vmem:[#allocation13 + $0x3f8] sm:$0xff]  ;;  %v1346_v23 = vadd.f32 %v1345_v50, %v1257_v36  ;;  %p2137_p10 = por %p2136_p9, %p2135_p8 }
 0x4c9   :  { %1455 = vmatprep.subr.mxu0 %v299_v24  ;;  %1628 = vmatmul.mubr.f32.vlgmr.msra.gmra.mxu1 %v2575_v40  ;;  %v1347_v21 = vpop.f32.mrf.mxu1 }
 0x4ca   :  { %1456 = vmatpush2.msra.mxu0 %v298_v33  ;;  %v1348_v3 = vadd.f32 %v1347_v21, %v1261_v28  ;;  %p2138_p11 = pnand %p2137_p10, %p2131_p7 }
 0x4cb   :  { %1457 = vmatprep.subr.mxu0 %v294_v53 }
 0x4cc   :  { %1458 = vmatpush2.msra.mxu0 %v293_v58 }
 0x4cd   :  { %1459 = vmatprep.subr.mxu0 %v289_v35 }
 0x4ce   :  { %1460 = vmatpush2.msra.mxu0 %v288_v26 }
 0x4cf   :  { %1461 = vmatprep.subr.mxu0 %v284_v27 }
 0x4d0   :  { %1462 = vmatpush2.msra.mxu0 %v283_v39 }
 0x4d1   :  { %1463 = vmatprep.subr.mxu0 %v279_v30 }
 0x4d2   :  { %1464 = vmatpush2.msra.mxu0 %v278_v31 }
 0x4d3   :  { %1465 = vmatprep.subr.mxu0 %v274_v42 }
 0x4d4   :  { %1466 = vmatpush2.msra.mxu0 %v273_v60  ;;  %v1269_v60 = vrot.slane %v386_v19, %v2431_v13 }
 0x4d5   :  { %1467 = vmatprep.subr.mxu0 %v269_v32 }
 0x4d6   :  { %1468 = vmatpush2.msra.mxu0 %v268_v2 }
 0x4d7   :  { %1469 = vmatprep.subr.mxu0 %v264_v34 }
 0x4d8   :  { %1470 = vmatpush2.msra.mxu0 %v263_v38 }
 0x4d9   :  { %1471 = vmatprep.subr.mxu0 %v259_v4 }
 0x4da   :  { %1472 = vmatpush2.msra.mxu0 %v258_v45 }
 0x4db   :  { %1473 = vmatprep.subr.mxu0 %v254_v62 }
 0x4dc   :  { %1474 = vmatpush2.msra.mxu0 %v253_v41 }
 0x4dd   :  { %1475 = vmatprep.subr.mxu0 %v249_v43 }
 0x4de   :  { %1476 = vmatpush2.msra.mxu0 %v248_v48 }
 0x4df   :  { %1477 = vmatprep.subr.mxu0 %v244_v44  ;;  %v127_v44 = vld [vmem:[#allocation7] sm:$0xff] }
 0x4e0   :  { %1478 = vmatpush2.msra.mxu0 %v243_v12 }
 0x4e1   :  { %1479 = vmatprep.subr.mxu0 %v239_v46 }
 0x4e2   :  { %1480 = vmatpush2.msra.mxu0 %v238_v49 }
 0x4e3   :  { %1481 = vmatprep.subr.mxu0 %v234_v61 }
 0x4e4   :  { %1482 = vmatpush2.msra.mxu0 %v233_v25 }
 0x4e5   :  { %1483 = vmatprep.subr.mxu0 %v229_v51 }
 0x4e6   :  { %1484 = vmatpush2.msra.mxu0 %v228_v6 }
 0x4e7   :  { %1486 = vmatmul.mubr.f32.vlgmr.msra.gmra.mxu0 %v2575_v40  ;;  %1856 = vmatprep.subr.mxu0 %v2171_v0  ;;  %v360_v40 = vld [vmem:[#allocation13 + $0x6b0] sm:$0xff] }
 0x4e8   :  { %1857 = vmatpush3.msra.mxu0 %v385_v20  ;;  %1888 = vmatprep.mubr.msk.f32.mxu0 %vm2172_vm0, %v2171_v0 }
 0x4e9   :  { %1858 = vmatprep.subr.mxu0 %v2171_v0 }
 0x4ea   :  { %1859 = vmatpush3.msra.mxu0 %v380_v9 }
 0x4eb   :  { %1860 = vmatprep.subr.mxu0 %v2171_v0 }
 0x4ec   :  { %1861 = vmatpush3.msra.mxu0 %v375_v10 }
 0x4ed   :  { %1862 = vmatprep.subr.mxu0 %v2171_v0 }
 0x4ee   :  { %1863 = vmatpush3.msra.mxu0 %v370_v55 }
 0x4ef   :  { %1864 = vmatprep.subr.mxu0 %v2171_v0 }
 0x4f0   :  { %1865 = vmatpush3.msra.mxu0 %v365_v37 }
 0x4f1   :  { %1866 = vmatprep.subr.mxu0 %v2171_v0 }
 0x4f2   :  { %1867 = vmatpush3.msra.mxu0 %v360_v40 }
 0x4f3   :  { %1868 = vmatprep.subr.mxu0 %v2171_v0 }
 0x4f4   :  { %1869 = vmatpush3.msra.mxu0 %v355_v56 }
 0x4f5   :  { %1870 = vmatprep.subr.mxu0 %v2171_v0 }
 0x4f6   :  { %1871 = vmatpush3.msra.mxu0 %v350_v11 }
 0x4f7   :  { %1872 = vmatprep.subr.mxu0 %v2171_v0 }
 0x4f8   :  { %1873 = vmatpush3.msra.mxu0 %v345_v14 }
 0x4f9   :  { %1874 = vmatprep.subr.mxu0 %v2171_v0 }
 0x4fa   :  { %1875 = vmatpush3.msra.mxu0 %v340_v52 }
 0x4fb   :  { %1876 = vmatprep.subr.mxu0 %v2171_v0 }
 0x4fc   :  { %1877 = vmatpush3.msra.mxu0 %v335_v22 }
 0x4fd   :  { %1878 = vmatprep.subr.mxu0 %v2171_v0 }
 0x4fe   :  { %1879 = vmatpush3.msra.mxu0 %v330_v63 }
 0x4ff   :  { %1880 = vmatprep.subr.mxu0 %v2171_v0 }
 0x500   :  { %1881 = vmatpush3.msra.mxu0 %v325_v8 }
 0x501   :  { %1882 = vmatprep.subr.mxu0 %v2171_v0 }
 0x502   :  { %1883 = vmatpush3.msra.mxu0 %v320_v15 }
 0x503   :  { %1884 = vmatprep.subr.mxu0 %v2171_v0 }
 0x504   :  { %1885 = vmatpush3.msra.mxu0 %v315_v16 }
 0x505   :  { %1886 = vmatprep.subr.mxu0 %v2171_v0 }
 0x506   :  { %1887 = vmatpush3.msra.mxu0 %v310_v18 }
 0x507   :  { %1889 = vmatmul.mubr.f32.vlgmr.msra.gmra.mxu0 %v2588_v5  ;;  %v1265_v5 = vrot.slane %v386_v19, %v2415_v54  ;;  %v1273_v54 = vrot.slane %v386_v19, %v2441_v59 }
 0x567   :  { %v1416_v57 = vpop.f32.mrf.mxu0  ;;  %v1558_v58 = vpop.f32.mrf.mxu1 }
 0x568   :  { %v1417_v7 = vadd.f32 %v1416_v57, %v1346_v23 }
 0x569   :  { %v1418_v1 = vpop.f32.mrf.mxu0  ;;  %v1560_v39 = vpop.f32.mrf.mxu1 }
 0x56a   :  { %v1419_v17 = vadd.f32 %v1418_v1, %v1348_v3  ;;  %v1749_v24 = vmul.f32 -1.442695, %v1417_v7 }
 0x56c   :  { %v1750_v0 = vmul.f32 -1.442695, %v1419_v17 }
 0x56e   :  { %1975 = vpow2.f32 %v1750_v0 }
 0x56f   :  { %1977 = vpow2.f32 %v1749_v24 }
 0x57b   :  { %v1976_v47 = vpop.eup %1975 }
 0x57c   :  { %v1978_v26 = vpop.eup %1977  ;;  %v1713_v29 = vadd.f32 1.0, %v1976_v47 }
 0x57d   :  { %v1712_v30 = vadd.f32 1.0, %v1978_v26 }
 0x589   :  { %v1801_v31 = vpop.f32.mrf.mxu1 }
 0x58b   :  { %v1802_v42 = vpop.f32.mrf.mxu1 }
 0x58c   :  { %v1803_v2 = vadd.f32 %v1802_v42, %v1801_v31 }
 0x58e   :  { %v1630_v38 = vadd.f32 %v1803_v2, %v1273_v54 }
 0x5a7   :  { %v1487_v33 = vpop.f32.mrf.mxu0 }
 0x5a8   :  { %v1488_v53 = vadd.f32 %v1487_v33, %v1265_v5 }
 0x5a9   :  { %v1489_v32 = vpop.f32.mrf.mxu0 }
 0x5aa   :  { %v1559_v35 = vadd.f32 %v1558_v58, %v1488_v53  ;;  %v1490_v34 = vadd.f32 %v1489_v32, %v1269_v60 }
 0x5ac   :  { %v1751_v27 = vmul.f32 -1.442695, %v1559_v35  ;;  %v1561_v62 = vadd.f32 %v1560_v39, %v1490_v34 }
 0x5ae   :  { %1979 = vpow2.f32 %v1751_v27 }
 0x5af   :  { %1981 = vrcp.f32 %v1713_v29 }
 0x5b0   :  { %1983 = vrcp.f32 %v1712_v30 }
 0x5bb   :  { %v1980_v45 = vpop.eup %1979 }
 0x5bc   :  { %v1982_v43 = vpop.eup %1981  ;;  %v1714_v49 = vadd.f32 1.0, %v1980_v45 }
 0x5bd   :  { %v1984_v46 = vpop.eup %1983  ;;  %v1722_v25 = vmul.f32 %v1982_v43, %v127_v44 }
 0x5be   :  { %1985 = vrcp.f32 %v1714_v49 }
 0x5c7   :  { %v1699_v4 = vpop.f32.mrf.mxu0 }
 0x5c8   :  { %v1700_v41 = vadd.f32 %v1699_v4, %v1630_v38 }
 0x5c9   :  { %v1890_v48 = vpop.f32.mrf.mxu0 }
 0x5ca   :  { %v1721_v12 = vmax.f32 %v1561_v62, %v1700_v41 }
 0x5cb   :  { %v1986_v13 = vpop.eup %1985 }
 0x5cc   :  { %v1723_v61 = vmul.f32 %v1984_v46, %v1721_v12 }
 0x5ce   :  { %v1724_v51 = vadd.f32 %v1723_v61, %v1722_v25 }
 0x5d0   :  { %1987 = vtanh.f32 %v1724_v51  ;;  %1728 = vst [vmem:[#allocation14 + $0x8] sm:$0xff] %v1724_v51 }
 0x5dd   :  { %v1988_v59 = vpop.eup %1987 }
 0x5de   :  { %v1726_v6 = vmul.f32 %v1988_v59, %v1986_v13 }
 0x5e0   :  { %1727 = vst [vmem:[#allocation14] sm:$0xff] %v1726_v6 }
 0x5e1   :  { %2141 = shalt.err (!%p2138_p11)
}
 0x5e2   :  { %1738 = dma.vmem_to_hbm [thread:$0]  %s1736_s28, 256, %s2638_s10, [#allocation4]  }
 0x5e3   :  { %2158 = dma.done.wait [#allocation4], 256  }
 0x5e4   :  { %2159 = vsyncadd [#allocation4], 4294967040 }
 0x5e5   :  { %1742 = vsyncpa [#allocation3], 1 }
 0x5e6   :  { %1743 = vsyncpa [#allocation6], 1 }
 0x5e7   :  { %1744 = vsyncpa [#allocation9], 1 }
 0x5e8   :  { %1745 = vsyncpa [#allocation12], 1 }
 0x5e9   :  { %1746 = vsyncpa [#allocation4], 1 }

</bundles_post_ra>
